<compile_context>
chip_gen: v7x
topology: tpu7x:2x2x1
jax: 0.10.0
libtpu: 0.0.40
codegen_flags: <defaults>
</compile_context>

<pallas_src>
import functools

import jax
import jax.numpy as jnp
from jax.experimental import pallas as pl
from jax.experimental.pallas import tpu as pltpu

BN_EPS = 1e-5
LANE = 128


def _round_up(x, m):
    return (x + m - 1) // m * m


@functools.lru_cache(maxsize=None)
def _vmem_limit():
    """Generation-aware scoped-VMEM request (v5e/v6e: 128 MiB, v7x: 64 MiB)."""
    cap = 64 * 1024 * 1024
    try:
        cap = int(pltpu.get_tpu_info().vmem_capacity_bytes)
    except Exception:
        pass
    return max(32 * 1024 * 1024, min(int(cap * 0.7), 100 * 1024 * 1024))


def _pick_tile_h(H, W, cin_p, cout_p, budget):
    """Largest even H-tile (>=4, divides H) whose conv working set fits `budget`.

    Accounts for the double-buffered main/halo/output/stat blocks, the
    double-buffered weights, the f32 accumulators, and slicing temporaries.
    """
    if H < 4 or H % 2:
        # TODO(synk): fall back to masked edge tiles for odd / tiny heights.
        raise NotImplementedError("Up Pallas kernel expects an even output height >= 4")
    Wp = W + 2
    cands = [t for t in range(H, 3, -1) if H % t == 0 and t % 2 == 0]
    weight_bytes = 2 * 9 * cin_p * cout_p * 2            # bf16, double-buffered
    for t in cands:
        per_step = (2 * t * Wp * cin_p * 2                # main input block (bf16, 2x)
                    + 2 * 2 * Wp * cin_p * 2              # 2-row halo block (2x)
                    + 2 * t * W * cout_p * 2              # bf16 conv-out block (2x)
                    + 2 * 2 * cout_p * 4                  # stats block (2x)
                    + 2 * t * W * cout_p * 4              # f32 accumulators + epilogue
                    + 2 * t * W * cin_p * 2               # shifted-LHS temporaries
                    + 4 * Wp * cin_p * 2)                 # 4-row tail window
        if weight_bytes + per_step <= budget:
            return t
    return cands[-1]


def _pick_rows(M, cap_rows):
    """Row tile for the flattened BN/ReLU pass: whole array or a multiple of 8."""
    cap_rows = max(8, min(cap_rows, M))
    if cap_rows >= M:
        return M
    return max(8, (cap_rows // 8) * 8)


# ---------------------------------------------------------------------------
# Pallas kernel 1: 3x3 conv (9 accumulated MXU dots) + per-tile BN partials
# ---------------------------------------------------------------------------
def _conv3x3_kernel(xm_ref, xh_ref, w_ref, y_ref, st_ref):
    # xm_ref: (1, tH, Wp, Cp)   bf16, padded-input rows [h*tH, h*tH + tH)
    # xh_ref: (1, 2,  Wp, Cp)   bf16, rows [(h+1)*tH, (h+1)*tH + 2): the halo
    # w_ref : (9, Cp, Coutp)    bf16, tap-major weights (k = dy*3 + dx)
    # y_ref : (1, tH, W, Coutp) bf16, raw conv output tile (lane-dense)
    # st_ref: (1, 1, 2, Coutp)  f32,  per-tile [sum, sum_of_squares]
    _, tH, Wp, Cp = xm_ref.shape
    _, _, W, Coutp = y_ref.shape
    nb = tH - 2                                            # "bulk" output rows

    xm = xm_ref[0]                                         # (tH, Wp, Cp)
    # 4-row window covering the last 2 output rows: last 2 main rows + 2 halo
    # rows.  This tiny copy replaces the old full (tH+2)-row concat.
    tail_win = jnp.concatenate([xm[nb:], xh_ref[0]], axis=0)   # (4, Wp, Cp)

    # Output rows [0, nb)  use input rows [dy, nb + dy)   -> always inside xm.
    # Output rows [nb, tH) use input rows [nb + dy, tH+dy) -> inside tail_win.
    bulk = None                                            # (nb*W, Coutp) f32
    tail = None                                            # (2*W,  Coutp) f32
    for dy in range(3):
        for dx in range(3):
            w = w_ref[dy * 3 + dx]                         # (Cp, Coutp) bf16
            lb = xm[dy:dy + nb, dx:dx + W, :].reshape(nb * W, Cp)
            lt = tail_win[dy:dy + 2, dx:dx + W, :].reshape(2 * W, Cp)
            pb = jnp.dot(lb, w, preferred_element_type=jnp.float32)
            pt = jnp.dot(lt, w, preferred_element_type=jnp.float32)
            bulk = pb if bulk is None else bulk + pb
            tail = pt if tail is None else tail + pt

    y_ref[0, :nb, :, :] = bulk.reshape(nb, W, Coutp).astype(y_ref.dtype)
    y_ref[0, nb:, :, :] = tail.reshape(2, W, Coutp).astype(y_ref.dtype)

    # Partial BatchNorm statistics from the f32 accumulators; finalized
    # globally outside the kernel so statistics stay global over (N, H, W).
    s1 = jnp.sum(bulk, axis=0, keepdims=True) + jnp.sum(tail, axis=0, keepdims=True)
    s2 = (jnp.sum(bulk * bulk, axis=0, keepdims=True)
          + jnp.sum(tail * tail, axis=0, keepdims=True))
    st_ref[...] = jnp.concatenate([s1, s2], axis=0).reshape(1, 1, 2, Coutp)


def _conv3x3_partial(xp, wmat, H, W, tile_h):
    """Tiled 3x3 conv over a spatially padded NHWC bf16 input.

    xp   : (N, H + 2, W + 2, Cp) bf16  (1-pixel zero halo on each side)
    wmat : (9, Cp, Coutp)        bf16
    Returns raw bf16 conv output (N, H, W, Coutp) and per-tile statistics
    (N, num_h, 2, Coutp) holding [sum, sum_sq] along axis 2.
    """
    N, _, Wp, Cp = xp.shape
    _, _, Coutp = wmat.shape
    num_h = H // tile_h

    flops = 2 * N * H * W * 9 * Cp * Coutp
    bytes_accessed = (xp.size * 2 + N * num_h * 2 * Wp * Cp * 2 + wmat.size * 2
                      + N * H * W * Coutp * 2 + N * num_h * 2 * Coutp * 4)

    return pl.pallas_call(
        _conv3x3_kernel,
        out_shape=(
            jax.ShapeDtypeStruct((N, H, W, Coutp), jnp.bfloat16),
            jax.ShapeDtypeStruct((N, num_h, 2, Coutp), jnp.float32),
        ),
        grid=(N, num_h),
        in_specs=[
            pl.BlockSpec((1, tile_h, Wp, Cp), lambda n, h: (n, h, 0, 0)),
            pl.BlockSpec((1, 2, Wp, Cp),
                         lambda n, h: (n, (h + 1) * (tile_h // 2), 0, 0)),
            pl.BlockSpec((9, Cp, Coutp), lambda n, h: (0, 0, 0)),
        ],
        out_specs=(
            pl.BlockSpec((1, tile_h, W, Coutp), lambda n, h: (n, h, 0, 0)),
            pl.BlockSpec((1, 1, 2, Coutp), lambda n, h: (n, h, 0, 0)),
        ),
        compiler_params=pltpu.CompilerParams(
            dimension_semantics=("parallel", "parallel"),
            vmem_limit_bytes=_vmem_limit()),
        cost_estimate=pl.CostEstimate(
            flops=flops, transcendentals=0, bytes_accessed=bytes_accessed),
    )(xp, xp, wmat)


# ---------------------------------------------------------------------------
# Pallas kernel 2: BatchNorm scale/shift + ReLU (flattened, big lane-dense tiles)
# ---------------------------------------------------------------------------
def _bn_relu_kernel(x_ref, sc_ref, sh_ref, o_ref):
    y = x_ref[...].astype(jnp.float32) * sc_ref[...] + sh_ref[...]
    o_ref[...] = jnp.maximum(y, 0.0).astype(o_ref.dtype)


def _bn_relu(y_raw, scale, shift, out_dtype):
    """Memory-bound pass: uses its own (large) row tiling over (N*H*W, Cp)."""
    N, H, W, Cp = y_raw.shape
    M = N * H * W
    x2d = y_raw.reshape(M, Cp)
    in_b = jnp.dtype(y_raw.dtype).itemsize
    out_b = jnp.dtype(out_dtype).itemsize

    budget = int(_vmem_limit() * 0.8)
    cap_rows = budget // (2 * Cp * (in_b + out_b))
    tm = _pick_rows(M, cap_rows)
    grid = (pl.cdiv(M, tm),)

    out = pl.pallas_call(
        _bn_relu_kernel,
        out_shape=jax.ShapeDtypeStruct((M, Cp), out_dtype),
        grid=grid,
        in_specs=[
            pl.BlockSpec((tm, Cp), lambda i: (i, 0)),
            pl.BlockSpec((1, Cp), lambda i: (0, 0)),
            pl.BlockSpec((1, Cp), lambda i: (0, 0)),
        ],
        out_specs=pl.BlockSpec((tm, Cp), lambda i: (i, 0)),
        compiler_params=pltpu.CompilerParams(
            dimension_semantics=("parallel",),
            vmem_limit_bytes=_vmem_limit()),
        cost_estimate=pl.CostEstimate(
            flops=2 * M * Cp, transcendentals=0,
            bytes_accessed=M * Cp * (in_b + out_b) + 2 * Cp * 4),
    )(x2d, scale.reshape(1, Cp), shift.reshape(1, Cp))
    return out.reshape(N, H, W, Cp)


def _finalize_bn(stats, gamma_p, beta_p, count):
    """Training-mode BatchNorm: global biased variance over (N, H, W)."""
    s1 = jnp.sum(stats[:, :, 0, :], axis=(0, 1))
    s2 = jnp.sum(stats[:, :, 1, :], axis=(0, 1))
    mean = s1 / count
    var = jnp.maximum(s2 / count - mean * mean, 0.0)
    scale = gamma_p * jax.lax.rsqrt(var + BN_EPS)
    shift = beta_p - mean * scale
    return scale, shift


def _prep_conv_params(w_hwio, gamma, beta, cin_p, cout_p):
    """Pad channels to 128 multiples and build the (9, Cp, Coutp) tap-major weights."""
    # TODO(synk): for tiny channel counts, pack (tap, real_cin) into K before
    # padding (K = round_up(9*cin, 128)) instead of padding each tap to 128.
    kh, kw, cin, cout = w_hwio.shape
    w = jnp.zeros((kh * kw, cin_p, cout_p), jnp.float32)
    w = w.at[:, :cin, :cout].set(
        w_hwio.reshape(kh * kw, cin, cout).astype(jnp.float32))
    g = jnp.zeros((cout_p,), jnp.float32).at[:cout].set(gamma)
    b = jnp.zeros((cout_p,), jnp.float32).at[:cout].set(beta)
    return w.astype(jnp.bfloat16), g, b


# ---------------------------------------------------------------------------
# Plain-JAX glue: bilinear x2 upsample (align_corners=True), pad, concat (NHWC)
# ---------------------------------------------------------------------------
def _upsample2x_bilinear_nhwc(x):
    """Matches nn.Upsample(scale_factor=2, mode='bilinear', align_corners=True)."""
    N, H, W, C = x.shape
    Ho, Wo = 2 * H, 2 * W

    def coords(n_in, n_out):
        if n_in == 1:
            z = jnp.zeros((n_out,), jnp.int32)
            return z, z, jnp.zeros((n_out,), jnp.float32)
        s = jnp.arange(n_out, dtype=jnp.float32) * (n_in - 1) / (n_out - 1)
        i0 = jnp.clip(jnp.floor(s).astype(jnp.int32), 0, n_in - 2)
        return i0, i0 + 1, s - i0.astype(jnp.float32)

    y0, y1, wy = coords(H, Ho)
    x0, x1, wx = coords(W, Wo)
    wy = wy[None, :, None, None]
    top = x[:, y0, :, :] * (1.0 - wy) + x[:, y1, :, :] * wy
    wx = wx[None, None, :, None]
    return top[:, :, x0, :] * (1.0 - wx) + top[:, :, x1, :] * wx


def _merge_skip(x1_nchw, x2_nchw):
    """Upsample x1, F.pad to x2's spatial size, concat channels -> NHWC f32."""
    # TODO(synk): the upsample / pad / concat could be folded into the first
    # conv's input pipeline (gather DMA + split-K), avoiding the XLA passes.
    x1 = jnp.transpose(x1_nchw, (0, 2, 3, 1))
    x2 = jnp.transpose(x2_nchw, (0, 2, 3, 1))
    x1 = _upsample2x_bilinear_nhwc(x1)
    diff_y = x2.shape[1] - x1.shape[1]
    diff_x = x2.shape[2] - x1.shape[2]
    x1 = jnp.pad(x1, ((0, 0),
                      (diff_y // 2, diff_y - diff_y // 2),
                      (diff_x // 2, diff_x - diff_x // 2),
                      (0, 0)))
    return jnp.concatenate([x2, x1], axis=-1)          # torch.cat([x2, x1], dim=1)


# ---------------------------------------------------------------------------
# Up.forward
# ---------------------------------------------------------------------------
def up_forward(params, x1_nchw, x2_nchw):
    """Up(bilinear=True).forward(x1, x2); x1/x2 NCHW f32, returns NCHW f32."""
    x = _merge_skip(x1_nchw, x2_nchw)                  # (N, H, W, Cin) f32
    N, H, W, cin = x.shape
    cmid = params["w1"].shape[-1]
    cout = params["w2"].shape[-1]
    cin_p, cmid_p, cout_p = (_round_up(c, LANE) for c in (cin, cmid, cout))

    wmat1, g1, b1 = _prep_conv_params(params["w1"], params["g1"], params["b1"],
                                      cin_p, cmid_p)
    wmat2, g2, b2 = _prep_conv_params(params["w2"], params["g2"], params["b2"],
                                      cmid_p, cout_p)

    budget = int(_vmem_limit() * 0.9)
    tile1 = _pick_tile_h(H, W, cin_p, cmid_p, budget)
    tile2 = _pick_tile_h(H, W, cmid_p, cout_p, budget)
    count = N * H * W

    # ---- conv1 + BN1 + ReLU (bf16 activations, f32 accumulation) ----
    xp = jnp.pad(x.astype(jnp.bfloat16),
                 ((0, 0), (1, 1), (1, 1), (0, cin_p - cin)))
    y1, st1 = _conv3x3_partial(xp, wmat1, H, W, tile1)     # bf16 raw conv out
    sc1, sh1 = _finalize_bn(st1, g1, b1, count)
    h1 = _bn_relu(y1, sc1, sh1, jnp.bfloat16)              # (N, H, W, cmid_p) bf16

    # ---- conv2 + BN2 + ReLU ----
    # TODO(synk): fuse BN1/ReLU and the zero halo into conv2's input pipeline to
    # drop the remaining inter-conv HBM round-trip (pad copy + separate pass).
    hp = jnp.pad(h1, ((0, 0), (1, 1), (1, 1), (0, 0)))
    y2, st2 = _conv3x3_partial(hp, wmat2, H, W, tile2)
    sc2, sh2 = _finalize_bn(st2, g2, b2, count)
    out = _bn_relu(y2, sc2, sh2, jnp.float32)              # (N, H, W, cout_p) f32

    out = out[..., :cout]
    return jnp.transpose(out, (0, 3, 1, 2))                # NHWC -> NCHW


# ---------------------------------------------------------------------------
# Pure-XLA reference (same bf16 matmul inputs) for a self-check
# ---------------------------------------------------------------------------
def _reference_forward(params, x1_nchw, x2_nchw):
    x = _merge_skip(x1_nchw, x2_nchw)

    def conv_bn_relu(x, w, g, b):
        y = jax.lax.conv_general_dilated(
            x.astype(jnp.bfloat16), w.astype(jnp.bfloat16),
            window_strides=(1, 1), padding="SAME",
            dimension_numbers=("NHWC", "HWIO", "NHWC"),
            preferred_element_type=jnp.float32)
        mean = jnp.mean(y, axis=(0, 1, 2))
        var = jnp.mean(jnp.square(y - mean), axis=(0, 1, 2))
        y = (y - mean) * jax.lax.rsqrt(var + BN_EPS) * g + b
        return jnp.maximum(y, 0.0)

    h = conv_bn_relu(x, params["w1"], params["g1"], params["b1"])
    h = conv_bn_relu(h, params["w2"], params["g2"], params["b2"])
    return jnp.transpose(h, (0, 3, 1, 2))


# ---------------------------------------------------------------------------
# Deterministic parameter init (shapes from Up(in_channels, out_channels, True))
# ---------------------------------------------------------------------------
def init_params(key, in_channels, out_channels):
    mid_channels = in_channels // 2            # DoubleConv(in, out, in // 2)
    k1, k2, k3, k4 = jax.random.split(key, 4)
    w1 = jax.random.normal(k1, (3, 3, in_channels, mid_channels), jnp.float32) * 0.1
    w2 = jax.random.normal(k2, (3, 3, mid_channels, out_channels), jnp.float32) * 0.1
    g1 = 1.0 + 0.1 * jax.random.normal(k3, (mid_channels,), jnp.float32)
    b1 = jnp.zeros((mid_channels,), jnp.float32)
    g2 = 1.0 + 0.1 * jax.random.normal(k4, (out_channels,), jnp.float32)
    b2 = jnp.zeros((out_channels,), jnp.float32)
    return {"w1": w1, "g1": g1, "b1": b1, "w2": w2, "g2": g2, "b2": b2}


if __name__ == "__main__":
    key = jax.random.PRNGKey(0)
    kx1, kx2, kp = jax.random.split(key, 3)

    in_channels, out_channels = 8, 4
    N = 2
    # Standard U-Net Up usage: x1 has in_channels//2 ch at half resolution,
    # x2 has in_channels//2 ch at full resolution -> concat = in_channels ch.
    x1 = jax.random.normal(kx1, (N, in_channels // 2, 8, 8), jnp.float32)
    x2 = jax.random.normal(kx2, (N, in_channels // 2, 16, 16), jnp.float32)
    params = init_params(kp, in_channels, out_channels)

    fwd = jax.jit(functools.partial(up_forward, params))
    out = fwd(x1, x2)
    jax.block_until_ready(out)

    assert out.shape == (N, out_channels, 16, 16), out.shape
    assert bool(jnp.all(jnp.isfinite(out)))

    ref = _reference_forward(params, x1, x2)
    err = float(jnp.max(jnp.abs(out - ref)))
    assert err < 5e-2, f"max abs error vs XLA reference: {err}"
    print("KERNEL_OK")
</pallas_src>

<mosaic_0001>
module attributes {stable_mosaic.version = 11 : i64} {
  func.func @_bn_relu_kernel(%arg0: i32, %arg1: memref<512x128xbf16, #tpu.memory_space<vmem>>, %arg2: memref<1x128xf32, #tpu.memory_space<vmem>>, %arg3: memref<1x128xf32, #tpu.memory_space<vmem>>, %arg4: memref<512x128xbf16, #tpu.memory_space<vmem>>) attributes {dimension_semantics = [#tpu.dimension_semantics<parallel>], iteration_bounds = array<i64: 1>, scalar_prefetch = 0 : i64, scratch_operands = 0 : i64, tpu.core_type = #tpu.core_type<tc>, window_params = [{transform_indices = @transform_0, window_bounds = array<i64: 512, 128>}, {pipeline_mode = #tpu.pipeline_mode<synchronous>, transform_indices = @transform_1, window_bounds = array<i64: 1, 128>}, {pipeline_mode = #tpu.pipeline_mode<synchronous>, transform_indices = @transform_2, window_bounds = array<i64: 1, 128>}, {transform_indices = @transform_3, window_bounds = array<i64: 512, 128>}]} {
    %c0 = arith.constant 0 : index
    %c0_0 = arith.constant 0 : index
    %0 = vector.load %arg1[%c0, %c0_0] : memref<512x128xbf16, #tpu.memory_space<vmem>>, vector<512x128xbf16>
    %1 = arith.extf %0 : vector<512x128xbf16> to vector<512x128xf32>
    %c0_1 = arith.constant 0 : index
    %c0_2 = arith.constant 0 : index
    %2 = vector.load %arg2[%c0_1, %c0_2] : memref<1x128xf32, #tpu.memory_space<vmem>>, vector<1x128xf32>
    %3 = vector.broadcast %2 : vector<1x128xf32> to vector<512x128xf32>
    %4 = arith.mulf %1, %3 : vector<512x128xf32>
    %c0_3 = arith.constant 0 : index
    %c0_4 = arith.constant 0 : index
    %5 = vector.load %arg3[%c0_3, %c0_4] : memref<1x128xf32, #tpu.memory_space<vmem>>, vector<1x128xf32>
    %6 = vector.broadcast %5 : vector<1x128xf32> to vector<512x128xf32>
    %7 = arith.addf %4, %6 : vector<512x128xf32>
    %cst = arith.constant 0.000000e+00 : f32
    %8 = vector.broadcast %cst : f32 to vector<512x128xf32>
    %9 = arith.maximumf %7, %8 : vector<512x128xf32>
    %10 = arith.truncf %9 : vector<512x128xf32> to vector<512x128xbf16>
    %c0_5 = arith.constant 0 : index
    %c0_6 = arith.constant 0 : index
    %11 = vector.load %arg4[%c0_5, %c0_6] : memref<512x128xbf16, #tpu.memory_space<vmem>>, vector<512x128xbf16>
    tpu.vector_store %arg4[%c0_5, %c0_6], %10 {strides = array<i32>} : memref<512x128xbf16, #tpu.memory_space<vmem>>, vector<512x128xbf16>,
    return
  }
  func.func @transform_0(%arg0: i32) -> (i32, i32) {
    %c0_i32 = arith.constant 0 : i32
    %c0_i32_0 = arith.constant 0 : i32
    return %arg0, %c0_i32 : i32, i32
  }
  func.func @transform_1(%arg0: i32) -> (i32, i32) {
    %c0_i32 = arith.constant 0 : i32
    %c0_i32_0 = arith.constant 0 : i32
    %c0_i32_1 = arith.constant 0 : i32
    return %c0_i32, %c0_i32_0 : i32, i32
  }
  func.func @transform_2(%arg0: i32) -> (i32, i32) {
    %c0_i32 = arith.constant 0 : i32
    %c0_i32_0 = arith.constant 0 : i32
    %c0_i32_1 = arith.constant 0 : i32
    return %c0_i32, %c0_i32_0 : i32, i32
  }
  func.func @transform_3(%arg0: i32) -> (i32, i32) {
    %c0_i32 = arith.constant 0 : i32
    %c0_i32_0 = arith.constant 0 : i32
    return %arg0, %c0_i32 : i32, i32
  }
}

module attributes {stable_mosaic.version = 11 : i64} {
  func.func @_conv3x3_kernel(%arg0: i32, %arg1: i32, %arg2: memref<1x16x18x128xbf16, #tpu.memory_space<vmem>>, %arg3: memref<1x2x18x128xbf16, #tpu.memory_space<vmem>>, %arg4: memref<9x128x128xbf16, #tpu.memory_space<vmem>>, %arg5: memref<1x16x16x128xbf16, #tpu.memory_space<vmem>>, %arg6: memref<1x1x2x128xf32, #tpu.memory_space<vmem>>) attributes {dimension_semantics = [#tpu.dimension_semantics<parallel>, #tpu.dimension_semantics<parallel>], iteration_bounds = array<i64: 2, 1>, scalar_prefetch = 0 : i64, scratch_operands = 0 : i64, tpu.core_type = #tpu.core_type<tc>, window_params = [{transform_indices = @transform_0, window_bounds = array<i64: 1, 16, 18, 128>}, {transform_indices = @transform_1, window_bounds = array<i64: 1, 2, 18, 128>}, {pipeline_mode = #tpu.pipeline_mode<synchronous>, transform_indices = @transform_2, window_bounds = array<i64: 9, 128, 128>}, {transform_indices = @transform_3, window_bounds = array<i64: 1, 16, 16, 128>}, {transform_indices = @transform_4, window_bounds = array<i64: 1, 1, 2, 128>}]} {
    %c0 = arith.constant 0 : index
    %c0_0 = arith.constant 0 : index
    %c0_1 = arith.constant 0 : index
    %c0_2 = arith.constant 0 : index
    %0 = vector.load %arg2[%c0, %c0_0, %c0_1, %c0_2] : memref<1x16x18x128xbf16, #tpu.memory_space<vmem>>, vector<1x16x18x128xbf16>
    %1 = vector.shape_cast %0 : vector<1x16x18x128xbf16> to vector<16x18x128xbf16>
    %2 = vector.extract_strided_slice %1 {offsets = [14, 0, 0], sizes = [2, 18, 128], strides = [1, 1, 1]} : vector<16x18x128xbf16> to vector<2x18x128xbf16>
    %c0_3 = arith.constant 0 : index
    %c0_4 = arith.constant 0 : index
    %c0_5 = arith.constant 0 : index
    %c0_6 = arith.constant 0 : index
    %3 = vector.load %arg3[%c0_3, %c0_4, %c0_5, %c0_6] : memref<1x2x18x128xbf16, #tpu.memory_space<vmem>>, vector<1x2x18x128xbf16>
    %4 = vector.shape_cast %3 : vector<1x2x18x128xbf16> to vector<2x18x128xbf16>
    %5 = tpu.concatenate %2, %4 in 0 : vector<2x18x128xbf16>, vector<2x18x128xbf16> -> vector<4x18x128xbf16>
    %c0_7 = arith.constant 0 : index
    %c0_8 = arith.constant 0 : index
    %c0_9 = arith.constant 0 : index
    %6 = vector.load %arg4[%c0_7, %c0_8, %c0_9] : memref<9x128x128xbf16, #tpu.memory_space<vmem>>, vector<1x128x128xbf16>
    %7 = vector.shape_cast %6 : vector<1x128x128xbf16> to vector<128x128xbf16>
    %8 = vector.extract_strided_slice %1 {offsets = [0, 0, 0], sizes = [14, 16, 128], strides = [1, 1, 1]} : vector<16x18x128xbf16> to vector<14x16x128xbf16>
    %9 = vector.shape_cast %8 : vector<14x16x128xbf16> to vector<224x128xbf16>
    %10 = vector.extract_strided_slice %5 {offsets = [0, 0, 0], sizes = [2, 16, 128], strides = [1, 1, 1]} : vector<4x18x128xbf16> to vector<2x16x128xbf16>
    %11 = vector.shape_cast %10 : vector<2x16x128xbf16> to vector<32x128xbf16>
    %cst = arith.constant dense<0.000000e+00> : vector<224x128xf32>
    %12 = tpu.matmul %9, %7, %cst {dimension_numbers = #tpu.dot_dimension_numbers<[1], [0], [0], [1], [0, 0, 1, 1], [], []>} : vector<224x128xbf16>, vector<128x128xbf16>, vector<224x128xf32> -> vector<224x128xf32>
    %cst_10 = arith.constant dense<0.000000e+00> : vector<32x128xf32>
    %13 = tpu.matmul %11, %7, %cst_10 {dimension_numbers = #tpu.dot_dimension_numbers<[1], [0], [0], [1], [0, 0, 1, 1], [], []>} : vector<32x128xbf16>, vector<128x128xbf16>, vector<32x128xf32> -> vector<32x128xf32>
    %c1 = arith.constant 1 : index
    %c0_11 = arith.constant 0 : index
    %c0_12 = arith.constant 0 : index
    %14 = vector.load %arg4[%c1, %c0_11, %c0_12] : memref<9x128x128xbf16, #tpu.memory_space<vmem>>, vector<1x128x128xbf16>
    %15 = vector.shape_cast %14 : vector<1x128x128xbf16> to vector<128x128xbf16>
    %16 = vector.extract_strided_slice %1 {offsets = [0, 1, 0], sizes = [14, 16, 128], strides = [1, 1, 1]} : vector<16x18x128xbf16> to vector<14x16x128xbf16>
    %17 = vector.shape_cast %16 : vector<14x16x128xbf16> to vector<224x128xbf16>
    %18 = vector.extract_strided_slice %5 {offsets = [0, 1, 0], sizes = [2, 16, 128], strides = [1, 1, 1]} : vector<4x18x128xbf16> to vector<2x16x128xbf16>
    %19 = vector.shape_cast %18 : vector<2x16x128xbf16> to vector<32x128xbf16>
    %cst_13 = arith.constant dense<0.000000e+00> : vector<224x128xf32>
    %20 = tpu.matmul %17, %15, %cst_13 {dimension_numbers = #tpu.dot_dimension_numbers<[1], [0], [0], [1], [0, 0, 1, 1], [], []>} : vector<224x128xbf16>, vector<128x128xbf16>, vector<224x128xf32> -> vector<224x128xf32>
    %cst_14 = arith.constant dense<0.000000e+00> : vector<32x128xf32>
    %21 = tpu.matmul %19, %15, %cst_14 {dimension_numbers = #tpu.dot_dimension_numbers<[1], [0], [0], [1], [0, 0, 1, 1], [], []>} : vector<32x128xbf16>, vector<128x128xbf16>, vector<32x128xf32> -> vector<32x128xf32>
    %22 = arith.addf %12, %20 : vector<224x128xf32>
    %23 = arith.addf %13, %21 : vector<32x128xf32>
    %c2 = arith.constant 2 : index
    %c0_15 = arith.constant 0 : index
    %c0_16 = arith.constant 0 : index
    %24 = vector.load %arg4[%c2, %c0_15, %c0_16] : memref<9x128x128xbf16, #tpu.memory_space<vmem>>, vector<1x128x128xbf16>
    %25 = vector.shape_cast %24 : vector<1x128x128xbf16> to vector<128x128xbf16>
    %26 = vector.extract_strided_slice %1 {offsets = [0, 2, 0], sizes = [14, 16, 128], strides = [1, 1, 1]} : vector<16x18x128xbf16> to vector<14x16x128xbf16>
    %27 = vector.shape_cast %26 : vector<14x16x128xbf16> to vector<224x128xbf16>
    %28 = vector.extract_strided_slice %5 {offsets = [0, 2, 0], sizes = [2, 16, 128], strides = [1, 1, 1]} : vector<4x18x128xbf16> to vector<2x16x128xbf16>
    %29 = vector.shape_cast %28 : vector<2x16x128xbf16> to vector<32x128xbf16>
    %cst_17 = arith.constant dense<0.000000e+00> : vector<224x128xf32>
    %30 = tpu.matmul %27, %25, %cst_17 {dimension_numbers = #tpu.dot_dimension_numbers<[1], [0], [0], [1], [0, 0, 1, 1], [], []>} : vector<224x128xbf16>, vector<128x128xbf16>, vector<224x128xf32> -> vector<224x128xf32>
    %cst_18 = arith.constant dense<0.000000e+00> : vector<32x128xf32>
    %31 = tpu.matmul %29, %25, %cst_18 {dimension_numbers = #tpu.dot_dimension_numbers<[1], [0], [0], [1], [0, 0, 1, 1], [], []>} : vector<32x128xbf16>, vector<128x128xbf16>, vector<32x128xf32> -> vector<32x128xf32>
    %32 = arith.addf %22, %30 : vector<224x128xf32>
    %33 = arith.addf %23, %31 : vector<32x128xf32>
    %c3 = arith.constant 3 : index
    %c0_19 = arith.constant 0 : index
    %c0_20 = arith.constant 0 : index
    %34 = vector.load %arg4[%c3, %c0_19, %c0_20] : memref<9x128x128xbf16, #tpu.memory_space<vmem>>, vector<1x128x128xbf16>
    %35 = vector.shape_cast %34 : vector<1x128x128xbf16> to vector<128x128xbf16>
    %36 = vector.extract_strided_slice %1 {offsets = [1, 0, 0], sizes = [14, 16, 128], strides = [1, 1, 1]} : vector<16x18x128xbf16> to vector<14x16x128xbf16>
    %37 = vector.shape_cast %36 : vector<14x16x128xbf16> to vector<224x128xbf16>
    %38 = vector.extract_strided_slice %5 {offsets = [1, 0, 0], sizes = [2, 16, 128], strides = [1, 1, 1]} : vector<4x18x128xbf16> to vector<2x16x128xbf16>
    %39 = vector.shape_cast %38 : vector<2x16x128xbf16> to vector<32x128xbf16>
    %cst_21 = arith.constant dense<0.000000e+00> : vector<224x128xf32>
    %40 = tpu.matmul %37, %35, %cst_21 {dimension_numbers = #tpu.dot_dimension_numbers<[1], [0], [0], [1], [0, 0, 1, 1], [], []>} : vector<224x128xbf16>, vector<128x128xbf16>, vector<224x128xf32> -> vector<224x128xf32>
    %cst_22 = arith.constant dense<0.000000e+00> : vector<32x128xf32>
    %41 = tpu.matmul %39, %35, %cst_22 {dimension_numbers = #tpu.dot_dimension_numbers<[1], [0], [0], [1], [0, 0, 1, 1], [], []>} : vector<32x128xbf16>, vector<128x128xbf16>, vector<32x128xf32> -> vector<32x128xf32>
    %42 = arith.addf %32, %40 : vector<224x128xf32>
    %43 = arith.addf %33, %41 : vector<32x128xf32>
    %c4 = arith.constant 4 : index
    %c0_23 = arith.constant 0 : index
    %c0_24 = arith.constant 0 : index
    %44 = vector.load %arg4[%c4, %c0_23, %c0_24] : memref<9x128x128xbf16, #tpu.memory_space<vmem>>, vector<1x128x128xbf16>
    %45 = vector.shape_cast %44 : vector<1x128x128xbf16> to vector<128x128xbf16>
    %46 = vector.extract_strided_slice %1 {offsets = [1, 1, 0], sizes = [14, 16, 128], strides = [1, 1, 1]} : vector<16x18x128xbf16> to vector<14x16x128xbf16>
    %47 = vector.shape_cast %46 : vector<14x16x128xbf16> to vector<224x128xbf16>
    %48 = vector.extract_strided_slice %5 {offsets = [1, 1, 0], sizes = [2, 16, 128], strides = [1, 1, 1]} : vector<4x18x128xbf16> to vector<2x16x128xbf16>
    %49 = vector.shape_cast %48 : vector<2x16x128xbf16> to vector<32x128xbf16>
    %cst_25 = arith.constant dense<0.000000e+00> : vector<224x128xf32>
    %50 = tpu.matmul %47, %45, %cst_25 {dimension_numbers = #tpu.dot_dimension_numbers<[1], [0], [0], [1], [0, 0, 1, 1], [], []>} : vector<224x128xbf16>, vector<128x128xbf16>, vector<224x128xf32> -> vector<224x128xf32>
    %cst_26 = arith.constant dense<0.000000e+00> : vector<32x128xf32>
    %51 = tpu.matmul %49, %45, %cst_26 {dimension_numbers = #tpu.dot_dimension_numbers<[1], [0], [0], [1], [0, 0, 1, 1], [], []>} : vector<32x128xbf16>, vector<128x128xbf16>, vector<32x128xf32> -> vector<32x128xf32>
    %52 = arith.addf %42, %50 : vector<224x128xf32>
    %53 = arith.addf %43, %51 : vector<32x128xf32>
    %c5 = arith.constant 5 : index
    %c0_27 = arith.constant 0 : index
    %c0_28 = arith.constant 0 : index
    %54 = vector.load %arg4[%c5, %c0_27, %c0_28] : memref<9x128x128xbf16, #tpu.memory_space<vmem>>, vector<1x128x128xbf16>
    %55 = vector.shape_cast %54 : vector<1x128x128xbf16> to vector<128x128xbf16>
    %56 = vector.extract_strided_slice %1 {offsets = [1, 2, 0], sizes = [14, 16, 128], strides = [1, 1, 1]} : vector<16x18x128xbf16> to vector<14x16x128xbf16>
    %57 = vector.shape_cast %56 : vector<14x16x128xbf16> to vector<224x128xbf16>
    %58 = vector.extract_strided_slice %5 {offsets = [1, 2, 0], sizes = [2, 16, 128], strides = [1, 1, 1]} : vector<4x18x128xbf16> to vector<2x16x128xbf16>
    %59 = vector.shape_cast %58 : vector<2x16x128xbf16> to vector<32x128xbf16>
    %cst_29 = arith.constant dense<0.000000e+00> : vector<224x128xf32>
    %60 = tpu.matmul %57, %55, %cst_29 {dimension_numbers = #tpu.dot_dimension_numbers<[1], [0], [0], [1], [0, 0, 1, 1], [], []>} : vector<224x128xbf16>, vector<128x128xbf16>, vector<224x128xf32> -> vector<224x128xf32>
    %cst_30 = arith.constant dense<0.000000e+00> : vector<32x128xf32>
    %61 = tpu.matmul %59, %55, %cst_30 {dimension_numbers = #tpu.dot_dimension_numbers<[1], [0], [0], [1], [0, 0, 1, 1], [], []>} : vector<32x128xbf16>, vector<128x128xbf16>, vector<32x128xf32> -> vector<32x128xf32>
    %62 = arith.addf %52, %60 : vector<224x128xf32>
    %63 = arith.addf %53, %61 : vector<32x128xf32>
    %c6 = arith.constant 6 : index
    %c0_31 = arith.constant 0 : index
    %c0_32 = arith.constant 0 : index
    %64 = vector.load %arg4[%c6, %c0_31, %c0_32] : memref<9x128x128xbf16, #tpu.memory_space<vmem>>, vector<1x128x128xbf16>
    %65 = vector.shape_cast %64 : vector<1x128x128xbf16> to vector<128x128xbf16>
    %66 = vector.extract_strided_slice %1 {offsets = [2, 0, 0], sizes = [14, 16, 128], strides = [1, 1, 1]} : vector<16x18x128xbf16> to vector<14x16x128xbf16>
    %67 = vector.shape_cast %66 : vector<14x16x128xbf16> to vector<224x128xbf16>
    %68 = vector.extract_strided_slice %5 {offsets = [2, 0, 0], sizes = [2, 16, 128], strides = [1, 1, 1]} : vector<4x18x128xbf16> to vector<2x16x128xbf16>
    %69 = vector.shape_cast %68 : vector<2x16x128xbf16> to vector<32x128xbf16>
    %cst_33 = arith.constant dense<0.000000e+00> : vector<224x128xf32>
    %70 = tpu.matmul %67, %65, %cst_33 {dimension_numbers = #tpu.dot_dimension_numbers<[1], [0], [0], [1], [0, 0, 1, 1], [], []>} : vector<224x128xbf16>, vector<128x128xbf16>, vector<224x128xf32> -> vector<224x128xf32>
    %cst_34 = arith.constant dense<0.000000e+00> : vector<32x128xf32>
    %71 = tpu.matmul %69, %65, %cst_34 {dimension_numbers = #tpu.dot_dimension_numbers<[1], [0], [0], [1], [0, 0, 1, 1], [], []>} : vector<32x128xbf16>, vector<128x128xbf16>, vector<32x128xf32> -> vector<32x128xf32>
    %72 = arith.addf %62, %70 : vector<224x128xf32>
    %73 = arith.addf %63, %71 : vector<32x128xf32>
    %c7 = arith.constant 7 : index
    %c0_35 = arith.constant 0 : index
    %c0_36 = arith.constant 0 : index
    %74 = vector.load %arg4[%c7, %c0_35, %c0_36] : memref<9x128x128xbf16, #tpu.memory_space<vmem>>, vector<1x128x128xbf16>
    %75 = vector.shape_cast %74 : vector<1x128x128xbf16> to vector<128x128xbf16>
    %76 = vector.extract_strided_slice %1 {offsets = [2, 1, 0], sizes = [14, 16, 128], strides = [1, 1, 1]} : vector<16x18x128xbf16> to vector<14x16x128xbf16>
    %77 = vector.shape_cast %76 : vector<14x16x128xbf16> to vector<224x128xbf16>
    %78 = vector.extract_strided_slice %5 {offsets = [2, 1, 0], sizes = [2, 16, 128], strides = [1, 1, 1]} : vector<4x18x128xbf16> to vector<2x16x128xbf16>
    %79 = vector.shape_cast %78 : vector<2x16x128xbf16> to vector<32x128xbf16>
    %cst_37 = arith.constant dense<0.000000e+00> : vector<224x128xf32>
    %80 = tpu.matmul %77, %75, %cst_37 {dimension_numbers = #tpu.dot_dimension_numbers<[1], [0], [0], [1], [0, 0, 1, 1], [], []>} : vector<224x128xbf16>, vector<128x128xbf16>, vector<224x128xf32> -> vector<224x128xf32>
    %cst_38 = arith.constant dense<0.000000e+00> : vector<32x128xf32>
    %81 = tpu.matmul %79, %75, %cst_38 {dimension_numbers = #tpu.dot_dimension_numbers<[1], [0], [0], [1], [0, 0, 1, 1], [], []>} : vector<32x128xbf16>, vector<128x128xbf16>, vector<32x128xf32> -> vector<32x128xf32>
    %82 = arith.addf %72, %80 : vector<224x128xf32>
    %83 = arith.addf %73, %81 : vector<32x128xf32>
    %c8 = arith.constant 8 : index
    %c0_39 = arith.constant 0 : index
    %c0_40 = arith.constant 0 : index
    %84 = vector.load %arg4[%c8, %c0_39, %c0_40] : memref<9x128x128xbf16, #tpu.memory_space<vmem>>, vector<1x128x128xbf16>
    %85 = vector.shape_cast %84 : vector<1x128x128xbf16> to vector<128x128xbf16>
    %86 = vector.extract_strided_slice %1 {offsets = [2, 2, 0], sizes = [14, 16, 128], strides = [1, 1, 1]} : vector<16x18x128xbf16> to vector<14x16x128xbf16>
    %87 = vector.shape_cast %86 : vector<14x16x128xbf16> to vector<224x128xbf16>
    %88 = vector.extract_strided_slice %5 {offsets = [2, 2, 0], sizes = [2, 16, 128], strides = [1, 1, 1]} : vector<4x18x128xbf16> to vector<2x16x128xbf16>
    %89 = vector.shape_cast %88 : vector<2x16x128xbf16> to vector<32x128xbf16>
    %cst_41 = arith.constant dense<0.000000e+00> : vector<224x128xf32>
    %90 = tpu.matmul %87, %85, %cst_41 {dimension_numbers = #tpu.dot_dimension_numbers<[1], [0], [0], [1], [0, 0, 1, 1], [], []>} : vector<224x128xbf16>, vector<128x128xbf16>, vector<224x128xf32> -> vector<224x128xf32>
    %cst_42 = arith.constant dense<0.000000e+00> : vector<32x128xf32>
    %91 = tpu.matmul %89, %85, %cst_42 {dimension_numbers = #tpu.dot_dimension_numbers<[1], [0], [0], [1], [0, 0, 1, 1], [], []>} : vector<32x128xbf16>, vector<128x128xbf16>, vector<32x128xf32> -> vector<32x128xf32>
    %92 = arith.addf %82, %90 : vector<224x128xf32>
    %93 = arith.addf %83, %91 : vector<32x128xf32>
    %94 = vector.shape_cast %92 : vector<224x128xf32> to vector<14x16x128xf32>
    %95 = arith.truncf %94 : vector<14x16x128xf32> to vector<14x16x128xbf16>
    %c0_43 = arith.constant 0 : index
    %c0_44 = arith.constant 0 : index
    %c0_45 = arith.constant 0 : index
    %c0_46 = arith.constant 0 : index
    %96 = vector.load %arg5[%c0_43, %c0_44, %c0_45, %c0_46] : memref<1x16x16x128xbf16, #tpu.memory_space<vmem>>, vector<1x14x16x128xbf16>
    %97 = vector.shape_cast %96 : vector<1x14x16x128xbf16> to vector<14x16x128xbf16>
    %98 = vector.shape_cast %95 : vector<14x16x128xbf16> to vector<1x14x16x128xbf16>
    tpu.vector_store %arg5[%c0_43, %c0_44, %c0_45, %c0_46], %98 {strides = array<i32>} : memref<1x16x16x128xbf16, #tpu.memory_space<vmem>>, vector<1x14x16x128xbf16>,
    %99 = vector.shape_cast %93 : vector<32x128xf32> to vector<2x16x128xf32>
    %100 = arith.truncf %99 : vector<2x16x128xf32> to vector<2x16x128xbf16>
    %c0_47 = arith.constant 0 : index
    %c14 = arith.constant 14 : index
    %c0_48 = arith.constant 0 : index
    %c0_49 = arith.constant 0 : index
    %101 = vector.load %arg5[%c0_47, %c14, %c0_48, %c0_49] : memref<1x16x16x128xbf16, #tpu.memory_space<vmem>>, vector<1x2x16x128xbf16>
    %102 = vector.shape_cast %101 : vector<1x2x16x128xbf16> to vector<2x16x128xbf16>
    %103 = vector.shape_cast %100 : vector<2x16x128xbf16> to vector<1x2x16x128xbf16>
    tpu.vector_store %arg5[%c0_47, %c14, %c0_48, %c0_49], %103 {strides = array<i32>} : memref<1x16x16x128xbf16, #tpu.memory_space<vmem>>, vector<1x2x16x128xbf16>,
    %cst_50 = arith.constant dense<0.000000e+00> : vector<128xf32>
    %104 = vector.multi_reduction <add>, %92, %cst_50 [0] : vector<224x128xf32> to vector<128xf32>
    %105 = vector.shape_cast %104 : vector<128xf32> to vector<1x128xf32>
    %cst_51 = arith.constant dense<0.000000e+00> : vector<128xf32>
    %106 = vector.multi_reduction <add>, %93, %cst_51 [0] : vector<32x128xf32> to vector<128xf32>
    %107 = vector.shape_cast %106 : vector<128xf32> to vector<1x128xf32>
    %108 = arith.addf %105, %107 : vector<1x128xf32>
    %109 = arith.mulf %92, %92 : vector<224x128xf32>
    %cst_52 = arith.constant dense<0.000000e+00> : vector<128xf32>
    %110 = vector.multi_reduction <add>, %109, %cst_52 [0] : vector<224x128xf32> to vector<128xf32>
    %111 = vector.shape_cast %110 : vector<128xf32> to vector<1x128xf32>
    %112 = arith.mulf %93, %93 : vector<32x128xf32>
    %cst_53 = arith.constant dense<0.000000e+00> : vector<128xf32>
    %113 = vector.multi_reduction <add>, %112, %cst_53 [0] : vector<32x128xf32> to vector<128xf32>
    %114 = vector.shape_cast %113 : vector<128xf32> to vector<1x128xf32>
    %115 = arith.addf %111, %114 : vector<1x128xf32>
    %116 = tpu.concatenate %108, %115 in 0 : vector<1x128xf32>, vector<1x128xf32> -> vector<2x128xf32>
    %117 = vector.shape_cast %116 : vector<2x128xf32> to vector<1x1x2x128xf32>
    %c0_54 = arith.constant 0 : index
    %c0_55 = arith.constant 0 : index
    %c0_56 = arith.constant 0 : index
    %c0_57 = arith.constant 0 : index
    %118 = vector.load %arg6[%c0_54, %c0_55, %c0_56, %c0_57] : memref<1x1x2x128xf32, #tpu.memory_space<vmem>>, vector<1x1x2x128xf32>
    tpu.vector_store %arg6[%c0_54, %c0_55, %c0_56, %c0_57], %117 {strides = array<i32>} : memref<1x1x2x128xf32, #tpu.memory_space<vmem>>, vector<1x1x2x128xf32>,
    return
  }
  func.func @transform_0(%arg0: i32, %arg1: i32) -> (i32, i32, i32, i32) {
    %c0_i32 = arith.constant 0 : i32
    %c0_i32_0 = arith.constant 0 : i32
    %c0_i32_1 = arith.constant 0 : i32
    return %arg0, %arg1, %c0_i32, %c0_i32_0 : i32, i32, i32, i32
  }
  func.func @transform_1(%arg0: i32, %arg1: i32) -> (i32, i32, i32, i32) {
    %c1_i32 = arith.constant 1 : i32
    %0 = arith.addi %arg1, %c1_i32 : i32
    %c8_i32 = arith.constant 8 : i32
    %1 = arith.muli %0, %c8_i32 : i32
    %c0_i32 = arith.constant 0 : i32
    %c0_i32_0 = arith.constant 0 : i32
    %c0_i32_1 = arith.constant 0 : i32
    return %arg0, %1, %c0_i32, %c0_i32_0 : i32, i32, i32, i32
  }
  func.func @transform_2(%arg0: i32, %arg1: i32) -> (i32, i32, i32) {
    %c0_i32 = arith.constant 0 : i32
    %c0_i32_0 = arith.constant 0 : i32
    %c0_i32_1 = arith.constant 0 : i32
    %c0_i32_2 = arith.constant 0 : i32
    return %c0_i32, %c0_i32_0, %c0_i32_1 : i32, i32, i32
  }
  func.func @transform_3(%arg0: i32, %arg1: i32) -> (i32, i32, i32, i32) {
    %c0_i32 = arith.constant 0 : i32
    %c0_i32_0 = arith.constant 0 : i32
    %c0_i32_1 = arith.constant 0 : i32
    return %arg0, %arg1, %c0_i32, %c0_i32_0 : i32, i32, i32, i32
  }
  func.func @transform_4(%arg0: i32, %arg1: i32) -> (i32, i32, i32, i32) {
    %c0_i32 = arith.constant 0 : i32
    %c0_i32_0 = arith.constant 0 : i32
    %c0_i32_1 = arith.constant 0 : i32
    return %arg0, %arg1, %c0_i32, %c0_i32_0 : i32, i32, i32, i32
  }
}

module attributes {stable_mosaic.version = 11 : i64} {
  func.func @_bn_relu_kernel(%arg0: i32, %arg1: memref<512x128xbf16, #tpu.memory_space<vmem>>, %arg2: memref<1x128xf32, #tpu.memory_space<vmem>>, %arg3: memref<1x128xf32, #tpu.memory_space<vmem>>, %arg4: memref<512x128xf32, #tpu.memory_space<vmem>>) attributes {dimension_semantics = [#tpu.dimension_semantics<parallel>], iteration_bounds = array<i64: 1>, scalar_prefetch = 0 : i64, scratch_operands = 0 : i64, tpu.core_type = #tpu.core_type<tc>, window_params = [{transform_indices = @transform_0, window_bounds = array<i64: 512, 128>}, {pipeline_mode = #tpu.pipeline_mode<synchronous>, transform_indices = @transform_1, window_bounds = array<i64: 1, 128>}, {pipeline_mode = #tpu.pipeline_mode<synchronous>, transform_indices = @transform_2, window_bounds = array<i64: 1, 128>}, {transform_indices = @transform_3, window_bounds = array<i64: 512, 128>}]} {
    %c0 = arith.constant 0 : index
    %c0_0 = arith.constant 0 : index
    %0 = vector.load %arg1[%c0, %c0_0] : memref<512x128xbf16, #tpu.memory_space<vmem>>, vector<512x128xbf16>
    %1 = arith.extf %0 : vector<512x128xbf16> to vector<512x128xf32>
    %c0_1 = arith.constant 0 : index
    %c0_2 = arith.constant 0 : index
    %2 = vector.load %arg2[%c0_1, %c0_2] : memref<1x128xf32, #tpu.memory_space<vmem>>, vector<1x128xf32>
    %3 = vector.broadcast %2 : vector<1x128xf32> to vector<512x128xf32>
    %4 = arith.mulf %1, %3 : vector<512x128xf32>
    %c0_3 = arith.constant 0 : index
    %c0_4 = arith.constant 0 : index
    %5 = vector.load %arg3[%c0_3, %c0_4] : memref<1x128xf32, #tpu.memory_space<vmem>>, vector<1x128xf32>
    %6 = vector.broadcast %5 : vector<1x128xf32> to vector<512x128xf32>
    %7 = arith.addf %4, %6 : vector<512x128xf32>
    %cst = arith.constant 0.000000e+00 : f32
    %8 = vector.broadcast %cst : f32 to vector<512x128xf32>
    %9 = arith.maximumf %7, %8 : vector<512x128xf32>
    %c0_5 = arith.constant 0 : index
    %c0_6 = arith.constant 0 : index
    %10 = vector.load %arg4[%c0_5, %c0_6] : memref<512x128xf32, #tpu.memory_space<vmem>>, vector<512x128xf32>
    tpu.vector_store %arg4[%c0_5, %c0_6], %9 {strides = array<i32>} : memref<512x128xf32, #tpu.memory_space<vmem>>, vector<512x128xf32>,
    return
  }
  func.func @transform_0(%arg0: i32) -> (i32, i32) {
    %c0_i32 = arith.constant 0 : i32
    %c0_i32_0 = arith.constant 0 : i32
    return %arg0, %c0_i32 : i32, i32
  }
  func.func @transform_1(%arg0: i32) -> (i32, i32) {
    %c0_i32 = arith.constant 0 : i32
    %c0_i32_0 = arith.constant 0 : i32
    %c0_i32_1 = arith.constant 0 : i32
    return %c0_i32, %c0_i32_0 : i32, i32
  }
  func.func @transform_2(%arg0: i32) -> (i32, i32) {
    %c0_i32 = arith.constant 0 : i32
    %c0_i32_0 = arith.constant 0 : i32
    %c0_i32_1 = arith.constant 0 : i32
    return %c0_i32, %c0_i32_0 : i32, i32
  }
  func.func @transform_3(%arg0: i32) -> (i32, i32) {
    %c0_i32 = arith.constant 0 : i32
    %c0_i32_0 = arith.constant 0 : i32
    return %arg0, %c0_i32 : i32, i32
  }
}

</mosaic_0001>

<bundles_post_ra>
// kernel: up_forward.7
= control target key start
LH: loop header
LB: loop body
LE: loop exit
PB: predicated region body
PF: predicated region fallthrough
CT: control target
= control target key end

     0   :  { %s1023_s0 = inlined_call_operand.vmem [shape: bf16[512,128], index: 0, kind: input, shape index: {}]   ;;  %s1024_s1 = inlined_call_operand.vmem [shape: f32[1,128], index: 1, kind: input, shape index: {}]   ;;  %s1025_s2 = inlined_call_operand.vmem [shape: f32[1,128], index: 2, kind: input, shape index: {}]   ;;  %s1026_s3 = inlined_call_operand.vmem [shape: f32[512,128], index: 3, kind: output, shape index: {}]  }
   0x1   :  { %v419_v0 = vld [vmem:[%s1023_s0] sm:$0xff]   ;;  %v546_v4 = vld [vmem:[%s1023_s0 + $0x8] sm:$0xff]   ;;  %v547_v5 = vld [vmem:[%s1023_s0 + $0x10] sm:$0xff]  }
   0x2   :  { %v603_v1 = vld [vmem:[%s1024_s1] ss:$0 sm:$0xff]  ;;  %v420_v2 = vunpack.c.l.bf16 %v419_v0  ;;  %v421_v3 = vunpack.c.h.bf16 %v419_v0  ;;  %v548_v6 = vld [vmem:[%s1023_s0 + $0x18] sm:$0xff]   ;;  %v424_v8 = vunpack.c.l.bf16 %v546_v4  ;;  %v425_v9 = vunpack.c.h.bf16 %v546_v4  ;;  %v550_v33 = vld [vmem:[%s1023_s0 + $0x28] sm:$0xff]  }
   0x3   :  { %v617_v7 = vld [vmem:[%s1025_s2] ss:$0 sm:$0xff]  ;;  %v428_v10 = vunpack.c.l.bf16 %v547_v5  ;;  %v429_v11 = vunpack.c.h.bf16 %v547_v5  ;;  %v432_v14 = vunpack.c.l.bf16 %v548_v6  ;;  %v433_v15 = vunpack.c.h.bf16 %v548_v6  ;;  %v551_v34 = vld [vmem:[%s1023_s0 + $0x30] sm:$0xff]   ;;  %v552_v39 = vld [vmem:[%s1023_s0 + $0x38] sm:$0xff]  }
   0x4   :  { %v149_v12 = vmul.f32 %v420_v2, %v603_v1  ;;  %v150_v13 = vmul.f32 %v421_v3, %v603_v1  ;;  %v151_v16 = vmul.f32 %v424_v8, %v603_v1  ;;  %v152_v17 = vmul.f32 %v425_v9, %v603_v1  ;;  %v549_v28 = vld [vmem:[%s1023_s0 + $0x20] sm:$0xff]   ;;  %v554_v6 = vld [vmem:[%s1023_s0 + $0x48] sm:$0xff]   ;;  %v555_v8 = vld [vmem:[%s1023_s0 + $0x50] sm:$0xff]  }
   0x5   :  { %v153_v18 = vmul.f32 %v428_v10, %v603_v1  ;;  %v154_v19 = vmul.f32 %v429_v11, %v603_v1  ;;  %v155_v22 = vmul.f32 %v432_v14, %v603_v1  ;;  %v156_v23 = vmul.f32 %v433_v15, %v603_v1  ;;  %v553_v0 = vld [vmem:[%s1023_s0 + $0x40] sm:$0xff]  }
   0x6   :  { %v220_v20 = vadd.f32 %v617_v7, %v149_v12  ;;  %v221_v21 = vadd.f32 %v617_v7, %v150_v13  ;;  %v222_v24 = vadd.f32 %v617_v7, %v151_v16  ;;  %v223_v25 = vadd.f32 %v617_v7, %v152_v17  ;;  %v556_v13 = vld [vmem:[%s1023_s0 + $0x58] sm:$0xff]  }
   0x7   :  { %v224_v26 = vadd.f32 %v617_v7, %v153_v18  ;;  %v225_v27 = vadd.f32 %v617_v7, %v154_v19  ;;  %v226_v31 = vadd.f32 %v617_v7, %v155_v22  ;;  %v227_v32 = vadd.f32 %v617_v7, %v156_v23 }
   0x8   :  { %v284_v29 = vmax.f32 %v220_v20, 0.0  ;;  %v285_v30 = vmax.f32 %v221_v21, 0.0  ;;  %v286_v35 = vmax.f32 %v222_v24, 0.0  ;;  %v287_v36 = vmax.f32 %v223_v25, 0.0 }
   0x9   :  { %v288_v37 = vmax.f32 %v224_v26, 0.0  ;;  %v289_v38 = vmax.f32 %v225_v27, 0.0  ;;  %v290_v40 = vmax.f32 %v226_v31, 0.0  ;;  %v291_v41 = vmax.f32 %v227_v32, 0.0 }
   0xa   :  { %348 = vst [vmem:[%s1026_s3] sm:$0xff] %v284_v29  ;;  %349 = vst [vmem:[%s1026_s3 + $0x8] sm:$0xff] %v285_v30  ;;  %v436_v42 = vunpack.c.l.bf16 %v549_v28  ;;  %v437_v43 = vunpack.c.h.bf16 %v549_v28  ;;  %v440_v44 = vunpack.c.l.bf16 %v550_v33  ;;  %v441_v45 = vunpack.c.h.bf16 %v550_v33 }
   0xb   :  { %350 = vst [vmem:[%s1026_s3 + $0x10] sm:$0xff] %v286_v35  ;;  %351 = vst [vmem:[%s1026_s3 + $0x18] sm:$0xff] %v287_v36  ;;  %v444_v46 = vunpack.c.l.bf16 %v551_v34  ;;  %v445_v47 = vunpack.c.h.bf16 %v551_v34  ;;  %v448_v50 = vunpack.c.l.bf16 %v552_v39  ;;  %v449_v51 = vunpack.c.h.bf16 %v552_v39 }
   0xc   :  { %352 = vst [vmem:[%s1026_s3 + $0x20] sm:$0xff] %v288_v37  ;;  %353 = vst [vmem:[%s1026_s3 + $0x28] sm:$0xff] %v289_v38  ;;  %v157_v48 = vmul.f32 %v436_v42, %v603_v1  ;;  %v158_v49 = vmul.f32 %v437_v43, %v603_v1  ;;  %v159_v52 = vmul.f32 %v440_v44, %v603_v1  ;;  %v452_v16 = vunpack.c.l.bf16 %v553_v0  ;;  %v557_v38 = vld [vmem:[%s1023_s0 + $0x60] sm:$0xff]   ;;  %v558_v43 = vld [vmem:[%s1023_s0 + $0x68] sm:$0xff]  }
   0xd   :  { %354 = vst [vmem:[%s1026_s3 + $0x30] sm:$0xff] %v290_v40  ;;  %355 = vst [vmem:[%s1026_s3 + $0x38] sm:$0xff] %v291_v41  ;;  %v160_v53 = vmul.f32 %v441_v45, %v603_v1  ;;  %v161_v54 = vmul.f32 %v444_v46, %v603_v1  ;;  %v162_v55 = vmul.f32 %v445_v47, %v603_v1  ;;  %v453_v17 = vunpack.c.h.bf16 %v553_v0  ;;  %v559_v44 = vld [vmem:[%s1023_s0 + $0x70] sm:$0xff]  }
   0xe   :  { %v228_v56 = vadd.f32 %v617_v7, %v157_v48  ;;  %v229_v57 = vadd.f32 %v617_v7, %v158_v49  ;;  %v163_v58 = vmul.f32 %v448_v50, %v603_v1  ;;  %v164_v59 = vmul.f32 %v449_v51, %v603_v1  ;;  %v560_v49 = vld [vmem:[%s1023_s0 + $0x78] sm:$0xff]  }
   0xf   :  { %v230_v60 = vadd.f32 %v617_v7, %v159_v52  ;;  %v231_v61 = vadd.f32 %v617_v7, %v160_v53  ;;  %v232_v62 = vadd.f32 %v617_v7, %v161_v54  ;;  %v233_v63 = vadd.f32 %v617_v7, %v162_v55 }
  0x10   :  { %v292_v2 = vmax.f32 %v228_v56, 0.0  ;;  %v293_v3 = vmax.f32 %v229_v57, 0.0  ;;  %v234_v4 = vadd.f32 %v617_v7, %v163_v58  ;;  %v235_v5 = vadd.f32 %v617_v7, %v164_v59 }
  0x11   :  { %v294_v9 = vmax.f32 %v230_v60, 0.0  ;;  %v295_v10 = vmax.f32 %v231_v61, 0.0  ;;  %v296_v11 = vmax.f32 %v232_v62, 0.0  ;;  %v297_v12 = vmax.f32 %v233_v63, 0.0 }
  0x12   :  { %356 = vst [vmem:[%s1026_s3 + $0x40] sm:$0xff] %v292_v2  ;;  %357 = vst [vmem:[%s1026_s3 + $0x48] sm:$0xff] %v293_v3  ;;  %v298_v14 = vmax.f32 %v234_v4, 0.0  ;;  %v299_v15 = vmax.f32 %v235_v5, 0.0  ;;  %v456_v18 = vunpack.c.l.bf16 %v554_v6  ;;  %v457_v19 = vunpack.c.h.bf16 %v554_v6 }
  0x13   :  { %358 = vst [vmem:[%s1026_s3 + $0x50] sm:$0xff] %v294_v9  ;;  %359 = vst [vmem:[%s1026_s3 + $0x58] sm:$0xff] %v295_v10  ;;  %v460_v20 = vunpack.c.l.bf16 %v555_v8  ;;  %v461_v21 = vunpack.c.h.bf16 %v555_v8  ;;  %v165_v22 = vmul.f32 %v452_v16, %v603_v1  ;;  %v166_v23 = vmul.f32 %v453_v17, %v603_v1  ;;  %v562_v17 = vld [vmem:[%s1023_s0 + $0x88] sm:$0xff]  }
  0x14   :  { %360 = vst [vmem:[%s1026_s3 + $0x60] sm:$0xff] %v296_v11  ;;  %361 = vst [vmem:[%s1026_s3 + $0x68] sm:$0xff] %v297_v12  ;;  %v464_v24 = vunpack.c.l.bf16 %v556_v13  ;;  %v465_v25 = vunpack.c.h.bf16 %v556_v13  ;;  %v167_v26 = vmul.f32 %v456_v18, %v603_v1  ;;  %v168_v27 = vmul.f32 %v457_v19, %v603_v1  ;;  %v561_v12 = vld [vmem:[%s1023_s0 + $0x80] sm:$0xff]   ;;  %v563_v18 = vld [vmem:[%s1023_s0 + $0x90] sm:$0xff]  }
  0x15   :  { %362 = vst [vmem:[%s1026_s3 + $0x70] sm:$0xff] %v298_v14  ;;  %363 = vst [vmem:[%s1026_s3 + $0x78] sm:$0xff] %v299_v15  ;;  %v169_v28 = vmul.f32 %v460_v20, %v603_v1  ;;  %v170_v29 = vmul.f32 %v461_v21, %v603_v1  ;;  %v236_v30 = vadd.f32 %v617_v7, %v165_v22  ;;  %v468_v52 = vunpack.c.l.bf16 %v557_v38 }
  0x16   :  { %v237_v31 = vadd.f32 %v617_v7, %v166_v23  ;;  %v171_v32 = vmul.f32 %v464_v24, %v603_v1  ;;  %v172_v33 = vmul.f32 %v465_v25, %v603_v1  ;;  %v238_v34 = vadd.f32 %v617_v7, %v167_v26  ;;  %v564_v23 = vld [vmem:[%s1023_s0 + $0x98] sm:$0xff]  }
  0x17   :  { %v239_v35 = vadd.f32 %v617_v7, %v168_v27  ;;  %v240_v36 = vadd.f32 %v617_v7, %v169_v28  ;;  %v241_v37 = vadd.f32 %v617_v7, %v170_v29  ;;  %v300_v39 = vmax.f32 %v236_v30, 0.0 }
  0x18   :  { %v301_v40 = vmax.f32 %v237_v31, 0.0  ;;  %v242_v41 = vadd.f32 %v617_v7, %v171_v32  ;;  %v243_v42 = vadd.f32 %v617_v7, %v172_v33  ;;  %v302_v45 = vmax.f32 %v238_v34, 0.0 }
  0x19   :  { %v303_v46 = vmax.f32 %v239_v35, 0.0  ;;  %v304_v47 = vmax.f32 %v240_v36, 0.0  ;;  %v305_v48 = vmax.f32 %v241_v37, 0.0  ;;  %364 = vst [vmem:[%s1026_s3 + $0x80] sm:$0xff] %v300_v39  ;;  %v469_v53 = vunpack.c.h.bf16 %v557_v38 }
  0x1a   :  { %365 = vst [vmem:[%s1026_s3 + $0x88] sm:$0xff] %v301_v40  ;;  %v306_v50 = vmax.f32 %v242_v41, 0.0  ;;  %v307_v51 = vmax.f32 %v243_v42, 0.0  ;;  %366 = vst [vmem:[%s1026_s3 + $0x90] sm:$0xff] %v302_v45  ;;  %v472_v54 = vunpack.c.l.bf16 %v558_v43  ;;  %v473_v55 = vunpack.c.h.bf16 %v558_v43 }
  0x1b   :  { %367 = vst [vmem:[%s1026_s3 + $0x98] sm:$0xff] %v303_v46  ;;  %368 = vst [vmem:[%s1026_s3 + $0xa0] sm:$0xff] %v304_v47  ;;  %v476_v56 = vunpack.c.l.bf16 %v559_v44  ;;  %v477_v57 = vunpack.c.h.bf16 %v559_v44  ;;  %v173_v58 = vmul.f32 %v468_v52, %v603_v1  ;;  %v174_v59 = vmul.f32 %v469_v53, %v603_v1  ;;  %v566_v53 = vld [vmem:[%s1023_s0 + $0xa8] sm:$0xff]  }
  0x1c   :  { %369 = vst [vmem:[%s1026_s3 + $0xa8] sm:$0xff] %v305_v48  ;;  %370 = vst [vmem:[%s1026_s3 + $0xb0] sm:$0xff] %v306_v50  ;;  %v480_v60 = vunpack.c.l.bf16 %v560_v49  ;;  %v481_v61 = vunpack.c.h.bf16 %v560_v49  ;;  %v175_v62 = vmul.f32 %v472_v54, %v603_v1  ;;  %v176_v63 = vmul.f32 %v473_v55, %v603_v1  ;;  %v565_v48 = vld [vmem:[%s1023_s0 + $0xa0] sm:$0xff]   ;;  %v567_v54 = vld [vmem:[%s1023_s0 + $0xb0] sm:$0xff]  }
  0x1d   :  { %371 = vst [vmem:[%s1026_s3 + $0xb8] sm:$0xff] %v307_v51  ;;  %v177_v0 = vmul.f32 %v476_v56, %v603_v1  ;;  %v178_v2 = vmul.f32 %v477_v57, %v603_v1  ;;  %v244_v3 = vadd.f32 %v617_v7, %v173_v58  ;;  %v245_v4 = vadd.f32 %v617_v7, %v174_v59  ;;  %v568_v59 = vld [vmem:[%s1023_s0 + $0xb8] sm:$0xff]  }
  0x1e   :  { %v179_v5 = vmul.f32 %v480_v60, %v603_v1  ;;  %v180_v6 = vmul.f32 %v481_v61, %v603_v1  ;;  %v246_v8 = vadd.f32 %v617_v7, %v175_v62  ;;  %v247_v9 = vadd.f32 %v617_v7, %v176_v63 }
  0x1f   :  { %v248_v10 = vadd.f32 %v617_v7, %v177_v0  ;;  %v249_v11 = vadd.f32 %v617_v7, %v178_v2  ;;  %v308_v13 = vmax.f32 %v244_v3, 0.0  ;;  %v309_v14 = vmax.f32 %v245_v4, 0.0 }
  0x20   :  { %v250_v15 = vadd.f32 %v617_v7, %v179_v5  ;;  %v251_v16 = vadd.f32 %v617_v7, %v180_v6  ;;  %v310_v19 = vmax.f32 %v246_v8, 0.0  ;;  %v311_v20 = vmax.f32 %v247_v9, 0.0 }
  0x21   :  { %v312_v21 = vmax.f32 %v248_v10, 0.0  ;;  %v313_v22 = vmax.f32 %v249_v11, 0.0  ;;  %372 = vst [vmem:[%s1026_s3 + $0xc0] sm:$0xff] %v308_v13  ;;  %373 = vst [vmem:[%s1026_s3 + $0xc8] sm:$0xff] %v309_v14  ;;  %v484_v26 = vunpack.c.l.bf16 %v561_v12  ;;  %v485_v27 = vunpack.c.h.bf16 %v561_v12 }
  0x22   :  { %v314_v24 = vmax.f32 %v250_v15, 0.0  ;;  %v315_v25 = vmax.f32 %v251_v16, 0.0  ;;  %374 = vst [vmem:[%s1026_s3 + $0xd0] sm:$0xff] %v310_v19  ;;  %375 = vst [vmem:[%s1026_s3 + $0xd8] sm:$0xff] %v311_v20  ;;  %v488_v28 = vunpack.c.l.bf16 %v562_v17  ;;  %v489_v29 = vunpack.c.h.bf16 %v562_v17 }
  0x23   :  { %376 = vst [vmem:[%s1026_s3 + $0xe0] sm:$0xff] %v312_v21  ;;  %377 = vst [vmem:[%s1026_s3 + $0xe8] sm:$0xff] %v313_v22  ;;  %v492_v30 = vunpack.c.l.bf16 %v563_v18  ;;  %v493_v31 = vunpack.c.h.bf16 %v563_v18  ;;  %v181_v32 = vmul.f32 %v484_v26, %v603_v1  ;;  %v182_v33 = vmul.f32 %v485_v27, %v603_v1  ;;  %v569_v22 = vld [vmem:[%s1023_s0 + $0xc0] sm:$0xff]   ;;  %v570_v27 = vld [vmem:[%s1023_s0 + $0xc8] sm:$0xff]  }
  0x24   :  { %378 = vst [vmem:[%s1026_s3 + $0xf0] sm:$0xff] %v314_v24  ;;  %379 = vst [vmem:[%s1026_s3 + $0xf8] sm:$0xff] %v315_v25  ;;  %v496_v34 = vunpack.c.l.bf16 %v564_v23  ;;  %v497_v35 = vunpack.c.h.bf16 %v564_v23  ;;  %v183_v36 = vmul.f32 %v488_v28, %v603_v1  ;;  %v184_v37 = vmul.f32 %v489_v29, %v603_v1  ;;  %v571_v28 = vld [vmem:[%s1023_s0 + $0xd0] sm:$0xff]  }
  0x25   :  { %v185_v38 = vmul.f32 %v492_v30, %v603_v1  ;;  %v186_v39 = vmul.f32 %v493_v31, %v603_v1  ;;  %v252_v40 = vadd.f32 %v617_v7, %v181_v32  ;;  %v253_v41 = vadd.f32 %v617_v7, %v182_v33  ;;  %v572_v33 = vld [vmem:[%s1023_s0 + $0xd8] sm:$0xff]  }
  0x26   :  { %v187_v42 = vmul.f32 %v496_v34, %v603_v1  ;;  %v188_v43 = vmul.f32 %v497_v35, %v603_v1  ;;  %v254_v44 = vadd.f32 %v617_v7, %v183_v36  ;;  %v255_v45 = vadd.f32 %v617_v7, %v184_v37 }
  0x27   :  { %v256_v46 = vadd.f32 %v617_v7, %v185_v38  ;;  %v257_v47 = vadd.f32 %v617_v7, %v186_v39  ;;  %v316_v49 = vmax.f32 %v252_v40, 0.0  ;;  %v317_v50 = vmax.f32 %v253_v41, 0.0 }
  0x28   :  { %v258_v51 = vadd.f32 %v617_v7, %v187_v42  ;;  %v259_v52 = vadd.f32 %v617_v7, %v188_v43  ;;  %v318_v55 = vmax.f32 %v254_v44, 0.0  ;;  %v319_v56 = vmax.f32 %v255_v45, 0.0 }
  0x29   :  { %v320_v57 = vmax.f32 %v256_v46, 0.0  ;;  %v321_v58 = vmax.f32 %v257_v47, 0.0  ;;  %380 = vst [vmem:[%s1026_s3 + $0x100] sm:$0xff] %v316_v49  ;;  %381 = vst [vmem:[%s1026_s3 + $0x108] sm:$0xff] %v317_v50  ;;  %v500_v62 = vunpack.c.l.bf16 %v565_v48  ;;  %v501_v63 = vunpack.c.h.bf16 %v565_v48 }
  0x2a   :  { %v322_v60 = vmax.f32 %v258_v51, 0.0  ;;  %v323_v61 = vmax.f32 %v259_v52, 0.0  ;;  %382 = vst [vmem:[%s1026_s3 + $0x110] sm:$0xff] %v318_v55  ;;  %383 = vst [vmem:[%s1026_s3 + $0x118] sm:$0xff] %v319_v56  ;;  %v504_v0 = vunpack.c.l.bf16 %v566_v53  ;;  %v505_v2 = vunpack.c.h.bf16 %v566_v53 }
  0x2b   :  { %384 = vst [vmem:[%s1026_s3 + $0x120] sm:$0xff] %v320_v57  ;;  %385 = vst [vmem:[%s1026_s3 + $0x128] sm:$0xff] %v321_v58  ;;  %v508_v3 = vunpack.c.l.bf16 %v567_v54  ;;  %v509_v4 = vunpack.c.h.bf16 %v567_v54  ;;  %v189_v5 = vmul.f32 %v500_v62, %v603_v1  ;;  %v190_v6 = vmul.f32 %v501_v63, %v603_v1  ;;  %v573_v58 = vld [vmem:[%s1023_s0 + $0xe0] sm:$0xff]   ;;  %v574_v63 = vld [vmem:[%s1023_s0 + $0xe8] sm:$0xff]  }
  0x2c   :  { %386 = vst [vmem:[%s1026_s3 + $0x130] sm:$0xff] %v322_v60  ;;  %387 = vst [vmem:[%s1026_s3 + $0x138] sm:$0xff] %v323_v61  ;;  %v512_v8 = vunpack.c.l.bf16 %v568_v59  ;;  %v513_v9 = vunpack.c.h.bf16 %v568_v59  ;;  %v191_v10 = vmul.f32 %v504_v0, %v603_v1  ;;  %v192_v11 = vmul.f32 %v505_v2, %v603_v1  ;;  %v575_v0 = vld [vmem:[%s1023_s0 + $0xf0] sm:$0xff]  }
  0x2d   :  { %v193_v12 = vmul.f32 %v508_v3, %v603_v1  ;;  %v194_v13 = vmul.f32 %v509_v4, %v603_v1  ;;  %v260_v14 = vadd.f32 %v617_v7, %v189_v5  ;;  %v261_v15 = vadd.f32 %v617_v7, %v190_v6  ;;  %v576_v6 = vld [vmem:[%s1023_s0 + $0xf8] sm:$0xff]  }
  0x2e   :  { %v195_v16 = vmul.f32 %v512_v8, %v603_v1  ;;  %v196_v17 = vmul.f32 %v513_v9, %v603_v1  ;;  %v262_v18 = vadd.f32 %v617_v7, %v191_v10  ;;  %v263_v19 = vadd.f32 %v617_v7, %v192_v11 }
  0x2f   :  { %v264_v20 = vadd.f32 %v617_v7, %v193_v12  ;;  %v265_v21 = vadd.f32 %v617_v7, %v194_v13  ;;  %v324_v23 = vmax.f32 %v260_v14, 0.0  ;;  %v325_v24 = vmax.f32 %v261_v15, 0.0 }
  0x30   :  { %v266_v25 = vadd.f32 %v617_v7, %v195_v16  ;;  %v267_v26 = vadd.f32 %v617_v7, %v196_v17  ;;  %v326_v29 = vmax.f32 %v262_v18, 0.0  ;;  %v327_v30 = vmax.f32 %v263_v19, 0.0 }
  0x31   :  { %v328_v31 = vmax.f32 %v264_v20, 0.0  ;;  %v329_v32 = vmax.f32 %v265_v21, 0.0  ;;  %388 = vst [vmem:[%s1026_s3 + $0x140] sm:$0xff] %v324_v23  ;;  %389 = vst [vmem:[%s1026_s3 + $0x148] sm:$0xff] %v325_v24  ;;  %v516_v36 = vunpack.c.l.bf16 %v569_v22  ;;  %v517_v37 = vunpack.c.h.bf16 %v569_v22 }
  0x32   :  { %v330_v34 = vmax.f32 %v266_v25, 0.0  ;;  %v331_v35 = vmax.f32 %v267_v26, 0.0  ;;  %390 = vst [vmem:[%s1026_s3 + $0x150] sm:$0xff] %v326_v29  ;;  %391 = vst [vmem:[%s1026_s3 + $0x158] sm:$0xff] %v327_v30  ;;  %v520_v38 = vunpack.c.l.bf16 %v570_v27  ;;  %v521_v39 = vunpack.c.h.bf16 %v570_v27 }
  0x33   :  { %392 = vst [vmem:[%s1026_s3 + $0x160] sm:$0xff] %v328_v31  ;;  %393 = vst [vmem:[%s1026_s3 + $0x168] sm:$0xff] %v329_v32  ;;  %v524_v40 = vunpack.c.l.bf16 %v571_v28  ;;  %v525_v41 = vunpack.c.h.bf16 %v571_v28  ;;  %v197_v42 = vmul.f32 %v516_v36, %v603_v1  ;;  %v198_v43 = vmul.f32 %v517_v37, %v603_v1 }
  0x34   :  { %394 = vst [vmem:[%s1026_s3 + $0x170] sm:$0xff] %v330_v34  ;;  %395 = vst [vmem:[%s1026_s3 + $0x178] sm:$0xff] %v331_v35  ;;  %v528_v44 = vunpack.c.l.bf16 %v572_v33  ;;  %v529_v45 = vunpack.c.h.bf16 %v572_v33  ;;  %v199_v46 = vmul.f32 %v520_v38, %v603_v1  ;;  %v200_v47 = vmul.f32 %v521_v39, %v603_v1 }
  0x35   :  { %v201_v48 = vmul.f32 %v524_v40, %v603_v1  ;;  %v202_v49 = vmul.f32 %v525_v41, %v603_v1  ;;  %v268_v50 = vadd.f32 %v617_v7, %v197_v42  ;;  %v269_v51 = vadd.f32 %v617_v7, %v198_v43 }
  0x36   :  { %v203_v52 = vmul.f32 %v528_v44, %v603_v1  ;;  %v204_v53 = vmul.f32 %v529_v45, %v603_v1  ;;  %v270_v54 = vadd.f32 %v617_v7, %v199_v46  ;;  %v271_v55 = vadd.f32 %v617_v7, %v200_v47 }
  0x37   :  { %v272_v56 = vadd.f32 %v617_v7, %v201_v48  ;;  %v273_v57 = vadd.f32 %v617_v7, %v202_v49  ;;  %v332_v59 = vmax.f32 %v268_v50, 0.0  ;;  %v333_v60 = vmax.f32 %v269_v51, 0.0 }
  0x38   :  { %v274_v61 = vadd.f32 %v617_v7, %v203_v52  ;;  %v275_v62 = vadd.f32 %v617_v7, %v204_v53  ;;  %v334_v2 = vmax.f32 %v270_v54, 0.0  ;;  %v335_v3 = vmax.f32 %v271_v55, 0.0 }
  0x39   :  { %v336_v4 = vmax.f32 %v272_v56, 0.0  ;;  %v337_v5 = vmax.f32 %v273_v57, 0.0  ;;  %396 = vst [vmem:[%s1026_s3 + $0x180] sm:$0xff] %v332_v59  ;;  %397 = vst [vmem:[%s1026_s3 + $0x188] sm:$0xff] %v333_v60  ;;  %v532_v10 = vunpack.c.l.bf16 %v573_v58  ;;  %v533_v11 = vunpack.c.h.bf16 %v573_v58 }
  0x3a   :  { %v338_v8 = vmax.f32 %v274_v61, 0.0  ;;  %v339_v9 = vmax.f32 %v275_v62, 0.0  ;;  %398 = vst [vmem:[%s1026_s3 + $0x190] sm:$0xff] %v334_v2  ;;  %399 = vst [vmem:[%s1026_s3 + $0x198] sm:$0xff] %v335_v3  ;;  %v536_v12 = vunpack.c.l.bf16 %v574_v63  ;;  %v537_v13 = vunpack.c.h.bf16 %v574_v63 }
  0x3b   :  { %400 = vst [vmem:[%s1026_s3 + $0x1a0] sm:$0xff] %v336_v4  ;;  %401 = vst [vmem:[%s1026_s3 + $0x1a8] sm:$0xff] %v337_v5  ;;  %v540_v14 = vunpack.c.l.bf16 %v575_v0  ;;  %v541_v15 = vunpack.c.h.bf16 %v575_v0  ;;  %v205_v16 = vmul.f32 %v532_v10, %v603_v1  ;;  %v206_v17 = vmul.f32 %v533_v11, %v603_v1 }
  0x3c   :  { %402 = vst [vmem:[%s1026_s3 + $0x1b0] sm:$0xff] %v338_v8  ;;  %403 = vst [vmem:[%s1026_s3 + $0x1b8] sm:$0xff] %v339_v9  ;;  %v544_v18 = vunpack.c.l.bf16 %v576_v6  ;;  %v545_v19 = vunpack.c.h.bf16 %v576_v6  ;;  %v207_v20 = vmul.f32 %v536_v12, %v603_v1  ;;  %v208_v21 = vmul.f32 %v537_v13, %v603_v1 }
  0x3d   :  { %v209_v22 = vmul.f32 %v540_v14, %v603_v1  ;;  %v210_v23 = vmul.f32 %v541_v15, %v603_v1  ;;  %v276_v24 = vadd.f32 %v617_v7, %v205_v16  ;;  %v277_v25 = vadd.f32 %v617_v7, %v206_v17 }
  0x3e   :  { %v211_v26 = vmul.f32 %v544_v18, %v603_v1  ;;  %v212_v27 = vmul.f32 %v545_v19, %v603_v1  ;;  %v278_v28 = vadd.f32 %v617_v7, %v207_v20  ;;  %v279_v29 = vadd.f32 %v617_v7, %v208_v21 }
  0x3f   :  { %v280_v30 = vadd.f32 %v617_v7, %v209_v22  ;;  %v281_v31 = vadd.f32 %v617_v7, %v210_v23  ;;  %v340_v32 = vmax.f32 %v276_v24, 0.0  ;;  %v341_v33 = vmax.f32 %v277_v25, 0.0 }
  0x40   :  { %v282_v34 = vadd.f32 %v617_v7, %v211_v26  ;;  %v283_v35 = vadd.f32 %v617_v7, %v212_v27  ;;  %v342_v36 = vmax.f32 %v278_v28, 0.0  ;;  %v343_v37 = vmax.f32 %v279_v29, 0.0 }
  0x41   :  { %v344_v38 = vmax.f32 %v280_v30, 0.0  ;;  %v345_v39 = vmax.f32 %v281_v31, 0.0  ;;  %404 = vst [vmem:[%s1026_s3 + $0x1c0] sm:$0xff] %v340_v32  ;;  %405 = vst [vmem:[%s1026_s3 + $0x1c8] sm:$0xff] %v341_v33 }
  0x42   :  { %v346_v1 = vmax.f32 %v282_v34, 0.0  ;;  %v347_v40 = vmax.f32 %v283_v35, 0.0  ;;  %406 = vst [vmem:[%s1026_s3 + $0x1d0] sm:$0xff] %v342_v36  ;;  %407 = vst [vmem:[%s1026_s3 + $0x1d8] sm:$0xff] %v343_v37 }
  0x43   :  { %408 = vst [vmem:[%s1026_s3 + $0x1e0] sm:$0xff] %v344_v38  ;;  %409 = vst [vmem:[%s1026_s3 + $0x1e8] sm:$0xff] %v345_v39 }
  0x44   :  { %410 = vst [vmem:[%s1026_s3 + $0x1f0] sm:$0xff] %v346_v1  ;;  %411 = vst [vmem:[%s1026_s3 + $0x1f8] sm:$0xff] %v347_v40 }

// kernel: up_forward.5
= control target key start
LH: loop header
LB: loop body
LE: loop exit
PB: predicated region body
PF: predicated region fallthrough
CT: control target
= control target key end

     0   :  { %s1502_s0 = inlined_call_operand.vmem [shape: bf16[512,128], index: 0, kind: input, shape index: {}]   ;;  %s1503_s1 = inlined_call_operand.vmem [shape: f32[1,128], index: 1, kind: input, shape index: {}]   ;;  %s1504_s2 = inlined_call_operand.vmem [shape: f32[1,128], index: 2, kind: input, shape index: {}]   ;;  %s1505_s3 = inlined_call_operand.vmem [shape: bf16[512,128], index: 3, kind: output, shape index: {}]  }
   0x1   :  { %v803_v0 = vld [vmem:[%s1502_s0] sm:$0xff]   ;;  %v1090_v4 = vld [vmem:[%s1502_s0 + $0x8] sm:$0xff]   ;;  %v1091_v5 = vld [vmem:[%s1502_s0 + $0x10] sm:$0xff]  }
   0x2   :  { %v1178_v1 = vld [vmem:[%s1503_s1] ss:$0 sm:$0xff]  ;;  %v804_v2 = vunpack.c.l.bf16 %v803_v0  ;;  %v805_v3 = vunpack.c.h.bf16 %v803_v0  ;;  %v1092_v6 = vld [vmem:[%s1502_s0 + $0x18] sm:$0xff]   ;;  %v808_v8 = vunpack.c.l.bf16 %v1090_v4  ;;  %v809_v9 = vunpack.c.h.bf16 %v1090_v4  ;;  %v1094_v33 = vld [vmem:[%s1502_s0 + $0x28] sm:$0xff]  }
   0x3   :  { %v1192_v7 = vld [vmem:[%s1504_s2] ss:$0 sm:$0xff]  ;;  %v812_v10 = vunpack.c.l.bf16 %v1091_v5  ;;  %v813_v11 = vunpack.c.h.bf16 %v1091_v5  ;;  %v816_v14 = vunpack.c.l.bf16 %v1092_v6  ;;  %v817_v15 = vunpack.c.h.bf16 %v1092_v6  ;;  %v1095_v38 = vld [vmem:[%s1502_s0 + $0x30] sm:$0xff]   ;;  %v1096_v43 = vld [vmem:[%s1502_s0 + $0x38] sm:$0xff]  }
   0x4   :  { %v149_v12 = vmul.f32 %v804_v2, %v1178_v1  ;;  %v150_v13 = vmul.f32 %v805_v3, %v1178_v1  ;;  %v151_v16 = vmul.f32 %v808_v8, %v1178_v1  ;;  %v152_v17 = vmul.f32 %v809_v9, %v1178_v1  ;;  %v1093_v28 = vld [vmem:[%s1502_s0 + $0x20] sm:$0xff]  }
   0x5   :  { %v153_v18 = vmul.f32 %v812_v10, %v1178_v1  ;;  %v154_v19 = vmul.f32 %v813_v11, %v1178_v1  ;;  %v155_v22 = vmul.f32 %v816_v14, %v1178_v1  ;;  %v156_v23 = vmul.f32 %v817_v15, %v1178_v1  ;;  %v1097_v0 = vld [vmem:[%s1502_s0 + $0x40] sm:$0xff]   ;;  %v1098_v11 = vld [vmem:[%s1502_s0 + $0x48] sm:$0xff]  }
   0x6   :  { %v220_v20 = vadd.f32 %v1192_v7, %v149_v12  ;;  %v221_v21 = vadd.f32 %v1192_v7, %v150_v13  ;;  %v222_v24 = vadd.f32 %v1192_v7, %v151_v16  ;;  %v223_v25 = vadd.f32 %v1192_v7, %v152_v17  ;;  %v1099_v16 = vld [vmem:[%s1502_s0 + $0x50] sm:$0xff]  }
   0x7   :  { %v224_v26 = vadd.f32 %v1192_v7, %v153_v18  ;;  %v225_v27 = vadd.f32 %v1192_v7, %v154_v19  ;;  %v226_v31 = vadd.f32 %v1192_v7, %v155_v22  ;;  %v227_v32 = vadd.f32 %v1192_v7, %v156_v23 }
   0x8   :  { %v284_v29 = vmax.f32 %v220_v20, 0.0  ;;  %v285_v30 = vmax.f32 %v221_v21, 0.0  ;;  %v286_v34 = vmax.f32 %v222_v24, 0.0  ;;  %v287_v35 = vmax.f32 %v223_v25, 0.0  ;;  %v1100_v25 = vld [vmem:[%s1502_s0 + $0x58] sm:$0xff]  }
   0x9   :  { %v288_v36 = vmax.f32 %v224_v26, 0.0  ;;  %v289_v37 = vmax.f32 %v225_v27, 0.0  ;;  %v290_v40 = vmax.f32 %v226_v31, 0.0  ;;  %v291_v41 = vmax.f32 %v227_v32, 0.0 }
   0xa   :  { %v933_v39 = vpack.c.bf16 %v285_v30, %v284_v29  ;;  %v820_v42 = vunpack.c.l.bf16 %v1093_v28  ;;  %v938_v44 = vpack.c.bf16 %v287_v35, %v286_v34  ;;  %v821_v46 = vunpack.c.h.bf16 %v1093_v28 }
   0xb   :  { %v943_v45 = vpack.c.bf16 %v289_v37, %v288_v36  ;;  %v824_v47 = vunpack.c.l.bf16 %v1094_v33  ;;  %v948_v48 = vpack.c.bf16 %v291_v41, %v290_v40  ;;  %v825_v50 = vunpack.c.h.bf16 %v1094_v33 }
   0xc   :  { %934 = vst [vmem:[%s1505_s3] sm:$0xff] %v933_v39   ;;  %v157_v49 = vmul.f32 %v820_v42, %v1178_v1  ;;  %v828_v51 = vunpack.c.l.bf16 %v1095_v38  ;;  %1121 = vst [vmem:[%s1505_s3 + $0x8] sm:$0xff] %v938_v44   ;;  %v158_v52 = vmul.f32 %v821_v46, %v1178_v1  ;;  %v829_v54 = vunpack.c.h.bf16 %v1095_v38  ;;  %v1101_v38 = vld [vmem:[%s1502_s0 + $0x60] sm:$0xff]  }
   0xd   :  { %1122 = vst [vmem:[%s1505_s3 + $0x10] sm:$0xff] %v943_v45   ;;  %v159_v53 = vmul.f32 %v824_v47, %v1178_v1  ;;  %v832_v55 = vunpack.c.l.bf16 %v1096_v43  ;;  %1123 = vst [vmem:[%s1505_s3 + $0x18] sm:$0xff] %v948_v48   ;;  %v160_v57 = vmul.f32 %v825_v50, %v1178_v1  ;;  %v833_v59 = vunpack.c.h.bf16 %v1096_v43 }
   0xe   :  { %v228_v56 = vadd.f32 %v1192_v7, %v157_v49  ;;  %v161_v58 = vmul.f32 %v828_v51, %v1178_v1  ;;  %v229_v60 = vadd.f32 %v1192_v7, %v158_v52  ;;  %v162_v62 = vmul.f32 %v829_v54, %v1178_v1  ;;  %v1102_v51 = vld [vmem:[%s1502_s0 + $0x68] sm:$0xff]  }
   0xf   :  { %v230_v61 = vadd.f32 %v1192_v7, %v159_v53  ;;  %v163_v63 = vmul.f32 %v832_v55, %v1178_v1  ;;  %v231_v3 = vadd.f32 %v1192_v7, %v160_v57  ;;  %v164_v5 = vmul.f32 %v833_v59, %v1178_v1 }
  0x10   :  { %v292_v2 = vmax.f32 %v228_v56, 0.0  ;;  %v232_v4 = vadd.f32 %v1192_v7, %v161_v58  ;;  %v293_v6 = vmax.f32 %v229_v60, 0.0  ;;  %v233_v9 = vadd.f32 %v1192_v7, %v162_v62  ;;  %v1103_v60 = vld [vmem:[%s1502_s0 + $0x70] sm:$0xff]  }
  0x11   :  { %v294_v8 = vmax.f32 %v230_v61, 0.0  ;;  %v234_v10 = vadd.f32 %v1192_v7, %v163_v63  ;;  %v295_v12 = vmax.f32 %v231_v3, 0.0  ;;  %v235_v14 = vadd.f32 %v1192_v7, %v164_v5 }
  0x12   :  { %v296_v13 = vmax.f32 %v232_v4, 0.0  ;;  %v836_v15 = vunpack.c.l.bf16 %v1097_v0  ;;  %v953_v17 = vpack.c.bf16 %v293_v6, %v292_v2  ;;  %v297_v18 = vmax.f32 %v233_v9, 0.0  ;;  %v1104_v2 = vld [vmem:[%s1502_s0 + $0x78] sm:$0xff]  }
  0x13   :  { %v298_v19 = vmax.f32 %v234_v10, 0.0  ;;  %v837_v20 = vunpack.c.h.bf16 %v1097_v0  ;;  %v958_v21 = vpack.c.bf16 %v295_v12, %v294_v8  ;;  %v299_v22 = vmax.f32 %v235_v14, 0.0  ;;  %v1105_v12 = vld [vmem:[%s1502_s0 + $0x80] sm:$0xff]  }
  0x14   :  { %v165_v23 = vmul.f32 %v836_v15, %v1178_v1  ;;  %v840_v24 = vunpack.c.l.bf16 %v1098_v11  ;;  %1124 = vst [vmem:[%s1505_s3 + $0x20] sm:$0xff] %v953_v17   ;;  %v963_v26 = vpack.c.bf16 %v297_v18, %v296_v13  ;;  %v841_v28 = vunpack.c.h.bf16 %v1098_v11 }
  0x15   :  { %v166_v27 = vmul.f32 %v837_v20, %v1178_v1  ;;  %v844_v29 = vunpack.c.l.bf16 %v1099_v16  ;;  %1125 = vst [vmem:[%s1505_s3 + $0x28] sm:$0xff] %v958_v21   ;;  %v968_v30 = vpack.c.bf16 %v299_v22, %v298_v19  ;;  %v845_v33 = vunpack.c.h.bf16 %v1099_v16 }
  0x16   :  { %v236_v31 = vadd.f32 %v1192_v7, %v165_v23  ;;  %v167_v32 = vmul.f32 %v840_v24, %v1178_v1  ;;  %1126 = vst [vmem:[%s1505_s3 + $0x30] sm:$0xff] %v963_v26   ;;  %v168_v35 = vmul.f32 %v841_v28, %v1178_v1  ;;  %v848_v37 = vunpack.c.l.bf16 %v1100_v25 }
  0x17   :  { %v237_v34 = vadd.f32 %v1192_v7, %v166_v27  ;;  %v169_v36 = vmul.f32 %v844_v29, %v1178_v1  ;;  %1127 = vst [vmem:[%s1505_s3 + $0x38] sm:$0xff] %v968_v30   ;;  %v170_v41 = vmul.f32 %v845_v33, %v1178_v1  ;;  %v849_v42 = vunpack.c.h.bf16 %v1100_v25  ;;  %v1106_v29 = vld [vmem:[%s1502_s0 + $0x88] sm:$0xff]  }
  0x18   :  { %v300_v39 = vmax.f32 %v236_v31, 0.0  ;;  %v238_v40 = vadd.f32 %v1192_v7, %v167_v32  ;;  %v239_v44 = vadd.f32 %v1192_v7, %v168_v35  ;;  %v171_v46 = vmul.f32 %v848_v37, %v1178_v1 }
  0x19   :  { %v301_v43 = vmax.f32 %v237_v34, 0.0  ;;  %v240_v45 = vadd.f32 %v1192_v7, %v169_v36  ;;  %v241_v48 = vadd.f32 %v1192_v7, %v170_v41  ;;  %v172_v49 = vmul.f32 %v849_v42, %v1178_v1  ;;  %v1107_v34 = vld [vmem:[%s1502_s0 + $0x90] sm:$0xff]  }
  0x1a   :  { %v302_v47 = vmax.f32 %v238_v40, 0.0  ;;  %v852_v50 = vunpack.c.l.bf16 %v1101_v38  ;;  %v303_v53 = vmax.f32 %v239_v44, 0.0  ;;  %v242_v55 = vadd.f32 %v1192_v7, %v171_v46 }
  0x1b   :  { %v973_v52 = vpack.c.bf16 %v301_v43, %v300_v39  ;;  %v304_v54 = vmax.f32 %v240_v45, 0.0  ;;  %v305_v56 = vmax.f32 %v241_v48, 0.0  ;;  %v243_v57 = vadd.f32 %v1192_v7, %v172_v49  ;;  %v1108_v43 = vld [vmem:[%s1502_s0 + $0x98] sm:$0xff]  }
  0x1c   :  { %v853_v58 = vunpack.c.h.bf16 %v1101_v38  ;;  %v173_v59 = vmul.f32 %v852_v50, %v1178_v1  ;;  %v978_v61 = vpack.c.bf16 %v303_v53, %v302_v47  ;;  %v306_v62 = vmax.f32 %v242_v55, 0.0 }
  0x1d   :  { %1128 = vst [vmem:[%s1505_s3 + $0x40] sm:$0xff] %v973_v52   ;;  %v856_v63 = vunpack.c.l.bf16 %v1102_v51  ;;  %v857_v0 = vunpack.c.h.bf16 %v1102_v51  ;;  %v983_v3 = vpack.c.bf16 %v305_v56, %v304_v54  ;;  %v307_v4 = vmax.f32 %v243_v57, 0.0  ;;  %v1109_v56 = vld [vmem:[%s1502_s0 + $0xa0] sm:$0xff]  }
  0x1e   :  { %v174_v5 = vmul.f32 %v853_v58, %v1178_v1  ;;  %v244_v6 = vadd.f32 %v1192_v7, %v173_v59  ;;  %1129 = vst [vmem:[%s1505_s3 + $0x48] sm:$0xff] %v978_v61   ;;  %v860_v10 = vunpack.c.l.bf16 %v1103_v60  ;;  %v861_v11 = vunpack.c.h.bf16 %v1103_v60 }
  0x1f   :  { %v175_v8 = vmul.f32 %v856_v63, %v1178_v1  ;;  %v176_v9 = vmul.f32 %v857_v0, %v1178_v1  ;;  %1130 = vst [vmem:[%s1505_s3 + $0x50] sm:$0xff] %v983_v3   ;;  %v988_v13 = vpack.c.bf16 %v307_v4, %v306_v62  ;;  %v864_v16 = vunpack.c.l.bf16 %v1104_v2 }
  0x20   :  { %v245_v14 = vadd.f32 %v1192_v7, %v174_v5  ;;  %v308_v15 = vmax.f32 %v244_v6, 0.0  ;;  %v177_v19 = vmul.f32 %v860_v10, %v1178_v1  ;;  %v178_v20 = vmul.f32 %v861_v11, %v1178_v1 }
  0x21   :  { %v246_v17 = vadd.f32 %v1192_v7, %v175_v8  ;;  %v247_v18 = vadd.f32 %v1192_v7, %v176_v9  ;;  %1131 = vst [vmem:[%s1505_s3 + $0x58] sm:$0xff] %v988_v13   ;;  %v865_v22 = vunpack.c.h.bf16 %v1104_v2  ;;  %v179_v23 = vmul.f32 %v864_v16, %v1178_v1  ;;  %v1110_v2 = vld [vmem:[%s1502_s0 + $0xa8] sm:$0xff]   ;;  %v1111_v16 = vld [vmem:[%s1502_s0 + $0xb0] sm:$0xff]  }
  0x22   :  { %v309_v21 = vmax.f32 %v245_v14, 0.0  ;;  %v868_v24 = vunpack.c.l.bf16 %v1105_v12  ;;  %v248_v27 = vadd.f32 %v1192_v7, %v177_v19  ;;  %v249_v28 = vadd.f32 %v1192_v7, %v178_v20 }
  0x23   :  { %v310_v25 = vmax.f32 %v246_v17, 0.0  ;;  %v311_v26 = vmax.f32 %v247_v18, 0.0  ;;  %v180_v31 = vmul.f32 %v865_v22, %v1178_v1  ;;  %v250_v32 = vadd.f32 %v1192_v7, %v179_v23 }
  0x24   :  { %v993_v30 = vpack.c.bf16 %v309_v21, %v308_v15  ;;  %v869_v33 = vunpack.c.h.bf16 %v1105_v12  ;;  %v312_v36 = vmax.f32 %v248_v27, 0.0  ;;  %v313_v37 = vmax.f32 %v249_v28, 0.0  ;;  %v1112_v21 = vld [vmem:[%s1502_s0 + $0xb8] sm:$0xff]  }
  0x25   :  { %v998_v35 = vpack.c.bf16 %v311_v26, %v310_v25  ;;  %v181_v38 = vmul.f32 %v868_v24, %v1178_v1  ;;  %v251_v39 = vadd.f32 %v1192_v7, %v180_v31  ;;  %v314_v40 = vmax.f32 %v250_v32, 0.0 }
  0x26   :  { %1132 = vst [vmem:[%s1505_s3 + $0x60] sm:$0xff] %v993_v30   ;;  %v182_v41 = vmul.f32 %v869_v33, %v1178_v1  ;;  %v872_v42 = vunpack.c.l.bf16 %v1106_v29  ;;  %v1003_v44 = vpack.c.bf16 %v313_v37, %v312_v36  ;;  %v873_v46 = vunpack.c.h.bf16 %v1106_v29 }
  0x27   :  { %1133 = vst [vmem:[%s1505_s3 + $0x68] sm:$0xff] %v998_v35   ;;  %v252_v45 = vadd.f32 %v1192_v7, %v181_v38  ;;  %v876_v47 = vunpack.c.l.bf16 %v1107_v34  ;;  %v315_v48 = vmax.f32 %v251_v39, 0.0  ;;  %v877_v51 = vunpack.c.h.bf16 %v1107_v34  ;;  %v1113_v34 = vld [vmem:[%s1502_s0 + $0xc0] sm:$0xff]  }
  0x28   :  { %v253_v49 = vadd.f32 %v1192_v7, %v182_v41  ;;  %v183_v50 = vmul.f32 %v872_v42, %v1178_v1  ;;  %1134 = vst [vmem:[%s1505_s3 + $0x70] sm:$0xff] %v1003_v44   ;;  %v184_v53 = vmul.f32 %v873_v46, %v1178_v1  ;;  %v880_v55 = vunpack.c.l.bf16 %v1108_v43 }
  0x29   :  { %v316_v52 = vmax.f32 %v252_v45, 0.0  ;;  %v185_v54 = vmul.f32 %v876_v47, %v1178_v1  ;;  %v1008_v57 = vpack.c.bf16 %v315_v48, %v314_v40  ;;  %v186_v60 = vmul.f32 %v877_v51, %v1178_v1  ;;  %v1114_v47 = vld [vmem:[%s1502_s0 + $0xc8] sm:$0xff]  }
  0x2a   :  { %v317_v58 = vmax.f32 %v253_v49, 0.0  ;;  %v254_v59 = vadd.f32 %v1192_v7, %v183_v50  ;;  %v255_v61 = vadd.f32 %v1192_v7, %v184_v53  ;;  %v881_v63 = vunpack.c.h.bf16 %v1108_v43 }
  0x2b   :  { %v256_v62 = vadd.f32 %v1192_v7, %v185_v54  ;;  %v187_v0 = vmul.f32 %v880_v55, %v1178_v1  ;;  %1135 = vst [vmem:[%s1505_s3 + $0x78] sm:$0xff] %v1008_v57   ;;  %v257_v5 = vadd.f32 %v1192_v7, %v186_v60  ;;  %v884_v6 = vunpack.c.l.bf16 %v1109_v56 }
  0x2c   :  { %v1013_v3 = vpack.c.bf16 %v317_v58, %v316_v52  ;;  %v318_v4 = vmax.f32 %v254_v59, 0.0  ;;  %v319_v8 = vmax.f32 %v255_v61, 0.0  ;;  %v188_v10 = vmul.f32 %v881_v63, %v1178_v1  ;;  %v1115_v52 = vld [vmem:[%s1502_s0 + $0xd0] sm:$0xff]   ;;  %v1116_v61 = vld [vmem:[%s1502_s0 + $0xd8] sm:$0xff]  }
  0x2d   :  { %v320_v9 = vmax.f32 %v256_v62, 0.0  ;;  %v258_v11 = vadd.f32 %v1192_v7, %v187_v0  ;;  %v321_v12 = vmax.f32 %v257_v5, 0.0  ;;  %v885_v13 = vunpack.c.h.bf16 %v1109_v56 }
  0x2e   :  { %1136 = vst [vmem:[%s1505_s3 + $0x80] sm:$0xff] %v1013_v3   ;;  %v189_v14 = vmul.f32 %v884_v6, %v1178_v1  ;;  %v888_v15 = vunpack.c.l.bf16 %v1110_v2  ;;  %v1018_v17 = vpack.c.bf16 %v319_v8, %v318_v4  ;;  %v259_v18 = vadd.f32 %v1192_v7, %v188_v10 }
  0x2f   :  { %v322_v19 = vmax.f32 %v258_v11, 0.0  ;;  %v889_v20 = vunpack.c.h.bf16 %v1110_v2  ;;  %v1023_v22 = vpack.c.bf16 %v321_v12, %v320_v9  ;;  %v190_v23 = vmul.f32 %v885_v13, %v1178_v1  ;;  %v1117_v12 = vld [vmem:[%s1502_s0 + $0xe0] sm:$0xff]  }
  0x30   :  { %v260_v24 = vadd.f32 %v1192_v7, %v189_v14  ;;  %v191_v25 = vmul.f32 %v888_v15, %v1178_v1  ;;  %1137 = vst [vmem:[%s1505_s3 + $0x88] sm:$0xff] %v1018_v17   ;;  %v323_v26 = vmax.f32 %v259_v18, 0.0  ;;  %v892_v28 = vunpack.c.l.bf16 %v1111_v16 }
  0x31   :  { %v192_v27 = vmul.f32 %v889_v20, %v1178_v1  ;;  %v893_v29 = vunpack.c.h.bf16 %v1111_v16  ;;  %1138 = vst [vmem:[%s1505_s3 + $0x90] sm:$0xff] %v1023_v22   ;;  %v261_v30 = vadd.f32 %v1192_v7, %v190_v23  ;;  %v896_v33 = vunpack.c.l.bf16 %v1112_v21 }
  0x32   :  { %v324_v31 = vmax.f32 %v260_v24, 0.0  ;;  %v262_v32 = vadd.f32 %v1192_v7, %v191_v25  ;;  %v1028_v35 = vpack.c.bf16 %v323_v26, %v322_v19  ;;  %v193_v37 = vmul.f32 %v892_v28, %v1178_v1 }
  0x33   :  { %v263_v36 = vadd.f32 %v1192_v7, %v192_v27  ;;  %v194_v38 = vmul.f32 %v893_v29, %v1178_v1  ;;  %v325_v39 = vmax.f32 %v261_v30, 0.0  ;;  %v897_v41 = vunpack.c.h.bf16 %v1112_v21  ;;  %v1118_v21 = vld [vmem:[%s1502_s0 + $0xe8] sm:$0xff]  }
  0x34   :  { %v326_v40 = vmax.f32 %v262_v32, 0.0  ;;  %v195_v42 = vmul.f32 %v896_v33, %v1178_v1  ;;  %1139 = vst [vmem:[%s1505_s3 + $0x98] sm:$0xff] %v1028_v35   ;;  %v264_v44 = vadd.f32 %v1192_v7, %v193_v37  ;;  %v900_v46 = vunpack.c.l.bf16 %v1113_v34 }
  0x35   :  { %v327_v43 = vmax.f32 %v263_v36, 0.0  ;;  %v265_v45 = vadd.f32 %v1192_v7, %v194_v38  ;;  %v1033_v48 = vpack.c.bf16 %v325_v39, %v324_v31  ;;  %v196_v49 = vmul.f32 %v897_v41, %v1178_v1  ;;  %v1120_v39 = vld [vmem:[%s1502_s0 + $0xf8] sm:$0xff]  }
  0x36   :  { %v266_v50 = vadd.f32 %v1192_v7, %v195_v42  ;;  %v901_v51 = vunpack.c.h.bf16 %v1113_v34  ;;  %v328_v54 = vmax.f32 %v264_v44, 0.0  ;;  %v197_v56 = vmul.f32 %v900_v46, %v1178_v1  ;;  %v1119_v34 = vld [vmem:[%s1502_s0 + $0xf0] sm:$0xff]  }
  0x37   :  { %v1038_v53 = vpack.c.bf16 %v327_v43, %v326_v40  ;;  %v329_v55 = vmax.f32 %v265_v45, 0.0  ;;  %1140 = vst [vmem:[%s1505_s3 + $0xa0] sm:$0xff] %v1033_v48   ;;  %v267_v57 = vadd.f32 %v1192_v7, %v196_v49  ;;  %v904_v60 = vunpack.c.l.bf16 %v1114_v47 }
  0x38   :  { %v330_v58 = vmax.f32 %v266_v50, 0.0  ;;  %v198_v59 = vmul.f32 %v901_v51, %v1178_v1  ;;  %v268_v63 = vadd.f32 %v1192_v7, %v197_v56  ;;  %v905_v0 = vunpack.c.h.bf16 %v1114_v47 }
  0x39   :  { %1141 = vst [vmem:[%s1505_s3 + $0xa8] sm:$0xff] %v1038_v53   ;;  %v1043_v62 = vpack.c.bf16 %v329_v55, %v328_v54  ;;  %v908_v2 = vunpack.c.l.bf16 %v1115_v52  ;;  %v331_v3 = vmax.f32 %v267_v57, 0.0  ;;  %v199_v5 = vmul.f32 %v904_v60, %v1178_v1 }
  0x3a   :  { %v269_v4 = vadd.f32 %v1192_v7, %v198_v59  ;;  %v909_v6 = vunpack.c.h.bf16 %v1115_v52  ;;  %v332_v8 = vmax.f32 %v268_v63, 0.0  ;;  %v200_v9 = vmul.f32 %v905_v0, %v1178_v1 }
  0x3b   :  { %1142 = vst [vmem:[%s1505_s3 + $0xb0] sm:$0xff] %v1043_v62   ;;  %v201_v10 = vmul.f32 %v908_v2, %v1178_v1  ;;  %v912_v11 = vunpack.c.l.bf16 %v1116_v61  ;;  %v1048_v13 = vpack.c.bf16 %v331_v3, %v330_v58  ;;  %v270_v15 = vadd.f32 %v1192_v7, %v199_v5 }
  0x3c   :  { %v333_v14 = vmax.f32 %v269_v4, 0.0  ;;  %v202_v16 = vmul.f32 %v909_v6, %v1178_v1  ;;  %v271_v17 = vadd.f32 %v1192_v7, %v200_v9  ;;  %v913_v19 = vunpack.c.h.bf16 %v1116_v61 }
  0x3d   :  { %v272_v18 = vadd.f32 %v1192_v7, %v201_v10  ;;  %v203_v20 = vmul.f32 %v912_v11, %v1178_v1  ;;  %1143 = vst [vmem:[%s1505_s3 + $0xb8] sm:$0xff] %v1048_v13   ;;  %v334_v23 = vmax.f32 %v270_v15, 0.0  ;;  %v916_v25 = vunpack.c.l.bf16 %v1117_v12 }
  0x3e   :  { %v1053_v22 = vpack.c.bf16 %v333_v14, %v332_v8  ;;  %v273_v24 = vadd.f32 %v1192_v7, %v202_v16  ;;  %v335_v26 = vmax.f32 %v271_v17, 0.0  ;;  %v204_v28 = vmul.f32 %v913_v19, %v1178_v1 }
  0x3f   :  { %v336_v27 = vmax.f32 %v272_v18, 0.0  ;;  %v274_v29 = vadd.f32 %v1192_v7, %v203_v20  ;;  %v917_v31 = vunpack.c.h.bf16 %v1117_v12  ;;  %v205_v32 = vmul.f32 %v916_v25, %v1178_v1 }
  0x40   :  { %1144 = vst [vmem:[%s1505_s3 + $0xc0] sm:$0xff] %v1053_v22   ;;  %v337_v30 = vmax.f32 %v273_v24, 0.0  ;;  %v920_v33 = vunpack.c.l.bf16 %v1118_v21  ;;  %v1058_v35 = vpack.c.bf16 %v335_v26, %v334_v23  ;;  %v275_v36 = vadd.f32 %v1192_v7, %v204_v28 }
  0x41   :  { %v338_v37 = vmax.f32 %v274_v29, 0.0  ;;  %v921_v38 = vunpack.c.h.bf16 %v1118_v21  ;;  %v206_v41 = vmul.f32 %v917_v31, %v1178_v1  ;;  %v276_v42 = vadd.f32 %v1192_v7, %v205_v32 }
  0x42   :  { %v1063_v40 = vpack.c.bf16 %v337_v30, %v336_v27  ;;  %v207_v43 = vmul.f32 %v920_v33, %v1178_v1  ;;  %1145 = vst [vmem:[%s1505_s3 + $0xc8] sm:$0xff] %v1058_v35   ;;  %v339_v44 = vmax.f32 %v275_v36, 0.0  ;;  %v924_v46 = vunpack.c.l.bf16 %v1119_v34 }
  0x43   :  { %v208_v45 = vmul.f32 %v921_v38, %v1178_v1  ;;  %v925_v47 = vunpack.c.h.bf16 %v1119_v34  ;;  %v277_v48 = vadd.f32 %v1192_v7, %v206_v41  ;;  %v340_v49 = vmax.f32 %v276_v42, 0.0 }
  0x44   :  { %1146 = vst [vmem:[%s1505_s3 + $0xd0] sm:$0xff] %v1063_v40   ;;  %v278_v50 = vadd.f32 %v1192_v7, %v207_v43  ;;  %v928_v51 = vunpack.c.l.bf16 %v1120_v39  ;;  %v1068_v52 = vpack.c.bf16 %v339_v44, %v338_v37  ;;  %v209_v54 = vmul.f32 %v924_v46, %v1178_v1 }
  0x45   :  { %v279_v53 = vadd.f32 %v1192_v7, %v208_v45  ;;  %v210_v55 = vmul.f32 %v925_v47, %v1178_v1  ;;  %v341_v56 = vmax.f32 %v277_v48, 0.0  ;;  %v929_v58 = vunpack.c.h.bf16 %v1120_v39 }
  0x46   :  { %v342_v57 = vmax.f32 %v278_v50, 0.0  ;;  %v211_v59 = vmul.f32 %v928_v51, %v1178_v1  ;;  %1147 = vst [vmem:[%s1505_s3 + $0xd8] sm:$0xff] %v1068_v52   ;;  %v280_v61 = vadd.f32 %v1192_v7, %v209_v54 }
  0x47   :  { %v343_v60 = vmax.f32 %v279_v53, 0.0  ;;  %v281_v62 = vadd.f32 %v1192_v7, %v210_v55  ;;  %v1073_v63 = vpack.c.bf16 %v341_v56, %v340_v49  ;;  %v212_v0 = vmul.f32 %v929_v58, %v1178_v1 }
  0x48   :  { %v282_v2 = vadd.f32 %v1192_v7, %v211_v59  ;;  %v344_v4 = vmax.f32 %v280_v61, 0.0 }
  0x49   :  { %v1078_v3 = vpack.c.bf16 %v343_v60, %v342_v57  ;;  %v345_v5 = vmax.f32 %v281_v62, 0.0  ;;  %1148 = vst [vmem:[%s1505_s3 + $0xe0] sm:$0xff] %v1073_v63   ;;  %v283_v6 = vadd.f32 %v1192_v7, %v212_v0 }
  0x4a   :  { %v346_v8 = vmax.f32 %v282_v2, 0.0 }
  0x4b   :  { %1149 = vst [vmem:[%s1505_s3 + $0xe8] sm:$0xff] %v1078_v3   ;;  %v1083_v9 = vpack.c.bf16 %v345_v5, %v344_v4  ;;  %v347_v10 = vmax.f32 %v283_v6, 0.0 }
  0x4d   :  { %1150 = vst [vmem:[%s1505_s3 + $0xf0] sm:$0xff] %v1083_v9   ;;  %v1088_v1 = vpack.c.bf16 %v347_v10, %v346_v8 }
  0x4f   :  { %1151 = vst [vmem:[%s1505_s3 + $0xf8] sm:$0xff] %v1088_v1  }

// kernel: up_forward.4
= control target key start
LH: loop header
LB: loop body
LE: loop exit
PB: predicated region body
PF: predicated region fallthrough
CT: control target
= control target key end

     0   :  { %s5981_s15 = smov 0   ;;  %s5983_s16 = smov 0   ;;  %s7357_s0 = inlined_call_operand.vmem [shape: bf16[2,18,18,128], index: 0, kind: input, shape index: {}, may-alias: {0,1}]   ;;  %s7358_s1 = inlined_call_operand.vmem [shape: bf16[2,18,18,128], index: 1, kind: input, shape index: {}, may-alias: {0,1}]   ;;  %s7359_s2 = inlined_call_operand.vmem [shape: bf16[9,128,128], index: 2, kind: input, shape index: {}]   ;;  %s7360_s3 = inlined_call_operand.vmem [shape: bf16[2,16,16,128], index: 3, kind: output, shape index: {0}]   ;;  %s7361_s4 = inlined_call_operand.vmem [shape: f32[2,1,2,128], index: 4, kind: output, shape index: {1}]  }
   0x1   :  { %s5985_s17 = smov 0  }
   0x2 LB: > { %s27_s18 = sadd.s32 1, %s5950_s16  ;;  %p4226_p0 = scmp.ge.s32.totalorder %s5954_s17, 1  ;;  %s5954_s17 = sphi %s5985_s17, %s15_s17   ;;  %s5950_s16 = sphi %s5983_s16, %s7448_s16   ;;  %s5946_s15 = sphi %s5981_s15, %s7447_s15  }
   0x3   : > { %p29_p1 = scmp.ge.s32.totalorder %s27_s18, 2  ;;  %p225_p2 = scmp.lt.s32.totalorder %s5954_s17, 3 }
   0x5   : > { %s7450_s18 = smov (%p29_p1, %s27_s18), 0  ;;  %p226_p3 = pnand %p4226_p0, %p225_p2 }
   0x7   : > { %229 = sbr.rel (%p226_p3) target bundleno = 690 (0x2b2), region = 32 }
   0xe   : > { %v6002_v0 = vld [vmem:[%s7359_s2 + $0x40] sm:$0xff]   ;;  %p291_p4 = scmp.lt.s32.totalorder %s5946_s15, 1  ;;  %v6011_v2 = vld [vmem:[%s7359_s2 + $0x48] sm:$0xff]   ;;  %v6023_v4 = vld [vmem:[%s7359_s2 + $0x50] sm:$0xff]   ;;  %vm1489_vm0 = vcmask 1042432   ;;  %vm1490_vm1 = vcmask 1046532  }
   0xf   : > { %v5820_v1 = vld [vmem:[%s7359_s2 + $0x80] sm:$0xff]   ;;  %4960 = vmatprep.subr.bf16.mxu1 %v6002_v0  ;;  %v5822_v3 = vld [vmem:[%s7359_s2 + $0x88] sm:$0xff]   ;;  %v5824_v5 = vld [vmem:[%s7359_s2 + $0x90] sm:$0xff]   ;;  %vm427_vm2 = vsmask.f32 3328  ;;  %vm4061_vm6 = vcmask 1040384  }
  0x10   : > { %5088 = vmatprep.subr.bf16.mxu0 %v5820_v1  ;;  %4961 = vmatpush3.bf16.msra.mxu1 %v6002_v0  ;;  %s7452_s15 = smov (!%p291_p4, %s5946_s15), 1  ;;  %v6033_v6 = vld [vmem:[%s7359_s2 + $0x58] sm:$0xff]   ;;  %v6044_v8 = vld [vmem:[%s7359_s2 + $0x60] sm:$0xff]   ;;  %v6059_v10 = vld [vmem:[%s7359_s2 + $0x68] sm:$0xff]   ;;  %vm428_vm3 = vsmask.f32 7440 }
  0x11   : > { %5089 = vmatpush3.bf16.msra.mxu0 %v5820_v1  ;;  %4962 = vmatprep.subr.bf16.mxu1 %v6011_v2  ;;  %v5826_v7 = vld [vmem:[%s7359_s2 + $0x98] sm:$0xff]   ;;  %s5792_s9 = smul.u32 216, %s7452_s15  ;;  %v5828_v9 = vld [vmem:[%s7359_s2 + $0xa0] sm:$0xff]   ;;  %v5830_v11 = vld [vmem:[%s7359_s2 + $0xa8] sm:$0xff]  }
  0x12   : > { %5090 = vmatprep.subr.bf16.mxu0 %v5822_v3  ;;  %v6072_v17 = vld [vmem:[%s7359_s2 + $0x70] sm:$0xff]   ;;  %vm6076_vm4 = vmor %vm1489_vm0, %vm1490_vm1  ;;  %v6100_v44 = vld [vmem:[%s7359_s2 + $0x78] sm:$0xff]  }
  0x13   : > { %s6054_s20 = scalar_lea.vmem %s7357_s0, %s5792_s9  ;;  %v5832_v24 = vld [vmem:[%s7359_s2 + $0xb0] sm:$0xff]   ;;  %vm6092_vm5 = vmor %vm427_vm2, %vm428_vm3  ;;  %v5834_v50 = vld [vmem:[%s7359_s2 + $0xb8] sm:$0xff]  }
  0x14   : > { %4963 = vmatpush3.bf16.msra.mxu1 %v6011_v2  ;;  %v340_v12 = vld [vmem:[%s6054_s20] sm:$0xf]  ;;  %v341_v13 = vld [vmem:[%s6054_s20 + $0x4] sm:$0xf]  ;;  %v342_v14 = vld [vmem:[%s6054_s20 + $0x8] sm:$0x1] }
  0x15   : > { %5091 = vmatpush3.bf16.msra.mxu0 %v5822_v3  ;;  %4964 = vmatprep.subr.bf16.mxu1 %v6023_v4  ;;  %v431_v15 = vshrl.u32 %v340_v12, 16  ;;  %v434_v16 = vshll.u32 %v340_v12, 16  ;;  %v440_v18 = vshll.u32 %v341_v13, 16  ;;  %v444_v19 = vshrl.u32 %v341_v13, 16  ;;  %v343_v23 = vld [vmem:[%s6054_s20 + $0xc] sm:$0xf] }
  0x16   : > { %5092 = vmatprep.subr.bf16.mxu0 %v5824_v5  ;;  %v450_v20 = vshll.u32 %v342_v14, 16  ;;  %v4312_v22 = vrot.slane %v340_v12, 9  ;;  %v1494_v27 = vrot.slane %v341_v13, 5  ;;  %v1497_v28 = vrot.slane %v342_v14, 5  ;;  %v344_v29 = vld [vmem:[%s6054_s20 + $0x10] sm:$0xf] }
  0x17   : > { %v433_v25 = vrot.slane %v431_v15, 4  ;;  %v436_v26 = vrot.slane %v434_v16, 5  ;;  %v442_v30 = vrot.slane %v440_v18, 5  ;;  %v446_v31 = vrot.slane %v444_v19, 4  ;;  %v345_v33 = vld [vmem:[%s6054_s20 + $0x14] sm:$0x1] }
  0x18   : > { %4965 = vmatpush3.bf16.msra.mxu1 %v6023_v4  ;;  %v452_v32 = vrot.slane %v450_v20, 5  ;;  %v455_v34 = vshrl.u32 %v343_v23, 16  ;;  %v1495_v36 = vsel %vm6076_vm4, %v4312_v22, %v1494_v27  ;;  %v1496_v37 = vrot.slane %v1494_v27, 4  ;;  %v6105_v49 = vld [vmem:[%s6054_s20 + $0x18] sm:$0xf]  ;;  %v5835_v16 = vld [vmem:[%s7359_s2 + $0xc0] sm:$0xff]  }
  0x19   : > { %5093 = vmatpush3.bf16.msra.mxu0 %v5824_v5  ;;  %4966 = vmatprep.subr.bf16.mxu1 %v6033_v6  ;;  %v437_v35 = vor.u32 %v436_v26, %v433_v25  ;;  %v458_v38 = vshll.u32 %v343_v23, 16  ;;  %v447_v40 = vor.u32 %v446_v31, %v442_v30  ;;  %v464_v42 = vshll.u32 %v344_v29, 16  ;;  %v347_v55 = vld [vmem:[%s6054_s20 + $0x1c] sm:$0xf]  ;;  %v348_v5 = vld [vmem:[%s6054_s20 + $0x20] sm:$0x1] }
  0x1a   : > { %5094 = vmatprep.subr.bf16.mxu0 %v5826_v7  ;;  %v457_v41 = vrot.slane %v455_v34, 4  ;;  %v468_v43 = vshrl.u32 %v344_v29, 16  ;;  %v1498_v46 = vsel %vm6076_vm4, %v1496_v37, %v1497_v28  ;;  %v474_v48 = vshll.u32 %v345_v33, 16  ;;  %v6133_v26 = vld [vmem:[%s6054_s20 + $0x24] sm:$0xf] }
  0x1b   : > { %v438_v45 = vrot.slane %v437_v35, 4  ;;  %v460_v47 = vrot.slane %v458_v38, 5  ;;  %v448_v51 = vrot.slane %v447_v40, 4  ;;  %v4328_v52 = vcombine.low %v1495_v36, %v1498_v46  ;;  %v6141_v31 = vld [vmem:[%s6054_s20 + $0x28] sm:$0xf] }
  0x1c   : > { %4967 = vmatpush3.bf16.msra.mxu1 %v6033_v6  ;;  %v466_v53 = vrot.slane %v464_v42, 5  ;;  %v470_v54 = vrot.slane %v468_v43, 4  ;;  %v476_v58 = vrot.slane %v474_v48, 5  ;;  %v4313_v59 = vrot.slane %v343_v23, 9  ;;  %v5836_v38 = vld [vmem:[%s7359_s2 + $0xc8] sm:$0xff]  }
  0x1d   : > { %5095 = vmatpush3.bf16.msra.mxu0 %v5826_v7  ;;  %4968 = vmatprep.subr.bf16.mxu1 %v6044_v8  ;;  %v443_v56 = vsel %vm6092_vm5, %v438_v45, %v442_v30  ;;  %v461_v57 = vor.u32 %v460_v47, %v457_v41  ;;  %v453_v60 = vsel %vm6092_vm5, %v448_v51, %v452_v32  ;;  %v1501_v62 = vrot.slane %v344_v29, 5  ;;  %v351_v40 = vld [vmem:[%s6054_s20 + $0x2c] sm:$0x1] }
  0x1e   : > { %5096 = vmatprep.subr.bf16.mxu0 %v5828_v9  ;;  %5104 = vmatprep.mubr.bf16.mxu0 %v4328_v52  ;;  %v471_v61 = vor.u32 %v470_v54, %v466_v53  ;;  %v1504_v63 = vrot.slane %v345_v33, 5  ;;  %v4248_v1 = vcombine.low %v443_v56, %v453_v60  ;;  %v479_v7 = vshrl.u32 %v6105_v49, 16  ;;  %v6163_v56 = vld [vmem:[%s6054_s20 + $0x30] sm:$0xf] }
  0x1f   : > { %v462_v3 = vrot.slane %v461_v57, 4  ;;  %v1502_v12 = vsel %vm6076_vm4, %v4313_v59, %v1501_v62  ;;  %v1503_v13 = vrot.slane %v1501_v62, 4  ;;  %v488_v14 = vshll.u32 %v347_v55, 16  ;;  %v5837_v60 = vld [vmem:[%s7359_s2 + $0xd0] sm:$0xff]  }
  0x20   : > { %4969 = vmatpush3.bf16.msra.mxu1 %v6044_v8  ;;  %4976 = vmatprep.mubr.bf16.mxu1 %v4248_v1  ;;  %v481_v18 = vrot.slane %v479_v7, 4  ;;  %v492_v20 = vshrl.u32 %v347_v55, 16  ;;  %v498_v25 = vshll.u32 %v348_v5, 16  ;;  %v4314_v33 = vrot.slane %v6105_v49, 9 }
  0x21   : > { %5097 = vmatpush3.bf16.msra.mxu0 %v5828_v9  ;;  %4970 = vmatprep.subr.bf16.mxu1 %v6059_v10  ;;  %v482_v9 = vshll.u32 %v6105_v49, 16  ;;  %v467_v15 = vsel %vm6092_vm5, %v462_v3, %v466_v53  ;;  %v1505_v23 = vsel %vm6076_vm4, %v1503_v13, %v1504_v63  ;;  %v1508_v34 = vrot.slane %v347_v55, 5 }
  0x22   : > { %5098 = vmatprep.subr.bf16.mxu0 %v5830_v11  ;;  %v6138_v28 = vcombine.low %v1502_v12, %v1505_v23  ;;  %v494_v30 = vrot.slane %v492_v20, 4  ;;  %v500_v32 = vrot.slane %v498_v25, 5  ;;  %v1511_v35 = vrot.slane %v348_v5, 5 }
  0x23   : > { %v484_v19 = vrot.slane %v482_v9, 5  ;;  %v503_v41 = vshrl.u32 %v6133_v26, 16  ;;  %v506_v42 = vshll.u32 %v6133_v26, 16  ;;  %v1509_v43 = vsel %vm6076_vm4, %v4314_v33, %v1508_v34  ;;  %v354_v9 = vld [vmem:[%s6054_s20 + $0x38] sm:$0x1] }
  0x24   : > { %4971 = vmatpush3.bf16.msra.mxu1 %v6059_v10  ;;  %7399 = vst [vmem:[#allocation2_spill] sm:$0xff] %v6138_v28  ;;  %v1510_v45 = vrot.slane %v1508_v34, 4  ;;  %v512_v46 = vshll.u32 %v6141_v31, 16  ;;  %v516_v47 = vshrl.u32 %v6141_v31, 16  ;;  %v522_v55 = vshll.u32 %v351_v40, 16 }
  0x25   : > { %5099 = vmatpush3.bf16.msra.mxu0 %v5830_v11  ;;  %4972 = vmatprep.subr.bf16.mxu1 %v6072_v17  ;;  %v472_v11 = vrot.slane %v471_v61, 4  ;;  %v485_v29 = vor.u32 %v484_v19, %v481_v18  ;;  %v508_v51 = vrot.slane %v506_v42, 5  ;;  %v6175_v61 = vld [vmem:[%s6054_s20 + $0x34] sm:$0xf]  ;;  %v1515_v3 = vrot.slane %v6141_v31, 5 }
  0x26   : > { %5100 = vmatprep.subr.bf16.mxu0 %v5832_v24  ;;  %v1512_v52 = vsel %vm6076_vm4, %v1510_v45, %v1511_v35  ;;  %v514_v53 = vrot.slane %v512_v46, 5  ;;  %v518_v54 = vrot.slane %v516_v47, 4  ;;  %v524_v1 = vrot.slane %v522_v55, 5  ;;  %v357_v45 = vld [vmem:[%s6054_s20 + $0x44] sm:$0x1] }
  0x27   : > { %v477_v22 = vsel %vm6092_vm5, %v472_v11, %v476_v58  ;;  %v486_v36 = vrot.slane %v485_v29, 4  ;;  %v6168_v58 = vcombine.low %v1509_v43, %v1512_v52  ;;  %v1518_v7 = vrot.slane %v351_v40, 5  ;;  %v6198_v29 = vld [vmem:[%s6054_s20 + $0x3c] sm:$0xf]  ;;  %v5839_v47 = vld [vmem:[%s7359_s2 + $0xe0] sm:$0xff]  }
  0x28   : > { %4973 = vmatpush3.bf16.msra.mxu1 %v6072_v17  ;;  %v6136_v27 = vcombine.low %v467_v15, %v477_v22  ;;  %v519_v63 = vor.u32 %v518_v54, %v514_v53  ;;  %v527_v11 = vshrl.u32 %v6163_v56, 16  ;;  %v530_v12 = vshll.u32 %v6163_v56, 16 }
  0x29   : > { %5101 = vmatpush3.bf16.msra.mxu0 %v5832_v24  ;;  %4974 = vmatprep.subr.bf16.mxu1 %v6100_v44  ;;  %v490_v24 = vrot.slane %v488_v14, 5  ;;  %7400 = vst [vmem:[#allocation3_spill] sm:$0xff] %v6168_v58  ;;  %v1517_v15 = vrot.slane %v1515_v3, 4  ;;  %v546_v25 = vshll.u32 %v354_v9, 16  ;;  %v1522_v40 = vrot.slane %v6175_v61, 5 }
  0x2a   : > { %5102 = vmatprep.subr.bf16.mxu0 %v5834_v50  ;;  %v520_v13 = vrot.slane %v519_v63, 4  ;;  %v529_v19 = vrot.slane %v527_v11, 4  ;;  %v532_v20 = vrot.slane %v530_v12, 5  ;;  %v551_v46 = vshrl.u32 %v6198_v29, 16  ;;  %v6232_v63 = vld [vmem:[%s6054_s20 + $0x48] sm:$0xf] }
  0x2b   : > { %v495_v37 = vor.u32 %v494_v30, %v490_v24  ;;  %v491_v48 = vsel %vm6092_vm5, %v486_v36, %v490_v24  ;;  %v1519_v23 = vsel %vm6076_vm4, %v1517_v15, %v1518_v7  ;;  %v5838_v30 = vld [vmem:[%s7359_s2 + $0xd8] sm:$0xff]   ;;  %v6208_v36 = vld [vmem:[%s6054_s20 + $0x40] sm:$0xf]  ;;  %v6241_v7 = vld [vmem:[%s6054_s20 + $0x4c] sm:$0xf] }
  0x2c   : > { %4975 = vmatpush3.bf16.msra.mxu1 %v6100_v44  ;;  %v525_v22 = vsel %vm6092_vm5, %v520_v13, %v524_v1  ;;  %v533_v34 = vor.u32 %v532_v20, %v529_v19  ;;  %v553_v54 = vrot.slane %v551_v46, 4  ;;  %v575_v19 = vshrl.u32 %v6232_v63, 16 }
  0x2d   : > { %5103 = vmatpush3.bf16.msra.mxu0 %v5834_v50  ;;  %5004 = vmatprep.subr.bf16.mxu1 %v6002_v0  ;;  %v496_v49 = vrot.slane %v495_v37, 4  ;;  %v505_v50 = vrot.slane %v503_v41, 4  ;;  %v548_v37 = vrot.slane %v546_v25, 5  ;;  %v1525_v41 = vrot.slane %v354_v9, 5  ;;  %v5840_v9 = vld [vmem:[%s7359_s2 + $0xe8] sm:$0xff]  }
  0x2e   : > { %5152 = vmatprep.subr.bf16.mxu0 %v5835_v16  ;;  %v534_v42 = vrot.slane %v533_v34, 4  ;;  %v578_v20 = vshll.u32 %v6232_v63, 16 }
  0x2f   : > { %4977 = vmatmul.mubr.bf16.vlgmr.msra.gmra.mrb[0].mxu1 %v6136_v27  ;;  %v501_v57 = vsel %vm6092_vm5, %v496_v49, %v500_v32  ;;  %v509_v59 = vor.u32 %v508_v51, %v505_v50  ;;  %v1524_v49 = vrot.slane %v1522_v40, 4  ;;  %v560_v50 = vshll.u32 %v6208_v36, 16 }
  0x30   : > { %5105 = vmatmul.mubr.bf16.vlgmr.msra.gmra.mrb[0].mxu0 %v6138_v28  ;;  %5005 = vmatpush3.bf16.msra.mxu1 %v6002_v0  ;;  %v4315_v0 = vrot.slane %v6133_v26, 9  ;;  %v6177_v62 = vcombine.low %v491_v48, %v501_v57  ;;  %v564_v51 = vshrl.u32 %v6208_v36, 16  ;;  %v580_v34 = vrot.slane %v578_v20, 5 }
  0x31   : > { %5153 = vmatpush3.bf16.msra.mxu0 %v5835_v16  ;;  %5006 = vmatprep.subr.bf16.mxu1 %v6011_v2  ;;  %v510_v5 = vrot.slane %v509_v59, 4  ;;  %v536_v16 = vshll.u32 %v6175_v61, 16  ;;  %v1526_v57 = vsel %vm6076_vm4, %v1524_v49, %v1525_v41  ;;  %v562_v59 = vrot.slane %v560_v50, 5  ;;  %v6267_v41 = vld [vmem:[%s6054_s20 + $0x54] sm:$0xf] }
  0x32   : > { %5154 = vmatprep.subr.bf16.mxu0 %v5836_v38  ;;  %5108 = vmatprep.mubr.bf16.mxu0 %v6168_v58  ;;  %v1516_v14 = vsel %vm6076_vm4, %v4315_v0, %v1515_v3  ;;  %v566_v0 = vrot.slane %v564_v51, 4  ;;  %v4318_v49 = vrot.slane %v6232_v63, 9  ;;  %v1536_v50 = vrot.slane %v6241_v7, 5 }
  0x33   : > { %4980 = vmatprep.mubr.bf16.mxu1 %v6177_v62  ;;  %v515_v18 = vsel %vm6092_vm5, %v510_v5, %v514_v53  ;;  %v538_v24 = vrot.slane %v536_v16, 5  ;;  %v6205_v33 = vcombine.low %v1516_v14, %v1519_v23  ;;  %v1529_v14 = vrot.slane %v6208_v36, 5 }
  0x34   : > { %5007 = vmatpush3.bf16.msra.mxu1 %v6011_v2  ;;  %v540_v2 = vshrl.u32 %v6175_v61, 16  ;;  %v6203_v32 = vcombine.low %v515_v18, %v525_v22  ;;  %v567_v12 = vor.u32 %v566_v0, %v562_v59  ;;  %v1532_v16 = vrot.slane %v357_v45, 5  ;;  %v360_v18 = vld [vmem:[%s6054_s20 + $0x50] sm:$0x1] }
  0x35   : > { %5155 = vmatpush3.bf16.msra.mxu0 %v5836_v38  ;;  %5008 = vmatprep.subr.bf16.mxu1 %v6023_v4  ;;  %7401 = vst [vmem:[#allocation4_spill] sm:$0xff] %v6205_v33  ;;  %v4316_v38 = vrot.slane %v6163_v56, 9  ;;  %v539_v52 = vsel %vm6092_vm5, %v534_v42, %v538_v24  ;;  %v1531_v23 = vrot.slane %v1529_v14, 4  ;;  %v5841_v42 = vld [vmem:[%s7359_s2 + $0xf0] sm:$0xff]   ;;  %v1539_v51 = vrot.slane %v360_v18, 5 }
  0x36   : > { %5156 = vmatprep.subr.bf16.mxu0 %v5837_v60  ;;  %v542_v35 = vrot.slane %v540_v2, 4  ;;  %v568_v2 = vrot.slane %v567_v12, 4  ;;  %v1538_v0 = vrot.slane %v1536_v50, 4 }
  0x37   : > { %4981 = vmatmul.mubr.bf16.gmra.mrb[4].mxu1 %v6203_v32  ;;  %v1523_v48 = vsel %vm6076_vm4, %v4316_v38, %v1522_v40  ;;  %v594_v40 = vshll.u32 %v360_v18, 16  ;;  %v6301_v18 = vld [vmem:[%s6054_s20 + $0x60] sm:$0xf] }
  0x38   : > { %5009 = vmatpush3.bf16.msra.mxu1 %v6023_v4  ;;  %5109 = vmatmul.mubr.bf16.gmra.mrb[4].mxu0 %v6205_v33  ;;  %v543_v43 = vor.u32 %v542_v35, %v538_v24  ;;  %v554_v4 = vshll.u32 %v6198_v29, 16  ;;  %v6237_v3 = vcombine.low %v1523_v48, %v1526_v57  ;;  %v584_v24 = vshll.u32 %v6241_v7, 16  ;;  %v5842_v57 = vld [vmem:[%s7359_s2 + $0xf8] sm:$0xff]  }
  0x39   : > { %5157 = vmatpush3.bf16.msra.mxu0 %v5837_v60  ;;  %5010 = vmatprep.subr.bf16.mxu1 %v6033_v6  ;;  %v570_v60 = vshll.u32 %v357_v45, 16  ;;  %v588_v35 = vshrl.u32 %v6241_v7, 16  ;;  %v596_v48 = vrot.slane %v594_v40, 5  ;;  %v623_v40 = vshrl.u32 %v6301_v18, 16 }
  0x3a   : > { %5158 = vmatprep.subr.bf16.mxu0 %v5838_v30  ;;  %v544_v53 = vrot.slane %v543_v43, 4  ;;  %v556_v55 = vrot.slane %v554_v4, 5  ;;  %7402 = vst [vmem:[#allocation5_spill] sm:$0xff] %v6237_v3  ;;  %5112 = vmatprep.mubr.bf16.mxu0 %v6237_v3  ;;  %v586_v38 = vrot.slane %v584_v24, 5  ;;  %v6320_v24 = vld [vmem:[%s7359_s2 + $0x100] sm:$0xff]  }
  0x3b   : > { %v572_v13 = vrot.slane %v570_v60, 5  ;;  %v590_v4 = vrot.slane %v588_v35, 4 }
  0x3c   : > { %5011 = vmatpush3.bf16.msra.mxu1 %v6033_v6  ;;  %v549_v1 = vsel %vm6092_vm5, %v544_v53, %v548_v37  ;;  %v557_v5 = vor.u32 %v556_v55, %v553_v54  ;;  %v4317_v6 = vrot.slane %v6198_v29, 9  ;;  %v1533_v37 = vsel %vm6076_vm4, %v1531_v23, %v1532_v16  ;;  %v363_v54 = vld [vmem:[%s6054_s20 + $0x5c] sm:$0x1]  ;;  %v6315_v23 = vld [vmem:[%s7359_s2] sm:$0xff]  }
  0x3d   : > { %5159 = vmatpush3.bf16.msra.mxu0 %v5838_v30  ;;  %5012 = vmatprep.subr.bf16.mxu1 %v6044_v8  ;;  %v6246_v11 = vcombine.low %v539_v52, %v549_v1  ;;  %v577_v30 = vrot.slane %v575_v19, 4  ;;  %v591_v53 = vor.u32 %v590_v4, %v586_v38  ;;  %v599_v55 = vshrl.u32 %v6267_v41, 16 }
  0x3e   : > { %5160 = vmatprep.subr.bf16.mxu0 %v5839_v47  ;;  %v558_v15 = vrot.slane %v557_v5, 4  ;;  %v1530_v22 = vsel %vm6076_vm4, %v4317_v6, %v1529_v14  ;;  %v618_v16 = vshll.u32 %v363_v54, 16 }
  0x3f   : > { %4984 = vmatprep.mubr.bf16.mxu1 %v6246_v11  ;;  %v6274_v45 = vcombine.low %v1530_v22, %v1533_v37  ;;  %v581_v46 = vor.u32 %v580_v34, %v577_v30  ;;  %v592_v6 = vrot.slane %v591_v53, 4  ;;  %v6310_v22 = vld [vmem:[%s6054_s20 + $0x64] sm:$0xf]  ;;  %v1546_v37 = vrot.slane %v363_v54, 5  ;;  %v6341_v54 = vld [vmem:[%s6054_s20 + $0x70] sm:$0xf] }
  0x40   : > { %5013 = vmatpush3.bf16.msra.mxu1 %v6044_v8  ;;  %v563_v25 = vsel %vm6092_vm5, %v558_v15, %v562_v59  ;;  %v573_v8 = vsel %vm6092_vm5, %v568_v2, %v572_v13  ;;  %v1537_v59 = vsel %vm6076_vm4, %v4318_v49, %v1536_v50  ;;  %v1540_v13 = vsel %vm6076_vm4, %v1538_v0, %v1539_v51  ;;  %v6335_v50 = vld [vmem:[%s6054_s20 + $0x6c] sm:$0xf] }
  0x41   : > { %5161 = vmatpush3.bf16.msra.mxu0 %v5839_v47  ;;  %5014 = vmatprep.subr.bf16.mxu1 %v6059_v10  ;;  %v6272_v43 = vcombine.low %v563_v25, %v573_v8  ;;  %7403 = vst [vmem:[#allocation6_spill] sm:$0xff] %v6274_v45  ;;  %v6277_v47 = vld [vmem:[%s6054_s20 + $0x58] sm:$0xf]  ;;  %v582_v52 = vrot.slane %v581_v46, 4  ;;  %v597_v19 = vsel %vm6092_vm5, %v592_v6, %v596_v48  ;;  %v620_v34 = vrot.slane %v618_v16, 5 }
  0x42   : > { %5162 = vmatprep.subr.bf16.mxu0 %v5840_v9  ;;  %5113 = vmatmul.mubr.bf16.gmra.mrb[8].mxu0 %v6274_v45  ;;  %v608_v60 = vshll.u32 %v6277_v47, 16  ;;  %v612_v1 = vshrl.u32 %v6277_v47, 16  ;;  %v6306_v20 = vcombine.low %v1537_v59, %v1540_v13  ;;  %v1543_v35 = vrot.slane %v6277_v47, 5  ;;  %v369_v6 = vld [vmem:[%s6054_s20 + $0x74] sm:$0x1] }
  0x43   : > { %4985 = vmatmul.mubr.bf16.gmra.mrb[8].mxu1 %v6272_v43  ;;  %v587_v5 = vsel %vm6092_vm5, %v582_v52, %v586_v38  ;;  %v366_v38 = vld [vmem:[%s6054_s20 + $0x68] sm:$0x1]  ;;  %v632_v49 = vshll.u32 %v6310_v22, 16  ;;  %v625_v52 = vrot.slane %v623_v40, 4  ;;  %v1550_v13 = vrot.slane %v6310_v22, 5 }
  0x44   : > { %5015 = vmatpush3.bf16.msra.mxu1 %v6059_v10  ;;  %v602_v10 = vshll.u32 %v6267_v41, 16  ;;  %v610_v14 = vrot.slane %v608_v60, 5  ;;  %v614_v15 = vrot.slane %v612_v1, 4  ;;  %7404 = vst [vmem:[#allocation7_spill] sm:$0xff] %v6306_v20  ;;  %v6322_v25 = vcombine.low %v587_v5, %v597_v19  ;;  %5116 = vmatprep.mubr.bf16.mxu0 %v6306_v20 }
  0x45   : > { %5163 = vmatpush3.bf16.msra.mxu0 %v5840_v9  ;;  %5016 = vmatprep.subr.bf16.mxu1 %v6072_v17  ;;  %v601_v9 = vrot.slane %v599_v55, 4  ;;  %v1545_v48 = vrot.slane %v1543_v35, 4  ;;  %v642_v59 = vshll.u32 %v366_v38, 16  ;;  %v647_v19 = vshrl.u32 %v6335_v50, 16 }
  0x46   : > { %5164 = vmatprep.subr.bf16.mxu0 %v5841_v42  ;;  %v604_v12 = vrot.slane %v602_v10, 5  ;;  %v615_v30 = vor.u32 %v614_v15, %v610_v14  ;;  %4988 = vmatprep.mubr.bf16.mxu1 %v6322_v25 }
  0x47   : > { %v1547_v10 = vsel %vm6076_vm4, %v1545_v48, %v1546_v37  ;;  %v649_v40 = vrot.slane %v647_v19, 4 }
  0x48   : > { %5017 = vmatpush3.bf16.msra.mxu1 %v6072_v17  ;;  %v605_v2 = vor.u32 %v604_v12, %v601_v9  ;;  %v4319_v17 = vrot.slane %v6267_v41, 9  ;;  %v616_v46 = vrot.slane %v615_v30, 4  ;;  %v644_v9 = vrot.slane %v642_v59, 5 }
  0x49   : > { %5165 = vmatpush3.bf16.msra.mxu0 %v5841_v42  ;;  %5018 = vmatprep.subr.bf16.mxu1 %v6100_v44  ;;  %v626_v42 = vshll.u32 %v6301_v18, 16  ;;  %v4320_v12 = vrot.slane %v6301_v18, 9  ;;  %v1552_v30 = vrot.slane %v1550_v13, 4 }
  0x4a   : > { %5166 = vmatprep.subr.bf16.mxu0 %v5842_v57  ;;  %v606_v8 = vrot.slane %v605_v2, 4  ;;  %v1544_v4 = vsel %vm6076_vm4, %v4319_v17, %v1543_v35  ;;  %v621_v55 = vsel %vm6092_vm5, %v616_v46, %v620_v34  ;;  %v650_v2 = vshll.u32 %v6335_v50, 16  ;;  %v6370_v46 = vld [vmem:[%s6054_s20 + $0x7c] sm:$0xf] }
  0x4b   : > { %v628_v53 = vrot.slane %v626_v42, 5  ;;  %v6351_v60 = vcombine.low %v1544_v4, %v1547_v10  ;;  %v1551_v17 = vsel %vm6076_vm4, %v4320_v12, %v1550_v13  ;;  %v656_v34 = vshll.u32 %v6341_v54, 16  ;;  %v372_v10 = vld [vmem:[%s6054_s20 + $0x80] sm:$0x1] }
  0x4c   : > { %5019 = vmatpush3.bf16.msra.mxu1 %v6100_v44  ;;  %v611_v51 = vsel %vm6092_vm5, %v606_v8, %v610_v14  ;;  %v636_v44 = vshrl.u32 %v6310_v22, 16  ;;  %v1553_v14 = vrot.slane %v366_v38, 5  ;;  %v660_v35 = vshrl.u32 %v6341_v54, 16  ;;  %v6365_v8 = vld [vmem:[%s6054_s20 + $0x78] sm:$0xf] }
  0x4d   : > { %5167 = vmatpush3.bf16.msra.mxu0 %v5842_v57  ;;  %5024 = vmatprep.subr.bf16.mxu1 %v6315_v23  ;;  %v634_v57 = vrot.slane %v632_v49, 5  ;;  %v6349_v0 = vcombine.low %v611_v51, %v621_v55  ;;  %7405 = vst [vmem:[#allocation8_spill] sm:$0xff] %v6351_v60  ;;  %v629_v1 = vor.u32 %v628_v53, %v625_v52  ;;  %v652_v42 = vrot.slane %v650_v2, 5 }
  0x4e   : > { %5216 = vmatprep.subr.bf16.mxu0 %v6320_v24  ;;  %v638_v5 = vrot.slane %v636_v44, 4  ;;  %5117 = vmatmul.mubr.bf16.gmra.mrb[12].mxu0 %v6351_v60  ;;  %v1554_v4 = vsel %vm6076_vm4, %v1552_v30, %v1553_v14  ;;  %v658_v48 = vrot.slane %v656_v34, 5  ;;  %v662_v49 = vrot.slane %v660_v35, 4 }
  0x4f   : > { %4989 = vmatmul.mubr.bf16.gmra.mrb[12].mxu1 %v6349_v0  ;;  %v630_v15 = vrot.slane %v629_v1, 4  ;;  %v666_v51 = vshll.u32 %v369_v6, 16  ;;  %v6376_v53 = vcombine.low %v1551_v17, %v1554_v4  ;;  %v653_v44 = vor.u32 %v652_v42, %v649_v40  ;;  %v6391_v17 = vld [vmem:[%s6054_s20 + $0x84] sm:$0xf] }
  0x50   : > { %v639_v16 = vor.u32 %v638_v5, %v634_v57  ;;  %v4321_v55 = vrot.slane %v6335_v50, 9  ;;  %v663_v59 = vor.u32 %v662_v49, %v658_v48  ;;  %v1557_v5 = vrot.slane %v6341_v54, 5 }
  0x51   : > { %v635_v37 = vsel %vm6092_vm5, %v630_v15, %v634_v57  ;;  %7406 = vst [vmem:[#allocation9_spill] sm:$0xff] %v6376_v53  ;;  %v668_v1 = vrot.slane %v666_v51, 5  ;;  %5120 = vmatprep.mubr.bf16.mxu0 %v6376_v53  ;;  %v654_v12 = vrot.slane %v653_v44, 4  ;;  %v1560_v13 = vrot.slane %v369_v6, 5  ;;  %v375_v44 = vld [vmem:[%s6054_s20 + $0x8c] sm:$0x1] }
  0x52   : > { %v640_v38 = vrot.slane %v639_v16, 4  ;;  %v674_v14 = vshll.u32 %v6365_v8, 16  ;;  %v664_v15 = vrot.slane %v663_v59, 4  ;;  %v1558_v16 = vsel %vm6076_vm4, %v4321_v55, %v1557_v5 }
  0x53   : > { %v1559_v19 = vrot.slane %v1557_v5, 4  ;;  %v680_v2 = vshll.u32 %v6370_v46, 16  ;;  %v659_v30 = vsel %vm6092_vm5, %v654_v12, %v658_v48  ;;  %v684_v35 = vshrl.u32 %v6370_v46, 16 }
  0x54   : > { %v645_v52 = vsel %vm6092_vm5, %v640_v38, %v644_v9  ;;  %v671_v9 = vshrl.u32 %v6365_v8, 16  ;;  %v676_v34 = vrot.slane %v674_v14, 5  ;;  %v669_v38 = vsel %vm6092_vm5, %v664_v15, %v668_v1 }
  0x55   : > { %v6380_v57 = vcombine.low %v635_v37, %v645_v52  ;;  %v6397_v37 = vld [vmem:[%s6054_s20 + $0x88] sm:$0xf]  ;;  %v1561_v40 = vsel %vm6076_vm4, %v1559_v19, %v1560_v13  ;;  %v682_v42 = vrot.slane %v680_v2, 5  ;;  %v690_v4 = vshll.u32 %v372_v10, 16  ;;  %v6419_v2 = vld [vmem:[%s6054_s20 + $0x90] sm:$0xf] }
  0x56   : > { %v673_v6 = vrot.slane %v671_v9, 4  ;;  %v6403_v49 = vcombine.low %v659_v30, %v669_v38  ;;  %v6405_v51 = vcombine.low %v1558_v16, %v1561_v40  ;;  %v686_v48 = vrot.slane %v684_v35, 4  ;;  %v6424_v38 = vld [vmem:[%s6054_s20 + $0x94] sm:$0xf] }
  0x57   : > { %4992 = vmatprep.mubr.bf16.mxu1 %v6380_v57  ;;  %v692_v55 = vrot.slane %v690_v4, 5  ;;  %v4322_v59 = vrot.slane %v6365_v8, 9  ;;  %v1564_v5 = vrot.slane %v6370_v46, 5  ;;  %v1567_v12 = vrot.slane %v372_v10, 5 }
  0x58   : > { %7407 = vst [vmem:[#allocation10_spill] sm:$0xff] %v6405_v51  ;;  %v677_v52 = vor.u32 %v676_v34, %v673_v6  ;;  %4993 = vmatmul.mubr.bf16.gmra.mrb[16].mxu1 %v6403_v49  ;;  %5121 = vmatmul.mubr.bf16.gmra.mrb[16].mxu0 %v6405_v51  ;;  %v687_v13 = vor.u32 %v686_v48, %v682_v42  ;;  %v695_v9 = vshrl.u32 %v6391_v17, 16  ;;  %v698_v14 = vshll.u32 %v6391_v17, 16 }
  0x59   : > { %v1565_v15 = vsel %vm6076_vm4, %v4322_v59, %v1564_v5  ;;  %v1566_v16 = vrot.slane %v1564_v5, 4  ;;  %v704_v19 = vshll.u32 %v6397_v37, 16  ;;  %v708_v10 = vshrl.u32 %v6397_v37, 16 }
  0x5a   : > { %v678_v1 = vrot.slane %v677_v52, 4  ;;  %v688_v6 = vrot.slane %v687_v13, 4  ;;  %v697_v34 = vrot.slane %v695_v9, 4  ;;  %v700_v35 = vrot.slane %v698_v14, 5 }
  0x5b   : > { %v1568_v40 = vsel %vm6076_vm4, %v1566_v16, %v1567_v12  ;;  %v706_v4 = vrot.slane %v704_v19, 5  ;;  %v710_v52 = vrot.slane %v708_v10, 4  ;;  %v714_v48 = vshll.u32 %v375_v44, 16 }
  0x5c   : > { %v683_v30 = vsel %vm6092_vm5, %v678_v1, %v682_v42  ;;  %v693_v59 = vsel %vm6092_vm5, %v688_v6, %v692_v55  ;;  %v6430_v5 = vcombine.low %v1565_v15, %v1568_v40  ;;  %v701_v51 = vor.u32 %v700_v35, %v697_v34  ;;  %v378_v42 = vld [vmem:[%s6054_s20 + $0x98] sm:$0x1]  ;;  %v6445_v34 = vld [vmem:[%s6054_s20 + $0x9c] sm:$0xf] }
  0x5d   : > { %v4323_v53 = vrot.slane %v6391_v17, 9  ;;  %v6434_v1 = vcombine.low %v683_v30, %v693_v59  ;;  %v711_v13 = vor.u32 %v710_v52, %v706_v4  ;;  %v716_v9 = vrot.slane %v714_v48, 5  ;;  %v6451_v52 = vld [vmem:[%s6054_s20 + $0xa0] sm:$0xf] }
  0x5e   : > { %7408 = vst [vmem:[#allocation11_spill] sm:$0xff] %v6430_v5  ;;  %v1571_v14 = vrot.slane %v6397_v37, 5  ;;  %5124 = vmatprep.mubr.bf16.mxu0 %v6430_v5  ;;  %v702_v12 = vrot.slane %v701_v51, 4  ;;  %v1574_v16 = vrot.slane %v375_v44, 5  ;;  %v719_v55 = vshrl.u32 %v6419_v2, 16 }
  0x5f   : > { %7409 = vst [vmem:[#allocation12_spill] sm:$0xff] %v6434_v1  ;;  %v722_v15 = vshll.u32 %v6419_v2, 16  ;;  %4996 = vmatprep.mubr.bf16.mxu1 %v6434_v1  ;;  %v712_v19 = vrot.slane %v711_v13, 4  ;;  %v728_v6 = vshll.u32 %v6424_v38, 16  ;;  %v732_v40 = vshrl.u32 %v6424_v38, 16 }
  0x60   : > { %v1572_v10 = vsel %vm6076_vm4, %v4323_v53, %v1571_v14  ;;  %v1573_v30 = vrot.slane %v1571_v14, 4  ;;  %v707_v51 = vsel %vm6092_vm5, %v702_v12, %v706_v4  ;;  %v721_v44 = vrot.slane %v719_v55, 4  ;;  %v381_v12 = vld [vmem:[%s6054_s20 + $0xa4] sm:$0x1] }
  0x61   : > { %v724_v35 = vrot.slane %v722_v15, 5  ;;  %v717_v48 = vsel %vm6092_vm5, %v712_v19, %v716_v9  ;;  %v730_v59 = vrot.slane %v728_v6, 5  ;;  %v738_v13 = vshll.u32 %v378_v42, 16 }
  0x62   : > { %v1575_v53 = vsel %vm6076_vm4, %v1573_v30, %v1574_v16  ;;  %v6457_v14 = vcombine.low %v707_v51, %v717_v48  ;;  %v734_v4 = vrot.slane %v732_v40, 4  ;;  %v4324_v15 = vrot.slane %v6419_v2, 9 }
  0x63   : > { %v6459_v5 = vcombine.low %v1572_v10, %v1575_v53  ;;  %v725_v60 = vor.u32 %v724_v35, %v721_v44  ;;  %v740_v55 = vrot.slane %v738_v13, 5  ;;  %v1578_v20 = vrot.slane %v6424_v38, 5  ;;  %v6473_v44 = vld [vmem:[%s6054_s20 + $0xa8] sm:$0xf]  ;;  %v6478_v53 = vld [vmem:[%s6054_s20 + $0xac] sm:$0xf] }
  0x64   : > { %7410 = vst [vmem:[#allocation13_spill] sm:$0xff] %v6457_v14  ;;  %v1581_v45 = vrot.slane %v378_v42, 5  ;;  %4997 = vmatmul.mubr.bf16.gmra.mrb[20].mxu1 %v6457_v14  ;;  %v735_v16 = vor.u32 %v734_v4, %v730_v59  ;;  %v743_v19 = vshrl.u32 %v6445_v34, 16  ;;  %v746_v10 = vshll.u32 %v6445_v34, 16 }
  0x65   : > { %7411 = vst [vmem:[#allocation14_spill] sm:$0xff] %v6459_v5  ;;  %5125 = vmatmul.mubr.bf16.gmra.mrb[20].mxu0 %v6459_v5  ;;  %v726_v9 = vrot.slane %v725_v60, 4  ;;  %v1579_v30 = vsel %vm6076_vm4, %v4324_v15, %v1578_v20  ;;  %v1580_v6 = vrot.slane %v1578_v20, 4  ;;  %v752_v51 = vshll.u32 %v6451_v52, 16 }
  0x66   : > { %v756_v42 = vshrl.u32 %v6451_v52, 16  ;;  %v736_v60 = vrot.slane %v735_v16, 4  ;;  %v745_v40 = vrot.slane %v743_v19, 4  ;;  %v748_v48 = vrot.slane %v746_v10, 5 }
  0x67   : > { %v731_v35 = vsel %vm6092_vm5, %v726_v9, %v730_v59  ;;  %v1582_v13 = vsel %vm6076_vm4, %v1580_v6, %v1581_v45  ;;  %v754_v4 = vrot.slane %v752_v51, 5  ;;  %v762_v15 = vshll.u32 %v381_v12, 16  ;;  %v6488_v9 = vld [vmem:[%s6054_s20 + $0xb0] sm:$0x1] }
  0x68   : > { %v758_v20 = vrot.slane %v756_v42, 4  ;;  %v741_v5 = vsel %vm6092_vm5, %v736_v60, %v740_v55  ;;  %v6484_v3 = vcombine.low %v1579_v30, %v1582_v13  ;;  %v749_v33 = vor.u32 %v748_v48, %v745_v40  ;;  %v6497_v42 = vld [vmem:[%s6054_s20 + $0xb4] sm:$0xf]  ;;  %v6504_v48 = vld [vmem:[%s6054_s20 + $0xb8] sm:$0xf] }
  0x69   : > { %v4325_v59 = vrot.slane %v6445_v34, 9  ;;  %v6490_v16 = vcombine.low %v731_v35, %v741_v5  ;;  %v764_v10 = vrot.slane %v762_v15, 5  ;;  %v1585_v45 = vrot.slane %v6451_v52, 5  ;;  %v6510_v15 = vld [vmem:[%s6054_s20 + $0xbc] sm:$0x1] }
  0x6a   : > { %7412 = vst [vmem:[#allocation15_spill] sm:$0xff] %v6484_v3  ;;  %v759_v19 = vor.u32 %v758_v20, %v754_v4  ;;  %5128 = vmatprep.mubr.bf16.mxu0 %v6484_v3  ;;  %v750_v6 = vrot.slane %v749_v33, 4  ;;  %v1588_v51 = vrot.slane %v381_v12, 5  ;;  %v767_v55 = vshrl.u32 %v6473_v44, 16 }
  0x6b   : > { %7413 = vst [vmem:[#allocation16_spill] sm:$0xff] %v6490_v16  ;;  %v770_v30 = vshll.u32 %v6473_v44, 16  ;;  %5000 = vmatprep.mubr.bf16.mxu1 %v6490_v16  ;;  %v1586_v5 = vsel %vm6076_vm4, %v4325_v59, %v1585_v45  ;;  %v1587_v35 = vrot.slane %v1585_v45, 4  ;;  %v776_v40 = vshll.u32 %v6478_v53, 16  ;;  %v5910_v16 = vld [vmem:[%s6054_s20 + $0x10] sm:$0xf] }
  0x6c   : > { %v760_v60 = vrot.slane %v759_v19, 4  ;;  %v755_v33 = vsel %vm6092_vm5, %v750_v6, %v754_v4  ;;  %v769_v12 = vrot.slane %v767_v55, 4  ;;  %v780_v20 = vshrl.u32 %v6478_v53, 16 }
  0x6d   : > { %v772_v13 = vrot.slane %v770_v30, 5  ;;  %v1589_v59 = vsel %vm6076_vm4, %v1587_v35, %v1588_v51  ;;  %v778_v45 = vrot.slane %v776_v40, 5  ;;  %v786_v3 = vshll.u32 %v6488_v9, 16  ;;  %v5909_v30 = vld [vmem:[%s6054_s20 + $0xc] sm:$0xf] }
  0x6e   : > { %v765_v19 = vsel %vm6092_vm5, %v760_v60, %v764_v10  ;;  %v6519_v28 = vcombine.low %v1586_v5, %v1589_v59  ;;  %v782_v6 = vrot.slane %v780_v20, 4  ;;  %v6523_v14 = vcombine.low %v5909_v30, %v5910_v16 }
  0x6f   : > { %v6517_v58 = vcombine.low %v755_v33, %v765_v19  ;;  %v773_v4 = vor.u32 %v772_v13, %v769_v12  ;;  %v788_v55 = vrot.slane %v786_v3, 5  ;;  %v791_v1 = vshrl.u32 %v6497_v42, 16 }
  0x70   : > { %7414 = vst [vmem:[#allocation17_spill] sm:$0xff] %v6519_v28  ;;  %v794_v10 = vshll.u32 %v6497_v42, 16  ;;  %5129 = vmatmul.mubr.bf16.gmra.mrb[24].mxu0 %v6519_v28  ;;  %v783_v60 = vor.u32 %v782_v6, %v778_v45  ;;  %v800_v5 = vshll.u32 %v6504_v48, 16  ;;  %v804_v3 = vshrl.u32 %v6504_v48, 16  ;;  %v5912_v6 = vld [vmem:[%s6054_s20 + $0x1c] sm:$0xf] }
  0x71   : > { %5001 = vmatmul.mubr.bf16.gmra.mrb[24].mxu1 %v6517_v58  ;;  %v774_v51 = vrot.slane %v773_v4, 4  ;;  %5168 = vmatprep.mubr.bf16.mxu0 %v6523_v14  ;;  %v793_v16 = vrot.slane %v791_v1, 4  ;;  %v810_v40 = vshll.u32 %v6510_v15, 16  ;;  %v5911_v4 = vld [vmem:[%s6054_s20 + $0x18] sm:$0xf]  ;;  %v6541_v28 = vcombine.low %v6133_v26, %v6141_v31 }
  0x72   : > { %v796_v35 = vrot.slane %v794_v10, 5  ;;  %v784_v12 = vrot.slane %v783_v60, 4  ;;  %v802_v13 = vrot.slane %v800_v5, 5  ;;  %v806_v20 = vrot.slane %v804_v3, 4  ;;  %v6601_v3 = vld [vmem:[%s7359_s2 + $0x110] sm:$0xff]  }
  0x73   : > { %v779_v33 = vsel %vm6092_vm5, %v774_v51, %v778_v45  ;;  %v812_v59 = vrot.slane %v810_v40, 5  ;;  %v6537_v30 = vcombine.low %v5911_v4, %v5912_v6  ;;  %v6547_v45 = vcombine.low %v6198_v29, %v6208_v36  ;;  %v6566_v29 = vld [vmem:[%s7359_s2 + $0x108] sm:$0xff]   ;;  %v5852_v4 = vld [vmem:[%s7359_s2 + $0x18] sm:$0xff]   ;;  %v6652_v6 = vld [vmem:[%s7359_s2 + $0x120] sm:$0xff]  }
  0x74   : > { %v797_v19 = vor.u32 %v796_v35, %v793_v16  ;;  %v789_v1 = vsel %vm6092_vm5, %v784_v12, %v788_v55  ;;  %v807_v10 = vor.u32 %v806_v20, %v802_v13  ;;  %v6551_v51 = vcombine.low %v6232_v63, %v6241_v7  ;;  %v6629_v20 = vld [vmem:[%s7359_s2 + $0x118] sm:$0xff]  }
  0x75   : > { %v6553_v60 = vcombine.low %v779_v33, %v789_v1  ;;  %v6557_v26 = vcombine.low %v6267_v41, %v6277_v47  ;;  %v6561_v31 = vcombine.low %v6301_v18, %v6310_v22  ;;  %v6570_v36 = vcombine.low %v6335_v50, %v6341_v54  ;;  %v6585_v47 = vld [vmem:[%s7359_s2 + $0x8] sm:$0xff]   ;;  %v5913_v18 = vld [vmem:[%s6054_s20] sm:$0xf]  ;;  %v5914_v22 = vld [vmem:[%s6054_s20 + $0x4] sm:$0xf]  ;;  %s4543_s20 = sadd.s32 192, %s5792_s9 }
  0x76   : > { %v798_v5 = vrot.slane %v797_v19, 4  ;;  %v808_v55 = vrot.slane %v807_v10, 4  ;;  %v6574_v63 = vcombine.low %v6365_v8, %v6370_v46  ;;  %v4272_v50 = vcombine.low %v5913_v18, %v5914_v22  ;;  %v5854_v1 = vld [vmem:[%s7359_s2 + $0x20] sm:$0xff]   ;;  %v6663_v10 = vld [vmem:[%s7359_s2 + $0x128] sm:$0xff]   ;;  %v5862_v18 = vld [vmem:[%s7359_s2 + $0x38] sm:$0xff]   ;;  %s6932_s23 = scalar_lea.vmem %s7358_s1, %s4543_s20  ;;  %s4231_s20 = sshll.u32 %s7452_s15, 1 }
  0x77   : > { %5020 = vmatprep.mubr.bf16.mxu1 %v6553_v60  ;;  %v6591_v54 = vcombine.low %v6497_v42, %v6504_v48  ;;  %v4326_v8 = vrot.slane %v6473_v44, 9  ;;  %v1594_v16 = vrot.slane %v6478_v53, 5  ;;  %v1597_v35 = vrot.slane %v6488_v9, 5  ;;  %v6616_v9 = vld [vmem:[%s7359_s2 + $0x10] sm:$0xff]   ;;  %v6697_v22 = vld [vmem:[%s7359_s2 + $0x140] sm:$0xff]   ;;  %s338_s21 = scalar_lea.vmem %s7361_s4, %s4231_s20 }
  0x78   : > { %v803_v7 = vsel %vm6092_vm5, %v798_v5, %v802_v13  ;;  %v813_v41 = vsel %vm6092_vm5, %v808_v55, %v812_v59  ;;  %5169 = vmatmul.mubr.bf16.vlgmr.msra.gmra.mrb[0].mxu0 %v6537_v30  ;;  %v4327_v40 = vrot.slane %v6497_v42, 9  ;;  %v1601_v33 = vrot.slane %v6504_v48, 5  ;;  %v5857_v5 = vld [vmem:[%s7359_s2 + $0x28] sm:$0xff]   ;;  %v6675_v55 = vld [vmem:[%s7359_s2 + $0x130] sm:$0xff]  }
  0x79   : > { %v6594_v46 = vcombine.low %v803_v7, %v813_v41  ;;  %5217 = vmatpush3.bf16.msra.mxu0 %v6320_v24  ;;  %5172 = vmatprep.mubr.bf16.mxu0 %v6541_v28  ;;  %v1604_v12 = vrot.slane %v6510_v15, 5  ;;  %v1595_v24 = vsel %vm6076_vm4, %v4326_v8, %v1594_v16  ;;  %v1596_v13 = vrot.slane %v1594_v16, 4  ;;  %v5859_v7 = vld [vmem:[%s7359_s2 + $0x30] sm:$0xff]   ;;  %v6685_v41 = vld [vmem:[%s7359_s2 + $0x138] sm:$0xff]  }
  0x7a   : > { %5218 = vmatprep.subr.bf16.mxu0 %v6566_v29  ;;  %v6620_v42 = vcombine.low %v6163_v56, %v6175_v61  ;;  %v1602_v48 = vsel %vm6076_vm4, %v4327_v40, %v1601_v33  ;;  %v1603_v15 = vrot.slane %v1601_v33, 4  ;;  %v6712_v8 = vcombine.low %v6419_v2, %v6424_v38  ;;  %v6756_v2 = vld [vmem:[%s7359_s2 + $0x158] sm:$0xff]   ;;  %v6765_v38 = vld [vmem:[%s7359_s2 + $0x160] sm:$0xff]   ;;  %v7419_v40 = vld [vmem:[#allocation16_spill] sm:$0xff] }
  0x7b   : > { %7415 = vst [vmem:[#allocation18_spill] sm:$0xff] %v6594_v46  ;;  %5021 = vmatmul.mubr.bf16.vlgmr.msra.gmra.mrb[28].mxu1 %v6594_v46  ;;  %v1598_v19 = vsel %vm6076_vm4, %v1596_v13, %v1597_v35  ;;  %v7418_v16 = vld [vmem:[#allocation13_spill] sm:$0xff]  ;;  %v5916_v35 = vld [vmem:[%s7359_s2 + $0x88] sm:$0xff]   ;;  %v5917_v33 = vld [vmem:[%s7359_s2 + $0x90] sm:$0xff]  }
  0x7c   : > { %5025 = vmatpush3.bf16.msra.mxu1 %v6315_v23  ;;  %5040 = vmatprep.mubr.bf16.mxu1 %v4272_v50  ;;  %v6634_v56 = vcombine.low %v1595_v24, %v1598_v19  ;;  %v1605_v61 = vsel %vm6076_vm4, %v1603_v15, %v1604_v12  ;;  %v6701_v50 = vcombine.low %v6391_v17, %v6397_v37  ;;  %v6738_v37 = vld [vmem:[%s7359_s2 + $0x148] sm:$0xff]   ;;  %v5918_v12 = vld [vmem:[%s7359_s2 + $0x98] sm:$0xff]   ;;  %v5919_v24 = vld [vmem:[%s7359_s2 + $0xa0] sm:$0xff]  }
  0x7d   : > { %5026 = vmatprep.subr.bf16.mxu1 %v6585_v47  ;;  %5219 = vmatpush3.bf16.msra.mxu0 %v6566_v29  ;;  %v6638_v59 = vcombine.low %v1602_v48, %v1605_v61  ;;  %v6717_v17 = vcombine.low %v6445_v34, %v6451_v52  ;;  %v5915_v34 = vld [vmem:[%s7359_s2 + $0x80] sm:$0xff]   ;;  %v6777_v52 = vld [vmem:[%s7359_s2 + $0x168] sm:$0xff]   ;;  %v5921_v19 = vld [vmem:[%s7359_s2 + $0xb0] sm:$0xff]  }
  0x7e   : > { %5220 = vmatprep.subr.bf16.mxu0 %v6601_v3  ;;  %7416 = vst [vmem:[#allocation19_spill] sm:$0xff] %v6634_v56  ;;  %v7420_v13 = vld [vmem:[#allocation2_spill] sm:$0xff]  ;;  %v6836_v48 = vld [vmem:[%s7359_s2 + $0x188] sm:$0xff]   ;;  %v7422_v61 = vld [vmem:[#allocation4_spill] sm:$0xff] }
  0x7f   : > { %v7421_v15 = vld [vmem:[#allocation3_spill] sm:$0xff] }
  0x80   : > { %5027 = vmatpush3.bf16.msra.mxu1 %v6585_v47  ;;  %5173 = vmatmul.mubr.bf16.gmra.mrb[4].mxu0 %v6620_v42 }
  0x81   : > { %5028 = vmatprep.subr.bf16.mxu1 %v6616_v9  ;;  %5176 = vmatprep.mubr.bf16.mxu0 %v6547_v45 }
  0x82   : > { %5221 = vmatpush3.bf16.msra.mxu0 %v6601_v3 }
  0x83   : > { %5222 = vmatprep.subr.bf16.mxu0 %v6629_v20 }
  0x84   : > { %5029 = vmatpush3.bf16.msra.mxu1 %v6616_v9 }
  0x85   : > { %5030 = vmatprep.subr.bf16.mxu1 %v5852_v4 }
  0x86   : > { %5223 = vmatpush3.bf16.msra.mxu0 %v6629_v20 }
  0x87   : > { %5224 = vmatprep.subr.bf16.mxu0 %v6652_v6 }
  0x88   : > { %5031 = vmatpush3.bf16.msra.mxu1 %v5852_v4  ;;  %5177 = vmatmul.mubr.bf16.gmra.mrb[8].mxu0 %v6551_v51 }
  0x89   : > { %5032 = vmatprep.subr.bf16.mxu1 %v5854_v1  ;;  %5180 = vmatprep.mubr.bf16.mxu0 %v6557_v26 }
  0x8a   : > { %5225 = vmatpush3.bf16.msra.mxu0 %v6652_v6 }
  0x8b   : > { %5226 = vmatprep.subr.bf16.mxu0 %v6663_v10 }
  0x8c   : > { %5033 = vmatpush3.bf16.msra.mxu1 %v5854_v1 }
  0x8d   : > { %5034 = vmatprep.subr.bf16.mxu1 %v5857_v5 }
  0x8e   : > { %5227 = vmatpush3.bf16.msra.mxu0 %v6663_v10 }
  0x8f   : > { %5228 = vmatprep.subr.bf16.mxu0 %v6675_v55 }
  0x90   : > { %5035 = vmatpush3.bf16.msra.mxu1 %v5857_v5  ;;  %5181 = vmatmul.mubr.bf16.gmra.mrb[12].mxu0 %v6561_v31 }
  0x91   : > { %5036 = vmatprep.subr.bf16.mxu1 %v5859_v7  ;;  %5184 = vmatprep.mubr.bf16.mxu0 %v6570_v36 }
  0x92   : > { %5229 = vmatpush3.bf16.msra.mxu0 %v6675_v55 }
  0x93   : > { %5230 = vmatprep.subr.bf16.mxu0 %v6685_v41 }
  0x94   : > { %5037 = vmatpush3.bf16.msra.mxu1 %v5859_v7 }
  0x95   : > { %5038 = vmatprep.subr.bf16.mxu1 %v5862_v18 }
  0x96   : > { %5231 = vmatpush3.bf16.msra.mxu0 %v6685_v41 }
  0x97   : > { %5280 = vmatprep.subr.bf16.mxu0 %v6697_v22 }
  0x98   : > { %5039 = vmatpush3.bf16.msra.mxu1 %v5862_v18  ;;  %5185 = vmatmul.mubr.bf16.gmra.mrb[16].mxu0 %v6574_v63 }
  0x99   : > { %5188 = vmatprep.mubr.bf16.mxu0 %v6701_v50  ;;  %5068 = vmatprep.subr.bf16.mxu1 %v6315_v23 }
  0x9b   : > { %5041 = vmatmul.mubr.bf16.vlgmr.msra.gmra.mrb[0].mxu1 %v6523_v14  ;;  %v6786_v14 = vld [vmem:[%s7359_s2 + $0x170] sm:$0xff]  }
  0x9c   : > { %5044 = vmatprep.mubr.bf16.mxu1 %v6537_v30  ;;  %5069 = vmatpush3.bf16.msra.mxu1 %v6315_v23  ;;  %v6728_v23 = vcombine.low %v6473_v44, %v6478_v53  ;;  %v6795_v44 = vld [vmem:[%s7359_s2 + $0x178] sm:$0xff]   ;;  %v6804_v53 = vld [vmem:[%s7359_s2 + $0x180] sm:$0xff]  }
  0x9d   : > { %5070 = vmatprep.subr.bf16.mxu1 %v6585_v47 }
  0xa0   : > { %5189 = vmatmul.mubr.bf16.gmra.mrb[20].mxu0 %v6712_v8  ;;  %5071 = vmatpush3.bf16.msra.mxu1 %v6585_v47  ;;  %v7417_v47 = vld [vmem:[#allocation12_spill] sm:$0xff] }
  0xa1   : > { %5192 = vmatprep.mubr.bf16.mxu0 %v6717_v17  ;;  %5072 = vmatprep.subr.bf16.mxu1 %v6616_v9 }
  0xa3   : > { %5045 = vmatmul.mubr.bf16.gmra.mrb[4].mxu1 %v6541_v28 }
  0xa4   : > { %5048 = vmatprep.mubr.bf16.mxu1 %v6620_v42  ;;  %5073 = vmatpush3.bf16.msra.mxu1 %v6616_v9  ;;  %v5920_v9 = vld [vmem:[%s7359_s2 + $0xa8] sm:$0xff]  }
  0xa5   : > { %5074 = vmatprep.subr.bf16.mxu1 %v5852_v4 }
  0xa8   : > { %5193 = vmatmul.mubr.bf16.gmra.mrb[24].mxu0 %v6728_v23  ;;  %5075 = vmatpush3.bf16.msra.mxu1 %v5852_v4  ;;  %v6848_v4 = vld [vmem:[%s7359_s2 + $0x190] sm:$0xff]  }
  0xa9   : > { %5232 = vmatprep.mubr.bf16.mxu0 %v6136_v27  ;;  %5076 = vmatprep.subr.bf16.mxu1 %v5854_v1  ;;  %v6747_v27 = vld [vmem:[%s7359_s2 + $0x150] sm:$0xff]  }
  0xab   : > { %5049 = vmatmul.mubr.bf16.gmra.mrb[8].mxu1 %v6547_v45 }
  0xac   : > { %5052 = vmatprep.mubr.bf16.mxu1 %v6551_v51  ;;  %5077 = vmatpush3.bf16.msra.mxu1 %v5854_v1  ;;  %v5922_v1 = vld [vmem:[%s7359_s2 + $0xb8] sm:$0xff]  }
  0xad   : > { %5078 = vmatprep.subr.bf16.mxu1 %v5857_v5 }
  0xb0   : > { %5233 = vmatmul.mubr.bf16.vlgmr.msra.gmra.mrb[0].mxu0 %v6177_v62  ;;  %5079 = vmatpush3.bf16.msra.mxu1 %v5857_v5  ;;  %v6858_v5 = vld [vmem:[%s7359_s2 + $0x198] sm:$0xff]  }
  0xb1   : > { %5281 = vmatpush3.bf16.msra.mxu0 %v6697_v22  ;;  %5236 = vmatprep.mubr.bf16.mxu0 %v6203_v32 }
  0xb2   : > { %5282 = vmatprep.subr.bf16.mxu0 %v6738_v37  ;;  %5080 = vmatprep.subr.bf16.mxu1 %v5859_v7 }
  0xb3   : > { %5053 = vmatmul.mubr.bf16.gmra.mrb[12].mxu1 %v6557_v26 }
  0xb4   : > { %5056 = vmatprep.mubr.bf16.mxu1 %v6561_v31  ;;  %5081 = vmatpush3.bf16.msra.mxu1 %v5859_v7  ;;  %v7423_v7 = vld [vmem:[#allocation5_spill] sm:$0xff] }
  0xb5   : > { %5283 = vmatpush3.bf16.msra.mxu0 %v6738_v37  ;;  %5082 = vmatprep.subr.bf16.mxu1 %v5862_v18 }
  0xb6   : > { %5284 = vmatprep.subr.bf16.mxu0 %v6747_v27 }
  0xb8   : > { %5237 = vmatmul.mubr.bf16.gmra.mrb[4].mxu0 %v6246_v11  ;;  %5083 = vmatpush3.bf16.msra.mxu1 %v5862_v18  ;;  %v5923_v18 = vld [vmem:[%s7359_s2 + $0xc0] sm:$0xff]  }
  0xb9   : > { %5240 = vmatprep.mubr.bf16.mxu0 %v6272_v43  ;;  %5285 = vmatpush3.bf16.msra.mxu0 %v6747_v27 }
  0xba   : > { %5286 = vmatprep.subr.bf16.mxu0 %v6756_v2  ;;  %5132 = vmatprep.subr.bf16.mxu1 %v5915_v34 }
  0xbb   : > { %5057 = vmatmul.mubr.bf16.gmra.mrb[16].mxu1 %v6570_v36 }
  0xbc   : > { %5060 = vmatprep.mubr.bf16.mxu1 %v6574_v63 }
  0xbd   : > { %5287 = vmatpush3.bf16.msra.mxu0 %v6756_v2 }
  0xbe   : > { %5288 = vmatprep.subr.bf16.mxu0 %v6765_v38 }
  0xc0   : > { %5241 = vmatmul.mubr.bf16.gmra.mrb[8].mxu0 %v6322_v25 }
  0xc1   : > { %5244 = vmatprep.mubr.bf16.mxu0 %v6349_v0  ;;  %5289 = vmatpush3.bf16.msra.mxu0 %v6765_v38 }
  0xc2   : > { %5290 = vmatprep.subr.bf16.mxu0 %v6777_v52 }
  0xc3   : > { %5061 = vmatmul.mubr.bf16.gmra.mrb[20].mxu1 %v6701_v50 }
  0xc4   : > { %5064 = vmatprep.mubr.bf16.mxu1 %v6712_v8 }
  0xc5   : > { %5291 = vmatpush3.bf16.msra.mxu0 %v6777_v52 }
  0xc6   : > { %5292 = vmatprep.subr.bf16.mxu0 %v6786_v14 }
  0xc8   : > { %5245 = vmatmul.mubr.bf16.gmra.mrb[12].mxu0 %v6380_v57 }
  0xc9   : > { %5248 = vmatprep.mubr.bf16.mxu0 %v6403_v49  ;;  %5293 = vmatpush3.bf16.msra.mxu0 %v6786_v14 }
  0xca   : > { %5294 = vmatprep.subr.bf16.mxu0 %v6795_v44 }
  0xcb   : > { %5065 = vmatmul.mubr.bf16.gmra.mrb[24].mxu1 %v6717_v17 }
  0xcc   : > { %5084 = vmatprep.mubr.bf16.mxu1 %v6728_v23 }
  0xcd   : > { %5295 = vmatpush3.bf16.msra.mxu0 %v6795_v44 }
  0xce   : > { %5344 = vmatprep.subr.bf16.mxu0 %v6804_v53 }
  0xd0   : > { %5249 = vmatmul.mubr.bf16.gmra.mrb[16].mxu0 %v7417_v47 }
  0xd1   : > { %5252 = vmatprep.mubr.bf16.mxu0 %v7418_v16 }
  0xd3   : > { %5085 = vmatmul.mubr.bf16.vlgmr.msra.gmra.mrb[28].mxu1 %v6591_v54 }
  0xd4   : > { %5133 = vmatpush3.bf16.msra.mxu1 %v5915_v34  ;;  %5148 = vmatprep.mubr.bf16.mxu1 %v6634_v56  ;;  %v7424_v34 = vld [vmem:[#allocation6_spill] sm:$0xff] }
  0xd5   : > { %5134 = vmatprep.subr.bf16.mxu1 %v5916_v35 }
  0xd8   : > { %5135 = vmatpush3.bf16.msra.mxu1 %v5916_v35  ;;  %5253 = vmatmul.mubr.bf16.gmra.mrb[20].mxu0 %v7419_v40  ;;  %v6871_v35 = vld [vmem:[%s7359_s2 + $0x1a0] sm:$0xff]  }
  0xd9   : > { %5136 = vmatprep.subr.bf16.mxu1 %v5917_v33  ;;  %5256 = vmatprep.mubr.bf16.mxu0 %v6517_v58 }
  0xdc   : > { %5137 = vmatpush3.bf16.msra.mxu1 %v5917_v33  ;;  %v5924_v33 = vld [vmem:[%s7359_s2 + $0xc8] sm:$0xff]  }
  0xdd   : > { %5138 = vmatprep.subr.bf16.mxu1 %v5918_v12 }
  0xe0   : > { %5139 = vmatpush3.bf16.msra.mxu1 %v5918_v12  ;;  %5257 = vmatmul.mubr.bf16.gmra.mrb[24].mxu0 %v6553_v60  ;;  %v6882_v12 = vld [vmem:[%s7359_s2 + $0x1a8] sm:$0xff]  }
  0xe1   : > { %5140 = vmatprep.subr.bf16.mxu1 %v5919_v24  ;;  %5296 = vmatprep.mubr.bf16.mxu0 %v7420_v13  ;;  %v5925_v13 = vld [vmem:[%s7359_s2 + $0xd0] sm:$0xff]  }
  0xe4   : > { %5141 = vmatpush3.bf16.msra.mxu1 %v5919_v24  ;;  %v7425_v24 = vld [vmem:[#allocation7_spill] sm:$0xff] }
  0xe5   : > { %5142 = vmatprep.subr.bf16.mxu1 %v5920_v9 }
  0xe8   : > { %5143 = vmatpush3.bf16.msra.mxu1 %v5920_v9  ;;  %5297 = vmatmul.mubr.bf16.vlgmr.msra.gmra.mrb[0].mxu0 %v7421_v15  ;;  %v7426_v9 = vld [vmem:[#allocation8_spill] sm:$0xff] }
  0xe9   : > { %5144 = vmatprep.subr.bf16.mxu1 %v5921_v19  ;;  %5345 = vmatpush3.bf16.msra.mxu0 %v6804_v53 }
  0xea   : > { %5300 = vmatprep.mubr.bf16.mxu0 %v7422_v61  ;;  %5346 = vmatprep.subr.bf16.mxu0 %v6836_v48  ;;  %v7431_v61 = vld [vmem:[#allocation15_spill] sm:$0xff] }
  0xec   : > { %5145 = vmatpush3.bf16.msra.mxu1 %v5921_v19  ;;  %v6894_v19 = vld [vmem:[%s7359_s2 + $0x1b0] sm:$0xff]  }
  0xed   : > { %5146 = vmatprep.subr.bf16.mxu1 %v5922_v1  ;;  %5347 = vmatpush3.bf16.msra.mxu0 %v6836_v48 }
  0xee   : > { %5348 = vmatprep.subr.bf16.mxu0 %v6848_v4 }
  0xf0   : > { %5147 = vmatpush3.bf16.msra.mxu1 %v5922_v1  ;;  %5301 = vmatmul.mubr.bf16.gmra.mrb[4].mxu0 %v7423_v7  ;;  %v5926_v1 = vld [vmem:[%s7359_s2 + $0xd8] sm:$0xff]  }
  0xf1   : > { %5196 = vmatprep.subr.bf16.mxu1 %v5923_v18  ;;  %5304 = vmatprep.mubr.bf16.mxu0 %v7424_v34  ;;  %v6936_v34 = vld [vmem:[%s6932_s23] sm:$0xf] }
  0xf2   : > { %5349 = vmatpush3.bf16.msra.mxu0 %v6848_v4 }
  0xf3   : > { %5149 = vmatmul.mubr.bf16.vlgmr.msra.gmra.mrb[28].mxu1 %v6638_v59  ;;  %5350 = vmatprep.subr.bf16.mxu0 %v6858_v5 }
  0xf4   : > { %5197 = vmatpush3.bf16.msra.mxu1 %v5923_v18  ;;  %5212 = vmatprep.mubr.bf16.mxu1 %v6591_v54  ;;  %v6904_v18 = vld [vmem:[%s7359_s2 + $0x1b8] sm:$0xff]  }
  0xf5   : > { %5198 = vmatprep.subr.bf16.mxu1 %v5924_v33 }
  0xf6   : > { %5351 = vmatpush3.bf16.msra.mxu0 %v6858_v5 }
  0xf7   : > { %5352 = vmatprep.subr.bf16.mxu0 %v6871_v35 }
  0xf8   : > { %5199 = vmatpush3.bf16.msra.mxu1 %v5924_v33  ;;  %5305 = vmatmul.mubr.bf16.gmra.mrb[8].mxu0 %v7425_v24  ;;  %v7427_v33 = vld [vmem:[#allocation9_spill] sm:$0xff]  ;;  %v6916_v24 = vld [vmem:[%s7359_s2 + $0x1c0] sm:$0xff]  }
  0xf9   : > { %5200 = vmatprep.subr.bf16.mxu1 %v5925_v13  ;;  %5308 = vmatprep.mubr.bf16.mxu0 %v7426_v9  ;;  %v7428_v9 = vld [vmem:[#allocation10_spill] sm:$0xff] }
  0xfa   : > { %5353 = vmatpush3.bf16.msra.mxu0 %v6871_v35 }
  0xfb   : > { %5354 = vmatprep.subr.bf16.mxu0 %v6882_v12 }
  0xfc   : > { %5201 = vmatpush3.bf16.msra.mxu1 %v5925_v13  ;;  %v5927_v13 = vld [vmem:[%s7359_s2 + $0xe0] sm:$0xff]  }
  0xfd   : > { %5202 = vmatprep.subr.bf16.mxu1 %v5926_v1 }
  0xfe   : > { %5355 = vmatpush3.bf16.msra.mxu0 %v6882_v12 }
  0xff   : > { %5356 = vmatprep.subr.bf16.mxu0 %v6894_v19 }
 0x100   : > { %5203 = vmatpush3.bf16.msra.mxu1 %v5926_v1  ;;  %5309 = vmatmul.mubr.bf16.gmra.mrb[12].mxu0 %v7427_v33  ;;  %v5928_v1 = vld [vmem:[%s7359_s2 + $0xe8] sm:$0xff]   ;;  %v5929_v33 = vld [vmem:[%s7359_s2 + $0xf0] sm:$0xff]  }
 0x101   : > { %5204 = vmatprep.subr.bf16.mxu1 %v5927_v13  ;;  %5312 = vmatprep.mubr.bf16.mxu0 %v7428_v9  ;;  %v7429_v9 = vld [vmem:[#allocation11_spill] sm:$0xff] }
 0x102   : > { %5357 = vmatpush3.bf16.msra.mxu0 %v6894_v19 }
 0x103   : > { %5358 = vmatprep.subr.bf16.mxu0 %v6904_v18 }
 0x104   : > { %5205 = vmatpush3.bf16.msra.mxu1 %v5927_v13  ;;  %v7430_v13 = vld [vmem:[#allocation14_spill] sm:$0xff] }
 0x105   : > { %5206 = vmatprep.subr.bf16.mxu1 %v5928_v1 }
 0x106   : > { %5359 = vmatpush3.bf16.msra.mxu0 %v6904_v18 }
 0x107   : > { %5408 = vmatprep.subr.bf16.mxu0 %v6916_v24 }
 0x108   : > { %5207 = vmatpush3.bf16.msra.mxu1 %v5928_v1  ;;  %5313 = vmatmul.mubr.bf16.gmra.mrb[16].mxu0 %v7429_v9  ;;  %v6939_v1 = vld [vmem:[%s6932_s23 + $0x4] sm:$0xf]  ;;  %v5930_v9 = vld [vmem:[%s7359_s2 + $0xf8] sm:$0xff]  }
 0x109   : > { %5208 = vmatprep.subr.bf16.mxu1 %v5929_v33  ;;  %5316 = vmatprep.mubr.bf16.mxu0 %v7430_v13  ;;  %v6946_v7 = vcombine.low %v6936_v34, %v6939_v1  ;;  %v7432_v13 = vld [vmem:[#allocation17_spill] sm:$0xff] }
 0x10c   : > { %5209 = vmatpush3.bf16.msra.mxu1 %v5929_v33  ;;  %v5931_v33 = vld [vmem:[%s7359_s2 + $0x100] sm:$0xff]  }
 0x10d   : > { %5210 = vmatprep.subr.bf16.mxu1 %v5930_v9 }
 0x110   : > { %5211 = vmatpush3.bf16.msra.mxu1 %v5930_v9  ;;  %5317 = vmatmul.mubr.bf16.gmra.mrb[20].mxu0 %v7431_v61  ;;  %v2259_v9 = vshrl.u32 %v6936_v34, 16  ;;  %v2272_v61 = vshrl.u32 %v6939_v1, 16 }
 0x111   : > { %5260 = vmatprep.subr.bf16.mxu1 %v5931_v33  ;;  %5320 = vmatprep.mubr.bf16.mxu0 %v7432_v13  ;;  %v2262_v13 = vshll.u32 %v6936_v34, 16 }
 0x113   : > { %5213 = vmatmul.mubr.bf16.vlgmr.msra.gmra.mrb[28].mxu1 %v6946_v7 }
 0x114   : > { %5261 = vmatpush3.bf16.msra.mxu1 %v5931_v33  ;;  %5276 = vmatprep.mubr.bf16.mxu1 %v6594_v46  ;;  %v2268_v33 = vshll.u32 %v6939_v1, 16  ;;  %v2274_v46 = vrot.slane %v2272_v61, 4 }
 0x115   : > { %5262 = vmatprep.subr.bf16.mxu1 %v6566_v29 }
 0x116   : > { %v2270_v15 = vrot.slane %v2268_v33, 5  ;;  %v7019_v33 = vld [vmem:[%s7359_s2 + $0x1e8] sm:$0xff]  }
 0x118   : > { %5263 = vmatpush3.bf16.msra.mxu1 %v6566_v29  ;;  %5321 = vmatmul.mubr.bf16.gmra.mrb[24].mxu0 %v6634_v56  ;;  %v6969_v29 = vld [vmem:[%s7359_s2 + $0x1c8] sm:$0xff]   ;;  %v2264_v56 = vrot.slane %v2262_v13, 5  ;;  %v2275_v13 = vor.u32 %v2274_v46, %v2270_v15 }
 0x119   : > { %5264 = vmatprep.subr.bf16.mxu1 %v6601_v3  ;;  %5360 = vmatprep.mubr.bf16.mxu0 %v6537_v30  ;;  %v2261_v30 = vrot.slane %v2259_v9, 4  ;;  %v7004_v9 = vld [vmem:[%s7359_s2 + $0x1e0] sm:$0xff]  }
 0x11c   : > { %5265 = vmatpush3.bf16.msra.mxu1 %v6601_v3  ;;  %v6976_v3 = vld [vmem:[%s6932_s23 + $0x8] sm:$0x1] }
 0x11d   : > { %5266 = vmatprep.subr.bf16.mxu1 %v6629_v20  ;;  %v2278_v61 = vshll.u32 %v6976_v3, 16 }
 0x11f   : > { %v2280_v46 = vrot.slane %v2278_v61, 5 }
 0x120   : > { %5267 = vmatpush3.bf16.msra.mxu1 %v6629_v20  ;;  %5361 = vmatmul.mubr.bf16.vlgmr.msra.gmra.mrb[0].mxu0 %v6541_v28  ;;  %v6983_v20 = vld [vmem:[%s7359_s2 + $0x1d0] sm:$0xff]   ;;  %v2265_v28 = vor.u32 %v2264_v56, %v2261_v30  ;;  %v2276_v56 = vrot.slane %v2275_v13, 4 }
 0x121   : > { %5268 = vmatprep.subr.bf16.mxu1 %v6652_v6  ;;  %5409 = vmatpush3.bf16.msra.mxu0 %v6916_v24 }
 0x122   : > { %5364 = vmatprep.mubr.bf16.mxu0 %v6620_v42  ;;  %5410 = vmatprep.subr.bf16.mxu0 %v6969_v29  ;;  %v6993_v42 = vld [vmem:[%s7359_s2 + $0x1d8] sm:$0xff]  }
 0x124   : > { %5269 = vmatpush3.bf16.msra.mxu1 %v6652_v6  ;;  %v2266_v6 = vrot.slane %v2265_v28, 4 }
 0x125   : > { %5270 = vmatprep.subr.bf16.mxu1 %v6663_v10  ;;  %5411 = vmatpush3.bf16.msra.mxu0 %v6969_v29 }
 0x126   : > { %5412 = vmatprep.subr.bf16.mxu0 %v6983_v20 }
 0x128   : > { %5271 = vmatpush3.bf16.msra.mxu1 %v6663_v10  ;;  %5365 = vmatmul.mubr.bf16.gmra.mrb[4].mxu0 %v6547_v45  ;;  %v2271_v45 = vsel %vm6092_vm5, %v2266_v6, %v2270_v15  ;;  %v2281_v10 = vsel %vm6092_vm5, %v2276_v56, %v2280_v46 }
 0x129   : > { %5272 = vmatprep.subr.bf16.mxu1 %v6675_v55  ;;  %5368 = vmatprep.mubr.bf16.mxu0 %v6551_v51  ;;  %v7013_v51 = vcombine.low %v2271_v45, %v2281_v10 }
 0x12a   : > { %5413 = vmatpush3.bf16.msra.mxu0 %v6983_v20 }
 0x12b   : > { %5414 = vmatprep.subr.bf16.mxu0 %v6993_v42 }
 0x12c   : > { %5273 = vmatpush3.bf16.msra.mxu1 %v6675_v55  ;;  %v7031_v55 = vld [vmem:[%s7359_s2 + $0x1f0] sm:$0xff]  }
 0x12d   : > { %5274 = vmatprep.subr.bf16.mxu1 %v6685_v41 }
 0x12e   : > { %5415 = vmatpush3.bf16.msra.mxu0 %v6993_v42 }
 0x12f   : > { %5416 = vmatprep.subr.bf16.mxu0 %v7004_v9 }
 0x130   : > { %5275 = vmatpush3.bf16.msra.mxu1 %v6685_v41  ;;  %5369 = vmatmul.mubr.bf16.gmra.mrb[8].mxu0 %v6557_v26  ;;  %v7041_v26 = vld [vmem:[%s7359_s2 + $0x1f8] sm:$0xff]  }
 0x131   : > { %5324 = vmatprep.subr.bf16.mxu1 %v6697_v22  ;;  %5372 = vmatprep.mubr.bf16.mxu0 %v6561_v31  ;;  %v7052_v31 = vld [vmem:[%s7359_s2 + $0x200] sm:$0xff]  }
 0x132   : > { %5417 = vmatpush3.bf16.msra.mxu0 %v7004_v9 }
 0x133   : > { %5277 = vmatmul.mubr.bf16.vlgmr.msra.gmra.mrb[28].mxu1 %v7013_v51  ;;  %5418 = vmatprep.subr.bf16.mxu0 %v7019_v33 }
 0x134   : > { %5325 = vmatpush3.bf16.msra.mxu1 %v6697_v22  ;;  %5340 = vmatprep.mubr.bf16.mxu1 %v6638_v59  ;;  %v2583_v22 = vrot.slane %v6976_v3, 5 }
 0x135   : > { %5326 = vmatprep.subr.bf16.mxu1 %v6738_v37 }
 0x136   : > { %5419 = vmatpush3.bf16.msra.mxu0 %v7019_v33 }
 0x137   : > { %5420 = vmatprep.subr.bf16.mxu0 %v7031_v55 }
 0x138   : > { %5327 = vmatpush3.bf16.msra.mxu1 %v6738_v37  ;;  %5373 = vmatmul.mubr.bf16.gmra.mrb[12].mxu0 %v6570_v36  ;;  %v2580_v36 = vrot.slane %v6939_v1, 5  ;;  %v7148_v37 = vld [vmem:[%s6932_s23 + $0x10] sm:$0xf] }
 0x139   : > { %5328 = vmatprep.subr.bf16.mxu1 %v6747_v27  ;;  %5376 = vmatprep.mubr.bf16.mxu0 %v6574_v63  ;;  %v4418_v63 = vrot.slane %v6936_v34, 9  ;;  %v3191_v15 = vshrl.u32 %v7148_v37, 16 }
 0x13a   : > { %5421 = vmatpush3.bf16.msra.mxu0 %v7031_v55  ;;  %v2582_v41 = vrot.slane %v2580_v36, 4 }
 0x13b   : > { %5422 = vmatprep.subr.bf16.mxu0 %v7041_v26 }
 0x13c   : > { %5329 = vmatpush3.bf16.msra.mxu1 %v6747_v27 }
 0x13d   : > { %5330 = vmatprep.subr.bf16.mxu1 %v6756_v2 }
 0x13e   : > { %5423 = vmatpush3.bf16.msra.mxu0 %v7041_v26 }
 0x13f   : > { %5472 = vmatprep.subr.bf16.mxu0 %v7052_v31 }
 0x140   : > { %5331 = vmatpush3.bf16.msra.mxu1 %v6756_v2  ;;  %5377 = vmatmul.mubr.bf16.gmra.mrb[16].mxu0 %v6701_v50  ;;  %v2581_v50 = vsel %vm6076_vm4, %v4418_v63, %v2580_v36  ;;  %v7162_v2 = vld [vmem:[%s7359_s2 + $0x238] sm:$0xff]   ;;  %v7437_v63 = vld [vmem:[#allocation6_spill] sm:$0xff] }
 0x141   : > { %5332 = vmatprep.subr.bf16.mxu1 %v6765_v38  ;;  %5380 = vmatprep.mubr.bf16.mxu0 %v6712_v8  ;;  %v2584_v8 = vsel %vm6076_vm4, %v2582_v41, %v2583_v22  ;;  %v7438_v22 = vld [vmem:[#allocation7_spill] sm:$0xff] }
 0x144   : > { %5333 = vmatpush3.bf16.msra.mxu1 %v6765_v38 }
 0x145   : > { %5334 = vmatprep.subr.bf16.mxu1 %v6777_v52 }
 0x148   : > { %5335 = vmatpush3.bf16.msra.mxu1 %v6777_v52  ;;  %5381 = vmatmul.mubr.bf16.gmra.mrb[20].mxu0 %v6717_v17  ;;  %v7077_v17 = vcombine.low %v2581_v50, %v2584_v8 }
 0x149   : > { %5336 = vmatprep.subr.bf16.mxu1 %v6786_v14  ;;  %5384 = vmatprep.mubr.bf16.mxu0 %v6728_v23  ;;  %v7090_v23 = vld [vmem:[%s7359_s2 + $0x208] sm:$0xff]  }
 0x14c   : > { %5337 = vmatpush3.bf16.msra.mxu1 %v6786_v14 }
 0x14d   : > { %5338 = vmatprep.subr.bf16.mxu1 %v6795_v44 }
 0x150   : > { %5339 = vmatpush3.bf16.msra.mxu1 %v6795_v44  ;;  %5385 = vmatmul.mubr.bf16.gmra.mrb[24].mxu0 %v6591_v54  ;;  %v7145_v54 = vld [vmem:[%s6932_s23 + $0xc] sm:$0xf] }
 0x151   : > { %5388 = vmatprep.subr.bf16.mxu1 %v6804_v53  ;;  %5424 = vmatprep.mubr.bf16.mxu0 %v6177_v62  ;;  %v7101_v62 = vld [vmem:[%s7359_s2 + $0x210] sm:$0xff]   ;;  %v4452_v27 = vcombine.low %v7145_v54, %v7148_v37 }
 0x153   : > { %5341 = vmatmul.mubr.bf16.vlgmr.msra.gmra.mrb[28].mxu1 %v7077_v17 }
 0x154   : > { %5389 = vmatpush3.bf16.msra.mxu1 %v6804_v53  ;;  %5404 = vmatprep.mubr.bf16.mxu1 %v6946_v7 }
 0x155   : > { %5390 = vmatprep.subr.bf16.mxu1 %v6836_v48 }
 0x158   : > { %5391 = vmatpush3.bf16.msra.mxu1 %v6836_v48  ;;  %5425 = vmatmul.mubr.bf16.vlgmr.msra.gmra.mrb[0].mxu0 %v6203_v32  ;;  %v7110_v32 = vld [vmem:[%s7359_s2 + $0x218] sm:$0xff]   ;;  %v3181_v48 = vshll.u32 %v7145_v54, 16 }
 0x159   : > { %5392 = vmatprep.subr.bf16.mxu1 %v6848_v4  ;;  %5473 = vmatpush3.bf16.msra.mxu0 %v7052_v31 }
 0x15a   : > { %5428 = vmatprep.mubr.bf16.mxu0 %v6246_v11  ;;  %5474 = vmatprep.subr.bf16.mxu0 %v7090_v23  ;;  %v7121_v11 = vld [vmem:[%s7359_s2 + $0x220] sm:$0xff]   ;;  %v3183_v34 = vrot.slane %v3181_v48, 5 }
 0x15c   : > { %5393 = vmatpush3.bf16.msra.mxu1 %v6848_v4  ;;  %v3187_v4 = vshll.u32 %v7148_v37, 16 }
 0x15d   : > { %5394 = vmatprep.subr.bf16.mxu1 %v6858_v5  ;;  %5475 = vmatpush3.bf16.msra.mxu0 %v7090_v23 }
 0x15e   : > { %5476 = vmatprep.subr.bf16.mxu0 %v7101_v62 }
 0x160   : > { %5395 = vmatpush3.bf16.msra.mxu1 %v6858_v5  ;;  %5429 = vmatmul.mubr.bf16.gmra.mrb[4].mxu0 %v6272_v43  ;;  %v7130_v43 = vld [vmem:[%s7359_s2 + $0x228] sm:$0xff]  }
 0x161   : > { %5396 = vmatprep.subr.bf16.mxu1 %v6871_v35  ;;  %5432 = vmatprep.mubr.bf16.mxu0 %v6322_v25  ;;  %v7141_v25 = vld [vmem:[%s7359_s2 + $0x230] sm:$0xff]  }
 0x162   : > { %5477 = vmatpush3.bf16.msra.mxu0 %v7101_v62 }
 0x163   : > { %5478 = vmatprep.subr.bf16.mxu0 %v7110_v32 }
 0x164   : > { %5397 = vmatpush3.bf16.msra.mxu1 %v6871_v35  ;;  %v3189_v35 = vrot.slane %v3187_v4, 5  ;;  %v7442_v4 = vld [vmem:[#allocation11_spill] sm:$0xff] }
 0x165   : > { %5398 = vmatprep.subr.bf16.mxu1 %v6882_v12 }
 0x166   : > { %5479 = vmatpush3.bf16.msra.mxu0 %v7110_v32 }
 0x167   : > { %5480 = vmatprep.subr.bf16.mxu0 %v7121_v11 }
 0x168   : > { %5399 = vmatpush3.bf16.msra.mxu1 %v6882_v12  ;;  %5433 = vmatmul.mubr.bf16.gmra.mrb[8].mxu0 %v6349_v0  ;;  %v3193_v12 = vrot.slane %v3191_v15, 4 }
 0x169   : > { %5400 = vmatprep.subr.bf16.mxu1 %v6894_v19  ;;  %5436 = vmatprep.mubr.bf16.mxu0 %v6380_v57 }
 0x16a   : > { %5481 = vmatpush3.bf16.msra.mxu0 %v7121_v11  ;;  %v3194_v1 = vor.u32 %v3193_v12, %v3189_v35 }
 0x16b   : > { %5482 = vmatprep.subr.bf16.mxu0 %v7130_v43 }
 0x16c   : > { %5401 = vmatpush3.bf16.msra.mxu1 %v6894_v19  ;;  %v7209_v19 = vld [vmem:[%s6932_s23 + $0x14] sm:$0x1]  ;;  %v3195_v28 = vrot.slane %v3194_v1, 4  ;;  %s4544_s23 = sshll.u32 %s7452_s15, 7 }
 0x16d   : > { %5402 = vmatprep.subr.bf16.mxu1 %v6904_v18  ;;  %v3502_v15 = vrot.slane %v7209_v19, 5  ;;  %s7301_s13 = scalar_lea.vmem %s7360_s3, %s4544_s23 }
 0x16e   : > { %v7151_v0 = vpop.f32.mrb[0].mxu1  ;;  %5483 = vmatpush3.bf16.msra.mxu0 %v7130_v43 }
 0x16f   : > { %v7154_v57 = vpop.f32.mrb[1].mxu1  ;;  %5484 = vmatprep.subr.bf16.mxu0 %v7141_v25 }
 0x170   : > { %5403 = vmatpush3.bf16.msra.mxu1 %v6904_v18  ;;  %v7165_v38 = vpop.f32.mrb[2].mxu1  ;;  %5437 = vmatmul.mubr.bf16.gmra.mrb[12].mxu0 %v6403_v49 }
 0x171   : > { %v7168_v52 = vpop.f32.mrb[3].mxu1  ;;  %5452 = vmatprep.subr.bf16.mxu1 %v6916_v24  ;;  %5440 = vmatprep.mubr.bf16.mxu0 %v7417_v47  ;;  %v3178_v47 = vshrl.u32 %v7145_v54, 16 }
 0x172   : > { %5485 = vmatpush3.bf16.msra.mxu0 %v7141_v25 }
 0x173   : > { %5405 = vmatmul.mubr.bf16.vlgmr.msra.gmra.mrb[28].mxu1 %v4452_v27  ;;  %5486 = vmatprep.subr.bf16.mxu0 %v7162_v2  ;;  %v3180_v7 = vrot.slane %v3178_v47, 4  ;;  %v7440_v27 = vld [vmem:[#allocation9_spill] sm:$0xff]  ;;  %v7441_v47 = vld [vmem:[#allocation10_spill] sm:$0xff] }
 0x174   : > { %5453 = vmatpush3.bf16.msra.mxu1 %v6916_v24  ;;  %5468 = vmatprep.mubr.bf16.mxu1 %v7013_v51  ;;  %v7435_v51 = vld [vmem:[#allocation4_spill] sm:$0xff] }
 0x175   : > { %5454 = vmatprep.subr.bf16.mxu1 %v6969_v29  ;;  %v3184_v18 = vor.u32 %v3183_v34, %v3180_v7  ;;  %v7444_v7 = vld [vmem:[#allocation15_spill] sm:$0xff]  ;;  %v7445_v34 = vld [vmem:[#allocation17_spill] sm:$0xff] }
 0x176   : > { %v7177_v14 = vpop.f32.mrb[4].mxu1  ;;  %5487 = vmatpush3.bf16.msra.mxu0 %v7162_v2 }
 0x177   : > { %v7180_v49 = vpop.f32.mrb[5].mxu1 }
 0x178   : > { %5455 = vmatpush3.bf16.msra.mxu1 %v6969_v29  ;;  %v7183_v44 = vpop.f32.mrb[6].mxu1  ;;  %5441 = vmatmul.mubr.bf16.gmra.mrb[16].mxu0 %v7418_v16  ;;  %v3197_v29 = vshll.u32 %v7209_v19, 16 }
 0x179   : > { %v7186_v53 = vpop.f32.mrb[7].mxu1  ;;  %5456 = vmatprep.subr.bf16.mxu1 %v6983_v20  ;;  %5444 = vmatprep.mubr.bf16.mxu0 %v7419_v40 }
 0x17a   : > { %v3199_v13 = vrot.slane %v3197_v29, 5 }
 0x17c   : > { %5457 = vmatpush3.bf16.msra.mxu1 %v6983_v20  ;;  %v7433_v20 = vld [vmem:[#allocation18_spill] sm:$0xff]  ;;  %v3200_v56 = vsel %vm6092_vm5, %v3195_v28, %v3199_v13 }
 0x17d   : > { %5458 = vmatprep.subr.bf16.mxu1 %v6993_v42 }
 0x17e   : > { %v7196_v16 = vpop.f32.mrb[8].mxu1 }
 0x17f   : > { %v7198_v5 = vpop.f32.mrb[9].mxu1 }
 0x180   : > { %5459 = vmatpush3.bf16.msra.mxu1 %v6993_v42  ;;  %v7201_v40 = vpop.f32.mrb[10].mxu1  ;;  %5445 = vmatmul.mubr.bf16.gmra.mrb[20].mxu0 %v6517_v58  ;;  %v7434_v42 = vld [vmem:[#allocation3_spill] sm:$0xff] }
 0x181   : > { %v7204_v24 = vpop.f32.mrb[11].mxu1  ;;  %5460 = vmatprep.subr.bf16.mxu1 %v7004_v9  ;;  %5448 = vmatprep.mubr.bf16.mxu0 %v6553_v60  ;;  %v3185_v60 = vrot.slane %v3184_v18, 4 }
 0x183   : > { %v3190_v6 = vsel %vm6092_vm5, %v3185_v60, %v3189_v35  ;;  %v7446_v35 = vld [vmem:[#allocation19_spill] sm:$0xff] }
 0x184   : > { %5461 = vmatpush3.bf16.msra.mxu1 %v7004_v9  ;;  %v4477_v45 = vcombine.low %v3190_v6, %v3200_v56 }
 0x185   : > { %5462 = vmatprep.subr.bf16.mxu1 %v7019_v33 }
 0x186   : > { %v7214_v58 = vpop.f32.mrb[12].mxu1 }
 0x187   : > { %v7216_v30 = vpop.f32.mrb[13].mxu1 }
 0x188   : > { %5463 = vmatpush3.bf16.msra.mxu1 %v7019_v33  ;;  %v7219_v3 = vpop.f32.mrb[14].mxu1  ;;  %5449 = vmatmul.mubr.bf16.gmra.mrb[24].mxu0 %v7433_v20 }
 0x189   : > { %v7222_v61 = vpop.f32.mrb[15].mxu1  ;;  %5464 = vmatprep.subr.bf16.mxu1 %v7031_v55  ;;  %5488 = vmatprep.mubr.bf16.mxu0 %v7434_v42 }
 0x18c   : > { %5465 = vmatpush3.bf16.msra.mxu1 %v7031_v55  ;;  %v7436_v55 = vld [vmem:[#allocation5_spill] sm:$0xff] }
 0x18d   : > { %5466 = vmatprep.subr.bf16.mxu1 %v7041_v26 }
 0x18e   : > { %v7232_v46 = vpop.f32.mrb[16].mxu1 }
 0x18f   : > { %v7234_v9 = vpop.f32.mrb[17].mxu1 }
 0x190   : > { %5467 = vmatpush3.bf16.msra.mxu1 %v7041_v26  ;;  %v7237_v10 = vpop.f32.mrb[18].mxu1  ;;  %5489 = vmatmul.mubr.bf16.vlgmr.msra.gmra.mrb[0].mxu0 %v7435_v51 }
 0x191   : > { %v7240_v33 = vpop.f32.mrb[19].mxu1  ;;  %5516 = vmatprep.subr.bf16.mxu1 %v7052_v31  ;;  %5492 = vmatprep.mubr.bf16.mxu0 %v7436_v55 }
 0x193   : > { %5469 = vmatmul.mubr.bf16.vlgmr.msra.gmra.mrb[28].mxu1 %v4477_v45 }
 0x194   : > { %5517 = vmatpush3.bf16.msra.mxu1 %v7052_v31  ;;  %5532 = vmatprep.mubr.bf16.mxu1 %v7077_v17  ;;  %v7439_v17 = vld [vmem:[#allocation8_spill] sm:$0xff] }
 0x195   : > { %5518 = vmatprep.subr.bf16.mxu1 %v7090_v23 }
 0x196   : > { %v7247_v39 = vpop.f32.mrb[20].mxu1 }
 0x197   : > { %v7249_v26 = vpop.f32.mrb[21].mxu1 }
 0x198   : > { %5519 = vmatpush3.bf16.msra.mxu1 %v7090_v23  ;;  %v7252_v36 = vpop.f32.mrb[22].mxu1  ;;  %5493 = vmatmul.mubr.bf16.gmra.mrb[4].mxu0 %v7437_v63 }
 0x199   : > { %v7255_v41 = vpop.f32.mrb[23].mxu1  ;;  %5520 = vmatprep.subr.bf16.mxu1 %v7101_v62  ;;  %5496 = vmatprep.mubr.bf16.mxu0 %v7438_v22 }
 0x19c   : > { %5521 = vmatpush3.bf16.msra.mxu1 %v7101_v62  ;;  %v3499_v62 = vrot.slane %v7148_v37, 5 }
 0x19d   : > { %5522 = vmatprep.subr.bf16.mxu1 %v7110_v32 }
 0x19e   : > { %v7261_v31 = vpop.f32.mrb[24].mxu1  ;;  %v3501_v48 = vrot.slane %v3499_v62, 4 }
 0x19f   : > { %v7263_v50 = vpop.f32.mrb[25].mxu1 }
 0x1a0   : > { %5523 = vmatpush3.bf16.msra.mxu1 %v7110_v32  ;;  %v7266_v8 = vpop.f32.mrb[26].mxu1  ;;  %5497 = vmatmul.mubr.bf16.gmra.mrb[8].mxu0 %v7439_v17  ;;  %v4494_v32 = vrot.slane %v7145_v54, 9  ;;  %v7443_v54 = vld [vmem:[#allocation14_spill] sm:$0xff] }
 0x1a1   : > { %v7269_v23 = vpop.f32.mrb[27].mxu1  ;;  %5524 = vmatprep.subr.bf16.mxu1 %v7121_v11  ;;  %5500 = vmatprep.mubr.bf16.mxu0 %v7440_v27 }
 0x1a4   : > { %5525 = vmatpush3.bf16.msra.mxu1 %v7121_v11  ;;  %v3500_v11 = vsel %vm6076_vm4, %v4494_v32, %v3499_v62 }
 0x1a5   : > { %5526 = vmatprep.subr.bf16.mxu1 %v7130_v43 }
 0x1a8   : > { %5527 = vmatpush3.bf16.msra.mxu1 %v7130_v43  ;;  %5501 = vmatmul.mubr.bf16.gmra.mrb[12].mxu0 %v7441_v47  ;;  %v3503_v43 = vsel %vm6076_vm4, %v3501_v48, %v3502_v15 }
 0x1a9   : > { %5528 = vmatprep.subr.bf16.mxu1 %v7141_v25  ;;  %5504 = vmatprep.mubr.bf16.mxu0 %v7442_v4  ;;  %v4503_v37 = vcombine.low %v3500_v11, %v3503_v43 }
 0x1ac   : > { %5529 = vmatpush3.bf16.msra.mxu1 %v7141_v25 }
 0x1ad   : > { %5530 = vmatprep.subr.bf16.mxu1 %v7162_v2 }
 0x1b0   : > { %5531 = vmatpush3.bf16.msra.mxu1 %v7162_v2  ;;  %5505 = vmatmul.mubr.bf16.gmra.mrb[16].mxu0 %v7443_v54 }
 0x1b1   : > { %5508 = vmatprep.mubr.bf16.mxu0 %v7444_v7 }
 0x1b3   : > { %5533 = vmatmul.mubr.bf16.vlgmr.msra.gmra.mrb[28].mxu1 %v4503_v37 }
 0x1b8   : > { %5509 = vmatmul.mubr.bf16.gmra.mrb[20].mxu0 %v7445_v34 }
 0x1b9   : > { %5512 = vmatprep.mubr.bf16.mxu0 %v7446_v35 }
 0x1c0   : > { %5513 = vmatmul.mubr.bf16.gmra.mrb[24].mxu0 %v6638_v59 }
 0x263   : > { %v5490_v25 = vpop.f32.mrb[0].mxu0 }
 0x264   : > { %v5536_v21 = vadd.f32 %v5490_v25, %v7151_v0  ;;  %v3586_v12 = vpop.f32.mrb[1].mxu0 }
 0x265   : > { %v5537_v19 = vadd.f32 %v3586_v12, %v7154_v57  ;;  %v5491_v18 = vpop.f32.mrb[2].mxu0 }
 0x266   : > { %v5538_v2 = vadd.f32 %v5491_v18, %v7165_v38  ;;  %v3589_v1 = vpop.f32.mrb[3].mxu0  ;;  %v3988_v57 = vmul.f32 %v5536_v21, %v5536_v21 }
 0x267   : > { %v5539_v59 = vadd.f32 %v3589_v1, %v7168_v52  ;;  %v3986_v20 = vmul.f32 %v5537_v19, %v5537_v19 }
 0x268   : > { %v4585_v29 = vpack.c.bf16 %v5538_v2, %v5536_v21  ;;  %v3989_v45 = vmul.f32 %v5538_v2, %v5538_v2 }
 0x269   : > { %v4580_v0 = vpack.c.bf16 %v5539_v59, %v5537_v19  ;;  %v3943_v60 = vadd.f32 %v5539_v59, %v5537_v19  ;;  %v3987_v28 = vmul.f32 %v5539_v59, %v5539_v59 }
 0x26a   : > { %4657 = vst [vmem:[%s7301_s13 + $0x8] sm:$0xff] %v4585_v29  }
 0x26b   : > { %4581 = vst [vmem:[%s7301_s13] sm:$0xff] %v4580_v0   ;;  %v3944_v13 = vadd.f32 %v5536_v21, %v3943_v60  ;;  %v4014_v38 = vadd.f32 %v3987_v28, %v3986_v20  ;;  %v5494_v42 = vpop.f32.mrb[4].mxu0 }
 0x26c   : > { %v5540_v6 = vadd.f32 %v5494_v42, %v7177_v14  ;;  %v3602_v56 = vpop.f32.mrb[5].mxu0 }
 0x26d   : > { %v4015_v51 = vadd.f32 %v4014_v38, %v3988_v57  ;;  %v5541_v55 = vadd.f32 %v3602_v56, %v7180_v49  ;;  %v3945_v52 = vadd.f32 %v5538_v2, %v3944_v13  ;;  %v5495_v63 = vpop.f32.mrb[6].mxu0 }
 0x26e   : > { %v5542_v22 = vadd.f32 %v5495_v63, %v7183_v44  ;;  %v3605_v17 = vpop.f32.mrb[7].mxu0  ;;  %v3992_v43 = vmul.f32 %v5540_v6, %v5540_v6 }
 0x26f   : > { %v3946_v27 = vadd.f32 %v5541_v55, %v3945_v52  ;;  %v3990_v62 = vmul.f32 %v5541_v55, %v5541_v55  ;;  %v4016_v47 = vadd.f32 %v4015_v51, %v3989_v45  ;;  %v5543_v32 = vadd.f32 %v3605_v17, %v7186_v53 }
 0x270   : > { %v4595_v48 = vpack.c.bf16 %v5542_v22, %v5540_v6  ;;  %v3993_v34 = vmul.f32 %v5542_v22, %v5542_v22 }
 0x271   : > { %v4017_v15 = vadd.f32 %v4016_v47, %v3990_v62  ;;  %v4590_v14 = vpack.c.bf16 %v5543_v32, %v5541_v55  ;;  %v3947_v4 = vadd.f32 %v5543_v32, %v3946_v27  ;;  %v3991_v11 = vmul.f32 %v5543_v32, %v5543_v32 }
 0x272   : > { %4659 = vst [vmem:[%s7301_s13 + $0x18] sm:$0xff] %v4595_v48  }
 0x273   : > { %4658 = vst [vmem:[%s7301_s13 + $0x10] sm:$0xff] %v4590_v14   ;;  %v3948_v49 = vadd.f32 %v5540_v6, %v3947_v4  ;;  %v4018_v37 = vadd.f32 %v4017_v15, %v3991_v11  ;;  %v5498_v54 = vpop.f32.mrb[8].mxu0 }
 0x274   : > { %v5544_v7 = vadd.f32 %v5498_v54, %v7196_v16  ;;  %v3618_v44 = vpop.f32.mrb[9].mxu0 }
 0x275   : > { %v4019_v35 = vadd.f32 %v4018_v37, %v3992_v43  ;;  %v5545_v25 = vadd.f32 %v3618_v44, %v7198_v5  ;;  %v3949_v53 = vadd.f32 %v5542_v22, %v3948_v49  ;;  %v5499_v21 = vpop.f32.mrb[10].mxu0 }
 0x276   : > { %v5546_v12 = vadd.f32 %v5499_v21, %v7201_v40  ;;  %v3621_v19 = vpop.f32.mrb[11].mxu0  ;;  %v3996_v28 = vmul.f32 %v5544_v7, %v5544_v7 }
 0x277   : > { %v3950_v18 = vadd.f32 %v5545_v25, %v3949_v53  ;;  %v3994_v2 = vmul.f32 %v5545_v25, %v5545_v25  ;;  %v4020_v1 = vadd.f32 %v4019_v35, %v3993_v34  ;;  %v5547_v59 = vadd.f32 %v3621_v19, %v7204_v24 }
 0x278   : > { %v4605_v29 = vpack.c.bf16 %v5546_v12, %v5544_v7  ;;  %v3997_v42 = vmul.f32 %v5546_v12, %v5546_v12 }
 0x279   : > { %v4021_v20 = vadd.f32 %v4020_v1, %v3994_v2  ;;  %v4600_v16 = vpack.c.bf16 %v5547_v59, %v5545_v25  ;;  %v3951_v0 = vadd.f32 %v5547_v59, %v3950_v18  ;;  %v3995_v60 = vmul.f32 %v5547_v59, %v5547_v59 }
 0x27a   : > { %4661 = vst [vmem:[%s7301_s13 + $0x28] sm:$0xff] %v4605_v29  }
 0x27b   : > { %4660 = vst [vmem:[%s7301_s13 + $0x20] sm:$0xff] %v4600_v16   ;;  %v3952_v5 = vadd.f32 %v5544_v7, %v3951_v0  ;;  %v4022_v57 = vadd.f32 %v4021_v20, %v3995_v60  ;;  %v5502_v13 = vpop.f32.mrb[12].mxu0 }
 0x27c   : > { %v5548_v38 = vadd.f32 %v5502_v13, %v7214_v58  ;;  %v3634_v40 = vpop.f32.mrb[13].mxu0 }
 0x27d   : > { %v4023_v6 = vadd.f32 %v4022_v57, %v3996_v28  ;;  %v5549_v56 = vadd.f32 %v3634_v40, %v7216_v30  ;;  %v3953_v24 = vadd.f32 %v5546_v12, %v3952_v5  ;;  %v5503_v45 = vpop.f32.mrb[14].mxu0 }
 0x27e   : > { %v5550_v51 = vadd.f32 %v5503_v45, %v7219_v3  ;;  %v3637_v55 = vpop.f32.mrb[15].mxu0  ;;  %v4000_v48 = vmul.f32 %v5548_v38, %v5548_v38 }
 0x27f   : > { %v3954_v52 = vadd.f32 %v5549_v56, %v3953_v24  ;;  %v3998_v63 = vmul.f32 %v5549_v56, %v5549_v56  ;;  %v4024_v22 = vadd.f32 %v4023_v6, %v3997_v42  ;;  %v5551_v17 = vadd.f32 %v3637_v55, %v7222_v61 }
 0x280   : > { %v4615_v27 = vpack.c.bf16 %v5550_v51, %v5548_v38  ;;  %v4001_v11 = vmul.f32 %v5550_v51, %v5550_v51 }
 0x281   : > { %v4025_v62 = vadd.f32 %v4024_v22, %v3998_v63  ;;  %v4610_v58 = vpack.c.bf16 %v5551_v17, %v5549_v56  ;;  %v3955_v47 = vadd.f32 %v5551_v17, %v3954_v52  ;;  %v3999_v32 = vmul.f32 %v5551_v17, %v5551_v17 }
 0x282   : > { %4663 = vst [vmem:[%s7301_s13 + $0x38] sm:$0xff] %v4615_v27  }
 0x283   : > { %4662 = vst [vmem:[%s7301_s13 + $0x30] sm:$0xff] %v4610_v58   ;;  %v3956_v30 = vadd.f32 %v5548_v38, %v3955_v47  ;;  %v4026_v15 = vadd.f32 %v4025_v62, %v3999_v32  ;;  %v5506_v14 = vpop.f32.mrb[16].mxu0 }
 0x284   : > { %v5552_v4 = vadd.f32 %v5506_v14, %v7232_v46  ;;  %v3650_v3 = vpop.f32.mrb[17].mxu0 }
 0x285   : > { %v4027_v43 = vadd.f32 %v4026_v15, %v4000_v48  ;;  %v5553_v49 = vadd.f32 %v3650_v3, %v7234_v9  ;;  %v3957_v37 = vadd.f32 %v5550_v51, %v3956_v30  ;;  %v5507_v61 = vpop.f32.mrb[18].mxu0 }
 0x286   : > { %v5534_v54 = vpop.f32.mrb[28].mxu1  ;;  %v5554_v7 = vadd.f32 %v5507_v61, %v7237_v10  ;;  %v3653_v44 = vpop.f32.mrb[19].mxu0  ;;  %v4004_v20 = vmul.f32 %v5552_v4, %v5552_v4 }
 0x287   : > { %v3735_v34 = vpop.f32.mrb[29].mxu1  ;;  %v3958_v35 = vadd.f32 %v5553_v49, %v3957_v37  ;;  %v4002_v25 = vmul.f32 %v5553_v49, %v5553_v49  ;;  %v4028_v53 = vadd.f32 %v4027_v43, %v4001_v11  ;;  %v5555_v46 = vadd.f32 %v3653_v44, %v7240_v33 }
 0x288   : > { %v5535_v21 = vpop.f32.mrb[30].mxu1  ;;  %v4625_v12 = vpack.c.bf16 %v5554_v7, %v5552_v4  ;;  %v4047_v19 = vmul.f32 %v3735_v34, %v3735_v34  ;;  %v4049_v28 = vmul.f32 %v5534_v54, %v5534_v54  ;;  %v4005_v38 = vmul.f32 %v5554_v7, %v5554_v7 }
 0x289   : > { %v4655_v18 = vpack.c.bf16 %v5535_v21, %v5534_v54  ;;  %v4029_v9 = vadd.f32 %v4028_v53, %v4002_v25  ;;  %v3738_v2 = vpop.f32.mrb[31].mxu1  ;;  %v4620_v29 = vpack.c.bf16 %v5555_v46, %v5553_v49  ;;  %v3959_v16 = vadd.f32 %v5555_v46, %v3958_v35 }
 0x28a   : > { %v4650_v1 = vpack.c.bf16 %v3738_v2, %v3735_v34  ;;  %v3976_v59 = vadd.f32 %v3738_v2, %v3735_v34  ;;  %v4048_v10 = vmul.f32 %v3738_v2, %v3738_v2  ;;  %4665 = vst [vmem:[%s7301_s13 + $0x48] sm:$0xff] %v4625_v12   ;;  %v4003_v0 = vmul.f32 %v5555_v46, %v5555_v46 }
 0x28b   : > { %4671 = vst [vmem:[%s7301_s13 + $0x78] sm:$0xff] %v4655_v18   ;;  %v5510_v60 = vpop.f32.mrb[20].mxu0  ;;  %4664 = vst [vmem:[%s7301_s13 + $0x40] sm:$0xff] %v4620_v29   ;;  %v3960_v40 = vadd.f32 %v5552_v4, %v3959_v16  ;;  %v4050_v24 = vmul.f32 %v5535_v21, %v5535_v21 }
 0x28c   : > { %4670 = vst [vmem:[%s7301_s13 + $0x70] sm:$0xff] %v4650_v1   ;;  %v3977_v5 = vadd.f32 %v5534_v54, %v3976_v59  ;;  %v4051_v33 = vadd.f32 %v4048_v10, %v4047_v19  ;;  %v5556_v57 = vadd.f32 %v5510_v60, %v7247_v39  ;;  %v3666_v13 = vpop.f32.mrb[21].mxu0  ;;  %v4030_v42 = vadd.f32 %v4029_v9, %v4003_v0 }
 0x28d   : > { %v5557_v6 = vadd.f32 %v3666_v13, %v7249_v26  ;;  %v5511_v56 = vpop.f32.mrb[22].mxu0  ;;  %v3961_v22 = vadd.f32 %v5554_v7, %v3960_v40 }
 0x28e   : > { %v3978_v45 = vadd.f32 %v5535_v21, %v3977_v5  ;;  %v4052_v51 = vadd.f32 %v4051_v33, %v4049_v28  ;;  %v5558_v55 = vadd.f32 %v5511_v56, %v7252_v36  ;;  %v3669_v52 = vpop.f32.mrb[23].mxu0  ;;  %v4031_v63 = vadd.f32 %v4030_v42, %v4004_v20 }
 0x28f   : > { %v4006_v17 = vmul.f32 %v5557_v6, %v5557_v6  ;;  %v5559_v39 = vadd.f32 %v3669_v52, %v7255_v41  ;;  %v3962_v58 = vadd.f32 %v5557_v6, %v3961_v22  ;;  %v4008_v4 = vmul.f32 %v5556_v57, %v5556_v57 }
 0x290   : > { %v4053_v27 = vadd.f32 %v4052_v51, %v4050_v24  ;;  %v4635_v62 = vpack.c.bf16 %v5558_v55, %v5556_v57  ;;  %v4032_v47 = vadd.f32 %v4031_v63, %v4005_v38  ;;  %v3979_v49 = vrot.slane %v3978_v45, 4 }
 0x291   : > { %v4630_v32 = vpack.c.bf16 %v5559_v39, %v5557_v6  ;;  %v4007_v26 = vmul.f32 %v5559_v39, %v5559_v39  ;;  %v3963_v30 = vadd.f32 %v5559_v39, %v3962_v58  ;;  %v4009_v37 = vmul.f32 %v5558_v55, %v5558_v55 }
 0x292   : > { %4667 = vst [vmem:[%s7301_s13 + $0x58] sm:$0xff] %v4635_v62   ;;  %v4033_v48 = vadd.f32 %v4032_v47, %v4006_v17 }
 0x293   : > { %4666 = vst [vmem:[%s7301_s13 + $0x50] sm:$0xff] %v4630_v32   ;;  %v5514_v15 = vpop.f32.mrb[24].mxu0  ;;  %v3964_v3 = vadd.f32 %v5556_v57, %v3963_v30 }
 0x294   : > { %v5560_v14 = vadd.f32 %v5514_v15, %v7261_v31  ;;  %v3682_v36 = vpop.f32.mrb[25].mxu0  ;;  %v4034_v11 = vadd.f32 %v4033_v48, %v4007_v26  ;;  %v4054_v31 = vrot.slane %v4053_v27, 4 }
 0x295   : > { %v5561_v43 = vadd.f32 %v3682_v36, %v7263_v50  ;;  %v5515_v41 = vpop.f32.mrb[26].mxu0  ;;  %v3965_v44 = vadd.f32 %v5558_v55, %v3964_v3  ;;  %v3980_v50 = vadd.f32 %v3979_v49, %v3978_v45 }
 0x296   : > { %v5562_v61 = vadd.f32 %v5515_v41, %v7266_v8  ;;  %v3685_v54 = vpop.f32.mrb[27].mxu0  ;;  %v4035_v7 = vadd.f32 %v4034_v11, %v4008_v4  ;;  %v4055_v9 = vadd.f32 %v4054_v31, %v4053_v27  ;;  %v4012_v2 = vmul.f32 %v5560_v14, %v5560_v14 }
 0x297   : > { %v4010_v34 = vmul.f32 %v5561_v43, %v5561_v43  ;;  %v5563_v35 = vadd.f32 %v3685_v54, %v7269_v23  ;;  %v3966_v53 = vadd.f32 %v5561_v43, %v3965_v44  ;;  %v3981_v59 = vrot.slane %v3980_v50, 2 }
 0x298   : > { %v4645_v25 = vpack.c.bf16 %v5562_v61, %v5560_v14  ;;  %v4036_v21 = vadd.f32 %v4035_v7, %v4009_v37  ;;  %v4013_v10 = vmul.f32 %v5562_v61, %v5562_v61  ;;  %v4056_v23 = vrot.slane %v4055_v9, 2 }
 0x299   : > { %v4640_v12 = vpack.c.bf16 %v5563_v35, %v5561_v43  ;;  %v4011_v46 = vmul.f32 %v5563_v35, %v5563_v35  ;;  %v3967_v18 = vadd.f32 %v5563_v35, %v3966_v53  ;;  %v3982_v60 = vadd.f32 %v3981_v59, %v3980_v50 }
 0x29a   : > { %4669 = vst [vmem:[%s7301_s13 + $0x68] sm:$0xff] %v4645_v25   ;;  %v4037_v19 = vadd.f32 %v4036_v21, %v4010_v34  ;;  %v4057_v33 = vadd.f32 %v4056_v23, %v4055_v9 }
 0x29b   : > { %4668 = vst [vmem:[%s7301_s13 + $0x60] sm:$0xff] %v4640_v12   ;;  %v3968_v8 = vadd.f32 %v5560_v14, %v3967_v18  ;;  %v3983_v38 = vrot.slane %v3982_v60, 1 }
 0x29c   : > { %v4038_v1 = vadd.f32 %v4037_v19, %v4011_v46  ;;  %v4058_v6 = vrot.slane %v4057_v33, 1 }
 0x29d   : > { %v3969_v29 = vadd.f32 %v5562_v61, %v3968_v8  ;;  %v3984_v45 = vadd.f32 %v3983_v38, %v3982_v60 }
 0x29e   : > { %v4039_v20 = vadd.f32 %v4038_v1, %v4012_v2  ;;  %v4059_v52 = vadd.f32 %v4058_v6, %v4057_v33 }
 0x29f   : > { %v3970_v16 = vrot.slane %v3969_v29, 4 }
 0x2a0   : > { %v4040_v0 = vadd.f32 %v4039_v20, %v4013_v10 }
 0x2a1   : > { %v3971_v28 = vadd.f32 %v3970_v16, %v3969_v29 }
 0x2a2   : > { %v4041_v5 = vrot.slane %v4040_v0, 4 }
 0x2a3   : > { %v3972_v57 = vrot.slane %v3971_v28, 2 }
 0x2a4   : > { %v4042_v13 = vadd.f32 %v4041_v5, %v4040_v0 }
 0x2a5   : > { %v3973_v40 = vadd.f32 %v3972_v57, %v3971_v28 }
 0x2a6   : > { %v4043_v42 = vrot.slane %v4042_v13, 2 }
 0x2a7   : > { %v3974_v56 = vrot.slane %v3973_v40, 1 }
 0x2a8   : > { %v4044_v24 = vadd.f32 %v4043_v42, %v4042_v13 }
 0x2a9   : > { %v3975_v51 = vadd.f32 %v3974_v56, %v3973_v40 }
 0x2aa   : > { %v4045_v55 = vrot.slane %v4044_v24, 1 }
 0x2ab   : > { %v3985_v63 = vadd.f32 %v3984_v45, %v3975_v51 }
 0x2ac   : > { %v4046_v22 = vadd.f32 %v4045_v55, %v4044_v24 }
 0x2ae   : > { %v4060_v17 = vadd.f32 %v4059_v52, %v4046_v22 }
 0x2b0   : > { %v4062_v39 = vsel %vm4061_vm6, %v3985_v63, %v4060_v17 }
 0x2b1   : > { %4063 = vst [vmem:[%s338_s21] sm:$0x3] %v4062_v39 }
 0x2b2 PF: > { %s15_s17 = sadd.s32 1, %s5954_s17   ;;  %s7447_s15 = smov %s5950_s16 }
 0x2b3   : > { %p12_p5 = scmp.ge.s32.totalorder %s15_s17, 4   ;;  %s7448_s16 = smov %s7450_s18 }
 0x2b5   :  { %14 = sbr.rel (!%p12_p5) target bundleno = 2 (0x2), region = 86 }

</bundles_post_ra>
